<compile_context>
chip_gen: v5e
topology: v5e:2x2
jax: 0.10.0
libtpu: 0.0.40
codegen_flags: <defaults>
</compile_context>

<pallas_src>
import functools

import jax
import jax.numpy as jnp
from jax import lax
from jax.experimental import pallas as pl
from jax.experimental.pallas import tpu as pltpu


def _attention_kernel(xq_ref, xkv_ref, wqkv_ref, wout_ref, bout_ref, o_ref,
                      k_scr, v_scr, q_scr, acc_scr, m_scr, l_scr, ctx_scr, kvst_scr,
                      *, heads, dim_head, scale, nk):
    """One (batch, q_tile, kv_tile) grid step.

    xq_ref   : (tq,  dim)   x rows for this q-tile             (compute dtype)
    xkv_ref  : (tkv, dim)   x rows for this kv-tile (read only at qi == 0)
    wqkv_ref : (dim, 3*inner), wout_ref : (inner, dim), bout_ref : (1, dim) f32
    o_ref    : (tq, dim)    output tile (written on the last kv step)
    k_scr/v_scr : (heads*nk, tkv, dim_head)  head-major per-batch K/V cache
    q_scr    : (heads, tq, dim_head)  pre-scaled Q, head-major  (compute dtype)
    acc_scr  : (heads, tq, dim_head)  f32 un-normalized attention output
    m_scr/l_scr : (heads, tq, 1) f32 online-softmax statistics
    ctx_scr  : (tq, inner)  staging buffer (Q scatter at ki==0, out-proj operand)
    kvst_scr : (tkv, 2*inner) staging buffer for the K/V projection result
    """
    qi = pl.program_id(1)
    ki = pl.program_id(2)
    inner = heads * dim_head
    cdt = q_scr.dtype  # matmul compute dtype; accumulation / stats stay f32

    # ---- K/V projection: ONCE per (batch, kv-tile). Grid order is (b, qi, ki), so
    #      qi == 0 visits every ki first and fills the head-major VMEM cache that all
    #      later q-tiles of this batch reuse (removes the (nq-1)/nq redundant FLOPs).
    @pl.when(qi == 0)
    def _project_kv():
        kvst_scr[...] = jnp.dot(xkv_ref[...], wqkv_ref[:, inner:],
                                preferred_element_type=jnp.float32).astype(cdt)
        for h in range(heads):  # cold path: lane re-pack paid once per (batch, kv-tile)
            k_scr[h * nk + ki] = kvst_scr[:, h * dim_head:(h + 1) * dim_head]
            v_scr[h * nk + ki] = kvst_scr[:, inner + h * dim_head:
                                          inner + (h + 1) * dim_head]

    # ---- Q projection + softmax-state init: once per (batch, q-tile). Scale folded
    #      into Q (O(n*inner) multiplies instead of O(n^2)).
    @pl.when(ki == 0)
    def _project_q():
        ctx_scr[...] = (jnp.dot(xq_ref[...], wqkv_ref[:, :inner],
                                preferred_element_type=jnp.float32)
                        * scale).astype(cdt)
        for h in range(heads):  # cold path: once per (batch, q-tile)
            q_scr[h] = ctx_scr[:, h * dim_head:(h + 1) * dim_head]
        m_scr[...] = jnp.full(m_scr.shape, -jnp.inf, dtype=m_scr.dtype)
        l_scr[...] = jnp.zeros(l_scr.shape, dtype=l_scr.dtype)
        acc_scr[...] = jnp.zeros(acc_scr.shape, dtype=acc_scr.dtype)

    # ---- Hot path: online-softmax update for every head with this kv tile. All
    #      per-head state lives in scratch refs with aligned leading-axis indexing.
    def head_body(h, carry):
        qh = q_scr[h]                         # (tq,  d), pre-scaled
        kh = k_scr[h * nk + ki]               # (tkv, d)
        vh = v_scr[h * nk + ki]               # (tkv, d)
        s = lax.dot_general(qh, kh, (((1,), (1,)), ((), ())),
                            preferred_element_type=jnp.float32)       # (tq, tkv)
        m_prev = m_scr[h]                                              # (tq, 1)
        m_new = jnp.maximum(m_prev, jnp.max(s, axis=-1, keepdims=True))
        alpha = jnp.exp(m_prev - m_new)
        p = jnp.exp(s - m_new)                                         # (tq, tkv)
        l_scr[h] = alpha * l_scr[h] + jnp.sum(p, axis=-1, keepdims=True)
        acc_scr[h] = alpha * acc_scr[h] + jnp.dot(p.astype(cdt), vh,
                                                  preferred_element_type=jnp.float32)
        m_scr[h] = m_new
        return carry

    lax.fori_loop(0, heads, head_body, 0, unroll=True)

    # ---- Finalize: EXACT normalization (fixes previous approx-reciprocal mismatch),
    #      one lane re-pack into (tq, inner), then a single fused wide out-proj + bias.
    @pl.when(ki == nk - 1)
    def _finalize():
        for h in range(heads):
            ctx_scr[:, h * dim_head:(h + 1) * dim_head] = (
                acc_scr[h] * (1.0 / l_scr[h])).astype(cdt)
        out = jnp.dot(ctx_scr[...], wout_ref[...],
                      preferred_element_type=jnp.float32)
        o_ref[...] = (out + bout_ref[...].astype(jnp.float32)).astype(o_ref.dtype)


def attention(x, w_qkv, w_out, b_out, *, heads, dim_head,
              q_tile=256, kv_tile=256, compute_dtype=None):
    """Fused multi-head self-attention (mask=None, dropout=0.0, with output bias).

    compute_dtype: dtype of matmul operands (jnp.bfloat16 for MXU peak on v6e/v7x);
                   accumulation and softmax statistics stay in f32. Default: x.dtype.
    q_tile/kv_tile: sequence tile sizes (clamped to the sequence length). 256 fills
                   the v6e/v7x MXU edge; use 128 on v5e if the EUP exp becomes binding.
    """
    b, n, dim = x.shape
    inner = heads * dim_head
    assert w_qkv.shape == (dim, 3 * inner), w_qkv.shape
    assert w_out.shape == (inner, dim), w_out.shape
    assert b_out.shape == (dim,), b_out.shape
    scale = float(dim_head) ** -0.5
    cdt = x.dtype if compute_dtype is None else compute_dtype

    tq = min(q_tile, n)
    tkv = min(kv_tile, n)
    assert n % tq == 0 and n % tkv == 0, "seq length must divide the tile sizes"
    nq, nk = n // tq, n // tkv

    xc = x.astype(cdt)
    wqc = w_qkv.astype(cdt)
    woc = w_out.astype(cdt)
    boc = b_out.reshape(1, dim).astype(jnp.float32)

    kernel = functools.partial(_attention_kernel, heads=heads, dim_head=dim_head,
                               scale=scale, nk=nk)

    # ---- VMEM footprint estimate -> scoped-vmem limit (v5e default is only 16 MiB).
    def _pad(v, m):
        return -(-v // m) * m

    csz = jnp.dtype(cdt).itemsize
    osz = jnp.dtype(x.dtype).itemsize
    d_pad = _pad(dim_head, 128)
    dim_pad = _pad(dim, 128)
    inner_pad = _pad(inner, 128)
    vmem_est = (
        2 * _pad(tq, 8) * dim_pad * csz                 # xq blocks (double-buffered)
        + 2 * _pad(tkv, 8) * dim_pad * csz              # xkv blocks
        + 2 * _pad(dim, 8) * 3 * inner_pad * csz        # wqkv (2 buffers)
        + 2 * _pad(inner, 8) * dim_pad * csz            # wout (2 buffers)
        + 2 * 8 * dim_pad * 4                           # bias
        + 2 * _pad(tq, 8) * dim_pad * osz               # output blocks
        + 2 * heads * _pad(n, 8) * d_pad * csz          # K + V cache
        + heads * _pad(tq, 8) * d_pad * (csz + 4)       # Q + acc
        + 2 * heads * _pad(tq, 8) * 128 * 4             # m + l
        + _pad(tq, 8) * inner_pad * csz                 # ctx staging
        + _pad(tkv, 8) * 2 * inner_pad * csz            # kv staging
    )
    vmem_limit = min(max(int(vmem_est * 3 // 2) + (1 << 20), 32 << 20), 100 << 20)

    # ---- Advisory cost estimate (K/V projection counted once per row after de-dup).
    flops = int(2 * b * n * dim * inner                 # Q projection
                + 2 * b * n * dim * 2 * inner           # K/V projection
                + 4 * b * heads * n * n * dim_head      # q@k^T and p@v
                + 2 * b * n * inner * dim)              # output projection
    transcendentals = int(b * heads * n * n)
    bytes_accessed = int(2 * b * n * dim * csz
                         + (dim * 3 * inner + inner * dim) * csz + dim * 4
                         + b * n * dim * osz)

    return pl.pallas_call(
        kernel,
        out_shape=jax.ShapeDtypeStruct((b, n, dim), x.dtype),
        grid_spec=pltpu.PrefetchScalarGridSpec(
            num_scalar_prefetch=0,
            grid=(b, nq, nk),
            in_specs=[
                # x rows for the current q-tile (batch dim squeezed away).
                pl.BlockSpec((pl.Squeezed(), tq, dim), lambda bi, qi, ki: (bi, qi, 0)),
                # x rows for the kv-tile: only consumed at qi == 0; for qi > 0 the
                # index map sticks to the last fetched block so no re-DMA happens.
                pl.BlockSpec((pl.Squeezed(), tkv, dim),
                             lambda bi, qi, ki: (bi, jnp.where(qi == 0, ki, nk - 1), 0)),
                # Weights + bias stay resident in VMEM across the whole grid.
                pl.BlockSpec((dim, 3 * inner), lambda bi, qi, ki: (0, 0)),
                pl.BlockSpec((inner, dim), lambda bi, qi, ki: (0, 0)),
                pl.BlockSpec((1, dim), lambda bi, qi, ki: (0, 0)),
            ],
            out_specs=pl.BlockSpec((pl.Squeezed(), tq, dim),
                                   lambda bi, qi, ki: (bi, qi, 0)),
            scratch_shapes=[
                pltpu.VMEM((heads * nk, tkv, dim_head), cdt),    # K cache (head-major)
                pltpu.VMEM((heads * nk, tkv, dim_head), cdt),    # V cache (head-major)
                pltpu.VMEM((heads, tq, dim_head), cdt),          # scaled Q (head-major)
                pltpu.VMEM((heads, tq, dim_head), jnp.float32),  # acc (head-major)
                pltpu.VMEM((heads, tq, 1), jnp.float32),         # running max m
                pltpu.VMEM((heads, tq, 1), jnp.float32),         # running denom l
                pltpu.VMEM((tq, inner), cdt),                    # ctx / Q staging
                pltpu.VMEM((tkv, 2 * inner), cdt),               # K/V projection staging
            ]),
        compiler_params=pltpu.CompilerParams(
            # qi must stay un-sharded ("arbitrary") so the qi==0 K/V cache fill and
            # its consumers run on the same core; megacore split comes from batch.
            dimension_semantics=("parallel", "arbitrary", "arbitrary"),
            vmem_limit_bytes=vmem_limit),
        cost_estimate=pl.CostEstimate(flops=flops, transcendentals=transcendentals,
                                      bytes_accessed=bytes_accessed),
    )(xc, xc, wqc, woc, boc)


def attention_ref(x, w_qkv, w_out, b_out, *, heads, dim_head):
    """Pure-JAX reference mirroring the PyTorch forward (mask=None, dropout=0.0)."""
    b, n, dim = x.shape
    inner = heads * dim_head
    scale = float(dim_head) ** -0.5
    qkv = jnp.einsum('bnd,de->bne', x, w_qkv, precision='highest')
    q, k, v = jnp.split(qkv, 3, axis=-1)

    def to_heads(t):
        return t.reshape(b, n, heads, dim_head).transpose(0, 2, 1, 3)   # (b,h,n,d)

    q, k, v = map(to_heads, (q, k, v))
    dots = jnp.einsum('bhid,bhjd->bhij', q, k, precision='highest') * scale
    attn = jax.nn.softmax(dots, axis=-1)
    out = jnp.einsum('bhij,bhjd->bhid', attn, v, precision='highest')
    out = out.transpose(0, 2, 1, 3).reshape(b, n, inner)
    return jnp.einsum('bne,ed->bnd', out, w_out, precision='highest') + b_out


if __name__ == "__main__":
    heads, dim_head = 8, 64              # PyTorch module defaults
    inner = heads * dim_head

    key = jax.random.PRNGKey(0)
    kx1, kx2, kq, ko, kb = jax.random.split(key, 5)

    # Small shapes consistent with the module's forward: x is (b, n, dim).
    b, n, dim = 2, 8, 32
    x1 = jax.random.normal(kx1, (b, n, dim), dtype=jnp.float32)
    # PyTorch stores Linear weights as (out, in); pass them pre-transposed (in, out).
    w_qkv = jax.random.normal(kq, (dim, 3 * inner), dtype=jnp.float32) * (dim ** -0.5)
    w_out = jax.random.normal(ko, (inner, dim), dtype=jnp.float32) * (inner ** -0.5)
    b_out = jax.random.normal(kb, (dim,), dtype=jnp.float32) * 0.1

    # Case 1: single-tile f32 path.
    ref1 = attention_ref(x1, w_qkv, w_out, b_out, heads=heads, dim_head=dim_head)
    out1 = jax.block_until_ready(
        attention(x1, w_qkv, w_out, b_out, heads=heads, dim_head=dim_head))
    assert out1.shape == (b, n, dim)
    assert jnp.allclose(out1, ref1, atol=2e-2, rtol=2e-2), "f32 single-tile mismatch"

    # Case 2: multi-tile f32 path — exercises the per-batch K/V VMEM cache and the
    # online softmax across several kv tiles (tiny tiles used only to force nq=nk=4).
    n2 = 32
    x2 = jax.random.normal(kx2, (b, n2, dim), dtype=jnp.float32)
    ref2 = attention_ref(x2, w_qkv, w_out, b_out, heads=heads, dim_head=dim_head)
    out2 = jax.block_until_ready(
        attention(x2, w_qkv, w_out, b_out, heads=heads, dim_head=dim_head,
                  q_tile=8, kv_tile=8))
    assert jnp.allclose(out2, ref2, atol=2e-2, rtol=2e-2), "f32 multi-tile mismatch"

    # Case 3: bf16 fast path — matmul operands in bf16, f32 accumulation/statistics.
    out3 = jax.block_until_ready(
        attention(x2, w_qkv, w_out, b_out, heads=heads, dim_head=dim_head,
                  q_tile=16, kv_tile=16, compute_dtype=jnp.bfloat16))
    assert jnp.allclose(out3, ref2, atol=1e-1, rtol=1e-1), "bf16 kernel mismatch"

    print("KERNEL_OK")
</pallas_src>

<mosaic_0001>
module attributes {stable_mosaic.version = 11 : i64} {
  func.func @_attention_kernel(%arg0: i32, %arg1: i32, %arg2: i32, %arg3: memref<1x8x32xf32, #tpu.memory_space<vmem>>, %arg4: memref<1x8x32xf32, #tpu.memory_space<vmem>>, %arg5: memref<32x1536xf32, #tpu.memory_space<vmem>>, %arg6: memref<512x32xf32, #tpu.memory_space<vmem>>, %arg7: memref<1x32xf32, #tpu.memory_space<vmem>>, %arg8: memref<1x8x32xf32, #tpu.memory_space<vmem>>, %arg9: memref<8x8x64xf32, #tpu.memory_space<vmem>>, %arg10: memref<8x8x64xf32, #tpu.memory_space<vmem>>, %arg11: memref<8x8x64xf32, #tpu.memory_space<vmem>>, %arg12: memref<8x8x64xf32, #tpu.memory_space<vmem>>, %arg13: memref<8x8x1xf32, #tpu.memory_space<vmem>>, %arg14: memref<8x8x1xf32, #tpu.memory_space<vmem>>, %arg15: memref<8x512xf32, #tpu.memory_space<vmem>>, %arg16: memref<8x1024xf32, #tpu.memory_space<vmem>>) attributes {dimension_semantics = [#tpu.dimension_semantics<parallel>, #tpu.dimension_semantics<arbitrary>, #tpu.dimension_semantics<arbitrary>], iteration_bounds = array<i64: 2, 1, 1>, scalar_prefetch = 0 : i64, scratch_operands = 8 : i64, tpu.core_type = #tpu.core_type<tc>, window_params = [{transform_indices = @transform_0, window_bounds = array<i64: 1, 8, 32>}, {transform_indices = @transform_1, window_bounds = array<i64: 1, 8, 32>}, {pipeline_mode = #tpu.pipeline_mode<synchronous>, transform_indices = @transform_2, window_bounds = array<i64: 32, 1536>}, {pipeline_mode = #tpu.pipeline_mode<synchronous>, transform_indices = @transform_3, window_bounds = array<i64: 512, 32>}, {pipeline_mode = #tpu.pipeline_mode<synchronous>, transform_indices = @transform_4, window_bounds = array<i64: 1, 32>}, {transform_indices = @transform_5, window_bounds = array<i64: 1, 8, 32>}]} {
    %c0_i32 = arith.constant 0 : i32
    %0 = arith.cmpi eq, %arg1, %c0_i32 : i32
    %1 = arith.extui %0 : i1 to i32
    %c0_i32_0 = arith.constant 0 : i32
    %2 = arith.cmpi ne, %1, %c0_i32_0 : i32
    scf.if %2 {
      %c0_196 = arith.constant 0 : index
      %c0_197 = arith.constant 0 : index
      %c0_198 = arith.constant 0 : index
      %417 = vector.load %arg4[%c0_196, %c0_197, %c0_198] : memref<1x8x32xf32, #tpu.memory_space<vmem>>, vector<1x8x32xf32>
      %418 = vector.shape_cast %417 : vector<1x8x32xf32> to vector<8x32xf32>
      %c0_199 = arith.constant 0 : index
      %c512 = arith.constant 512 : index
      %419 = vector.load %arg5[%c0_199, %c512] : memref<32x1536xf32, #tpu.memory_space<vmem>>, vector<32x1024xf32>
      %cst_200 = arith.constant dense<0.000000e+00> : vector<8x1024xf32>
      %420 = tpu.matmul %418, %419, %cst_200 {dimension_numbers = #tpu.dot_dimension_numbers<[1], [0], [0], [1], [0, 0, 1, 1], [], []>} : vector<8x32xf32>, vector<32x1024xf32>, vector<8x1024xf32> -> vector<8x1024xf32>
      %c0_201 = arith.constant 0 : index
      %c0_202 = arith.constant 0 : index
      %421 = vector.load %arg16[%c0_201, %c0_202] : memref<8x1024xf32, #tpu.memory_space<vmem>>, vector<8x1024xf32>
      tpu.vector_store %arg16[%c0_201, %c0_202], %420 {strides = array<i32>} : memref<8x1024xf32, #tpu.memory_space<vmem>>, vector<8x1024xf32>,
      %c0_203 = arith.constant 0 : index
      %c0_204 = arith.constant 0 : index
      %422 = vector.load %arg16[%c0_203, %c0_204] : memref<8x1024xf32, #tpu.memory_space<vmem>>, vector<8x64xf32>
      %c0_i32_205 = arith.constant 0 : i32
      %423 = arith.addi %c0_i32_205, %arg2 : i32
      %424 = arith.index_cast %423 : i32 to index
      %c0_206 = arith.constant 0 : index
      %c0_207 = arith.constant 0 : index
      %425 = vector.load %arg9[%424, %c0_206, %c0_207] : memref<8x8x64xf32, #tpu.memory_space<vmem>>, vector<1x8x64xf32>
      %426 = vector.shape_cast %425 : vector<1x8x64xf32> to vector<8x64xf32>
      %427 = vector.shape_cast %422 : vector<8x64xf32> to vector<1x8x64xf32>
      tpu.vector_store %arg9[%424, %c0_206, %c0_207], %427 {strides = array<i32>} : memref<8x8x64xf32, #tpu.memory_space<vmem>>, vector<1x8x64xf32>,
      %c0_208 = arith.constant 0 : index
      %c512_209 = arith.constant 512 : index
      %428 = vector.load %arg16[%c0_208, %c512_209] : memref<8x1024xf32, #tpu.memory_space<vmem>>, vector<8x64xf32>
      %c0_i32_210 = arith.constant 0 : i32
      %429 = arith.addi %c0_i32_210, %arg2 : i32
      %430 = arith.index_cast %429 : i32 to index
      %c0_211 = arith.constant 0 : index
      %c0_212 = arith.constant 0 : index
      %431 = vector.load %arg10[%430, %c0_211, %c0_212] : memref<8x8x64xf32, #tpu.memory_space<vmem>>, vector<1x8x64xf32>
      %432 = vector.shape_cast %431 : vector<1x8x64xf32> to vector<8x64xf32>
      %433 = vector.shape_cast %428 : vector<8x64xf32> to vector<1x8x64xf32>
      tpu.vector_store %arg10[%430, %c0_211, %c0_212], %433 {strides = array<i32>} : memref<8x8x64xf32, #tpu.memory_space<vmem>>, vector<1x8x64xf32>,
      %c0_213 = arith.constant 0 : index
      %c64 = arith.constant 64 : index
      %434 = vector.load %arg16[%c0_213, %c64] : memref<8x1024xf32, #tpu.memory_space<vmem>>, vector<8x64xf32>
      %c1_i32_214 = arith.constant 1 : i32
      %435 = arith.addi %c1_i32_214, %arg2 : i32
      %436 = arith.index_cast %435 : i32 to index
      %c0_215 = arith.constant 0 : index
      %c0_216 = arith.constant 0 : index
      %437 = vector.load %arg9[%436, %c0_215, %c0_216] : memref<8x8x64xf32, #tpu.memory_space<vmem>>, vector<1x8x64xf32>
      %438 = vector.shape_cast %437 : vector<1x8x64xf32> to vector<8x64xf32>
      %439 = vector.shape_cast %434 : vector<8x64xf32> to vector<1x8x64xf32>
      tpu.vector_store %arg9[%436, %c0_215, %c0_216], %439 {strides = array<i32>} : memref<8x8x64xf32, #tpu.memory_space<vmem>>, vector<1x8x64xf32>,
      %c0_217 = arith.constant 0 : index
      %c576 = arith.constant 576 : index
      %440 = vector.load %arg16[%c0_217, %c576] : memref<8x1024xf32, #tpu.memory_space<vmem>>, vector<8x64xf32>
      %c1_i32_218 = arith.constant 1 : i32
      %441 = arith.addi %c1_i32_218, %arg2 : i32
      %442 = arith.index_cast %441 : i32 to index
      %c0_219 = arith.constant 0 : index
      %c0_220 = arith.constant 0 : index
      %443 = vector.load %arg10[%442, %c0_219, %c0_220] : memref<8x8x64xf32, #tpu.memory_space<vmem>>, vector<1x8x64xf32>
      %444 = vector.shape_cast %443 : vector<1x8x64xf32> to vector<8x64xf32>
      %445 = vector.shape_cast %440 : vector<8x64xf32> to vector<1x8x64xf32>
      tpu.vector_store %arg10[%442, %c0_219, %c0_220], %445 {strides = array<i32>} : memref<8x8x64xf32, #tpu.memory_space<vmem>>, vector<1x8x64xf32>,
      %c0_221 = arith.constant 0 : index
      %c128 = arith.constant 128 : index
      %446 = vector.load %arg16[%c0_221, %c128] : memref<8x1024xf32, #tpu.memory_space<vmem>>, vector<8x64xf32>
      %c2_i32_222 = arith.constant 2 : i32
      %447 = arith.addi %c2_i32_222, %arg2 : i32
      %448 = arith.index_cast %447 : i32 to index
      %c0_223 = arith.constant 0 : index
      %c0_224 = arith.constant 0 : index
      %449 = vector.load %arg9[%448, %c0_223, %c0_224] : memref<8x8x64xf32, #tpu.memory_space<vmem>>, vector<1x8x64xf32>
      %450 = vector.shape_cast %449 : vector<1x8x64xf32> to vector<8x64xf32>
      %451 = vector.shape_cast %446 : vector<8x64xf32> to vector<1x8x64xf32>
      tpu.vector_store %arg9[%448, %c0_223, %c0_224], %451 {strides = array<i32>} : memref<8x8x64xf32, #tpu.memory_space<vmem>>, vector<1x8x64xf32>,
      %c0_225 = arith.constant 0 : index
      %c640 = arith.constant 640 : index
      %452 = vector.load %arg16[%c0_225, %c640] : memref<8x1024xf32, #tpu.memory_space<vmem>>, vector<8x64xf32>
      %c2_i32_226 = arith.constant 2 : i32
      %453 = arith.addi %c2_i32_226, %arg2 : i32
      %454 = arith.index_cast %453 : i32 to index
      %c0_227 = arith.constant 0 : index
      %c0_228 = arith.constant 0 : index
      %455 = vector.load %arg10[%454, %c0_227, %c0_228] : memref<8x8x64xf32, #tpu.memory_space<vmem>>, vector<1x8x64xf32>
      %456 = vector.shape_cast %455 : vector<1x8x64xf32> to vector<8x64xf32>
      %457 = vector.shape_cast %452 : vector<8x64xf32> to vector<1x8x64xf32>
      tpu.vector_store %arg10[%454, %c0_227, %c0_228], %457 {strides = array<i32>} : memref<8x8x64xf32, #tpu.memory_space<vmem>>, vector<1x8x64xf32>,
      %c0_229 = arith.constant 0 : index
      %c192 = arith.constant 192 : index
      %458 = vector.load %arg16[%c0_229, %c192] : memref<8x1024xf32, #tpu.memory_space<vmem>>, vector<8x64xf32>
      %c3_i32_230 = arith.constant 3 : i32
      %459 = arith.addi %c3_i32_230, %arg2 : i32
      %460 = arith.index_cast %459 : i32 to index
      %c0_231 = arith.constant 0 : index
      %c0_232 = arith.constant 0 : index
      %461 = vector.load %arg9[%460, %c0_231, %c0_232] : memref<8x8x64xf32, #tpu.memory_space<vmem>>, vector<1x8x64xf32>
      %462 = vector.shape_cast %461 : vector<1x8x64xf32> to vector<8x64xf32>
      %463 = vector.shape_cast %458 : vector<8x64xf32> to vector<1x8x64xf32>
      tpu.vector_store %arg9[%460, %c0_231, %c0_232], %463 {strides = array<i32>} : memref<8x8x64xf32, #tpu.memory_space<vmem>>, vector<1x8x64xf32>,
      %c0_233 = arith.constant 0 : index
      %c704 = arith.constant 704 : index
      %464 = vector.load %arg16[%c0_233, %c704] : memref<8x1024xf32, #tpu.memory_space<vmem>>, vector<8x64xf32>
      %c3_i32_234 = arith.constant 3 : i32
      %465 = arith.addi %c3_i32_234, %arg2 : i32
      %466 = arith.index_cast %465 : i32 to index
      %c0_235 = arith.constant 0 : index
      %c0_236 = arith.constant 0 : index
      %467 = vector.load %arg10[%466, %c0_235, %c0_236] : memref<8x8x64xf32, #tpu.memory_space<vmem>>, vector<1x8x64xf32>
      %468 = vector.shape_cast %467 : vector<1x8x64xf32> to vector<8x64xf32>
      %469 = vector.shape_cast %464 : vector<8x64xf32> to vector<1x8x64xf32>
      tpu.vector_store %arg10[%466, %c0_235, %c0_236], %469 {strides = array<i32>} : memref<8x8x64xf32, #tpu.memory_space<vmem>>, vector<1x8x64xf32>,
      %c0_237 = arith.constant 0 : index
      %c256 = arith.constant 256 : index
      %470 = vector.load %arg16[%c0_237, %c256] : memref<8x1024xf32, #tpu.memory_space<vmem>>, vector<8x64xf32>
      %c4_i32_238 = arith.constant 4 : i32
      %471 = arith.addi %c4_i32_238, %arg2 : i32
      %472 = arith.index_cast %471 : i32 to index
      %c0_239 = arith.constant 0 : index
      %c0_240 = arith.constant 0 : index
      %473 = vector.load %arg9[%472, %c0_239, %c0_240] : memref<8x8x64xf32, #tpu.memory_space<vmem>>, vector<1x8x64xf32>
      %474 = vector.shape_cast %473 : vector<1x8x64xf32> to vector<8x64xf32>
      %475 = vector.shape_cast %470 : vector<8x64xf32> to vector<1x8x64xf32>
      tpu.vector_store %arg9[%472, %c0_239, %c0_240], %475 {strides = array<i32>} : memref<8x8x64xf32, #tpu.memory_space<vmem>>, vector<1x8x64xf32>,
      %c0_241 = arith.constant 0 : index
      %c768 = arith.constant 768 : index
      %476 = vector.load %arg16[%c0_241, %c768] : memref<8x1024xf32, #tpu.memory_space<vmem>>, vector<8x64xf32>
      %c4_i32_242 = arith.constant 4 : i32
      %477 = arith.addi %c4_i32_242, %arg2 : i32
      %478 = arith.index_cast %477 : i32 to index
      %c0_243 = arith.constant 0 : index
      %c0_244 = arith.constant 0 : index
      %479 = vector.load %arg10[%478, %c0_243, %c0_244] : memref<8x8x64xf32, #tpu.memory_space<vmem>>, vector<1x8x64xf32>
      %480 = vector.shape_cast %479 : vector<1x8x64xf32> to vector<8x64xf32>
      %481 = vector.shape_cast %476 : vector<8x64xf32> to vector<1x8x64xf32>
      tpu.vector_store %arg10[%478, %c0_243, %c0_244], %481 {strides = array<i32>} : memref<8x8x64xf32, #tpu.memory_space<vmem>>, vector<1x8x64xf32>,
      %c0_245 = arith.constant 0 : index
      %c320 = arith.constant 320 : index
      %482 = vector.load %arg16[%c0_245, %c320] : memref<8x1024xf32, #tpu.memory_space<vmem>>, vector<8x64xf32>
      %c5_i32_246 = arith.constant 5 : i32
      %483 = arith.addi %c5_i32_246, %arg2 : i32
      %484 = arith.index_cast %483 : i32 to index
      %c0_247 = arith.constant 0 : index
      %c0_248 = arith.constant 0 : index
      %485 = vector.load %arg9[%484, %c0_247, %c0_248] : memref<8x8x64xf32, #tpu.memory_space<vmem>>, vector<1x8x64xf32>
      %486 = vector.shape_cast %485 : vector<1x8x64xf32> to vector<8x64xf32>
      %487 = vector.shape_cast %482 : vector<8x64xf32> to vector<1x8x64xf32>
      tpu.vector_store %arg9[%484, %c0_247, %c0_248], %487 {strides = array<i32>} : memref<8x8x64xf32, #tpu.memory_space<vmem>>, vector<1x8x64xf32>,
      %c0_249 = arith.constant 0 : index
      %c832 = arith.constant 832 : index
      %488 = vector.load %arg16[%c0_249, %c832] : memref<8x1024xf32, #tpu.memory_space<vmem>>, vector<8x64xf32>
      %c5_i32_250 = arith.constant 5 : i32
      %489 = arith.addi %c5_i32_250, %arg2 : i32
      %490 = arith.index_cast %489 : i32 to index
      %c0_251 = arith.constant 0 : index
      %c0_252 = arith.constant 0 : index
      %491 = vector.load %arg10[%490, %c0_251, %c0_252] : memref<8x8x64xf32, #tpu.memory_space<vmem>>, vector<1x8x64xf32>
      %492 = vector.shape_cast %491 : vector<1x8x64xf32> to vector<8x64xf32>
      %493 = vector.shape_cast %488 : vector<8x64xf32> to vector<1x8x64xf32>
      tpu.vector_store %arg10[%490, %c0_251, %c0_252], %493 {strides = array<i32>} : memref<8x8x64xf32, #tpu.memory_space<vmem>>, vector<1x8x64xf32>,
      %c0_253 = arith.constant 0 : index
      %c384 = arith.constant 384 : index
      %494 = vector.load %arg16[%c0_253, %c384] : memref<8x1024xf32, #tpu.memory_space<vmem>>, vector<8x64xf32>
      %c6_i32_254 = arith.constant 6 : i32
      %495 = arith.addi %c6_i32_254, %arg2 : i32
      %496 = arith.index_cast %495 : i32 to index
      %c0_255 = arith.constant 0 : index
      %c0_256 = arith.constant 0 : index
      %497 = vector.load %arg9[%496, %c0_255, %c0_256] : memref<8x8x64xf32, #tpu.memory_space<vmem>>, vector<1x8x64xf32>
      %498 = vector.shape_cast %497 : vector<1x8x64xf32> to vector<8x64xf32>
      %499 = vector.shape_cast %494 : vector<8x64xf32> to vector<1x8x64xf32>
      tpu.vector_store %arg9[%496, %c0_255, %c0_256], %499 {strides = array<i32>} : memref<8x8x64xf32, #tpu.memory_space<vmem>>, vector<1x8x64xf32>,
      %c0_257 = arith.constant 0 : index
      %c896 = arith.constant 896 : index
      %500 = vector.load %arg16[%c0_257, %c896] : memref<8x1024xf32, #tpu.memory_space<vmem>>, vector<8x64xf32>
      %c6_i32_258 = arith.constant 6 : i32
      %501 = arith.addi %c6_i32_258, %arg2 : i32
      %502 = arith.index_cast %501 : i32 to index
      %c0_259 = arith.constant 0 : index
      %c0_260 = arith.constant 0 : index
      %503 = vector.load %arg10[%502, %c0_259, %c0_260] : memref<8x8x64xf32, #tpu.memory_space<vmem>>, vector<1x8x64xf32>
      %504 = vector.shape_cast %503 : vector<1x8x64xf32> to vector<8x64xf32>
      %505 = vector.shape_cast %500 : vector<8x64xf32> to vector<1x8x64xf32>
      tpu.vector_store %arg10[%502, %c0_259, %c0_260], %505 {strides = array<i32>} : memref<8x8x64xf32, #tpu.memory_space<vmem>>, vector<1x8x64xf32>,
      %c0_261 = arith.constant 0 : index
      %c448 = arith.constant 448 : index
      %506 = vector.load %arg16[%c0_261, %c448] : memref<8x1024xf32, #tpu.memory_space<vmem>>, vector<8x64xf32>
      %c7_i32_262 = arith.constant 7 : i32
      %507 = arith.addi %c7_i32_262, %arg2 : i32
      %508 = arith.index_cast %507 : i32 to index
      %c0_263 = arith.constant 0 : index
      %c0_264 = arith.constant 0 : index
      %509 = vector.load %arg9[%508, %c0_263, %c0_264] : memref<8x8x64xf32, #tpu.memory_space<vmem>>, vector<1x8x64xf32>
      %510 = vector.shape_cast %509 : vector<1x8x64xf32> to vector<8x64xf32>
      %511 = vector.shape_cast %506 : vector<8x64xf32> to vector<1x8x64xf32>
      tpu.vector_store %arg9[%508, %c0_263, %c0_264], %511 {strides = array<i32>} : memref<8x8x64xf32, #tpu.memory_space<vmem>>, vector<1x8x64xf32>,
      %c0_265 = arith.constant 0 : index
      %c960 = arith.constant 960 : index
      %512 = vector.load %arg16[%c0_265, %c960] : memref<8x1024xf32, #tpu.memory_space<vmem>>, vector<8x64xf32>
      %c7_i32_266 = arith.constant 7 : i32
      %513 = arith.addi %c7_i32_266, %arg2 : i32
      %514 = arith.index_cast %513 : i32 to index
      %c0_267 = arith.constant 0 : index
      %c0_268 = arith.constant 0 : index
      %515 = vector.load %arg10[%514, %c0_267, %c0_268] : memref<8x8x64xf32, #tpu.memory_space<vmem>>, vector<1x8x64xf32>
      %516 = vector.shape_cast %515 : vector<1x8x64xf32> to vector<8x64xf32>
      %517 = vector.shape_cast %512 : vector<8x64xf32> to vector<1x8x64xf32>
      tpu.vector_store %arg10[%514, %c0_267, %c0_268], %517 {strides = array<i32>} : memref<8x8x64xf32, #tpu.memory_space<vmem>>, vector<1x8x64xf32>,
    } else {
    }
    %c0_i32_1 = arith.constant 0 : i32
    %3 = arith.cmpi eq, %arg2, %c0_i32_1 : i32
    %4 = arith.extui %3 : i1 to i32
    %c0_i32_2 = arith.constant 0 : i32
    %5 = arith.cmpi ne, %4, %c0_i32_2 : i32
    scf.if %5 {
      %c0_196 = arith.constant 0 : index
      %c0_197 = arith.constant 0 : index
      %c0_198 = arith.constant 0 : index
      %417 = vector.load %arg3[%c0_196, %c0_197, %c0_198] : memref<1x8x32xf32, #tpu.memory_space<vmem>>, vector<1x8x32xf32>
      %418 = vector.shape_cast %417 : vector<1x8x32xf32> to vector<8x32xf32>
      %c0_199 = arith.constant 0 : index
      %c0_200 = arith.constant 0 : index
      %419 = vector.load %arg5[%c0_199, %c0_200] : memref<32x1536xf32, #tpu.memory_space<vmem>>, vector<32x512xf32>
      %cst_201 = arith.constant dense<0.000000e+00> : vector<8x512xf32>
      %420 = tpu.matmul %418, %419, %cst_201 {dimension_numbers = #tpu.dot_dimension_numbers<[1], [0], [0], [1], [0, 0, 1, 1], [], []>} : vector<8x32xf32>, vector<32x512xf32>, vector<8x512xf32> -> vector<8x512xf32>
      %cst_202 = arith.constant 1.250000e-01 : f32
      %421 = vector.broadcast %cst_202 : f32 to vector<8x512xf32>
      %422 = arith.mulf %420, %421 : vector<8x512xf32>
      %c0_203 = arith.constant 0 : index
      %c0_204 = arith.constant 0 : index
      %423 = vector.load %arg15[%c0_203, %c0_204] : memref<8x512xf32, #tpu.memory_space<vmem>>, vector<8x512xf32>
      tpu.vector_store %arg15[%c0_203, %c0_204], %422 {strides = array<i32>} : memref<8x512xf32, #tpu.memory_space<vmem>>, vector<8x512xf32>,
      %c0_205 = arith.constant 0 : index
      %c0_206 = arith.constant 0 : index
      %424 = vector.load %arg15[%c0_205, %c0_206] : memref<8x512xf32, #tpu.memory_space<vmem>>, vector<8x64xf32>
      %c0_207 = arith.constant 0 : index
      %c0_208 = arith.constant 0 : index
      %c0_209 = arith.constant 0 : index
      %425 = vector.load %arg11[%c0_207, %c0_208, %c0_209] : memref<8x8x64xf32, #tpu.memory_space<vmem>>, vector<1x8x64xf32>
      %426 = vector.shape_cast %425 : vector<1x8x64xf32> to vector<8x64xf32>
      %427 = vector.shape_cast %424 : vector<8x64xf32> to vector<1x8x64xf32>
      tpu.vector_store %arg11[%c0_207, %c0_208, %c0_209], %427 {strides = array<i32>} : memref<8x8x64xf32, #tpu.memory_space<vmem>>, vector<1x8x64xf32>,
      %c0_210 = arith.constant 0 : index
      %c64 = arith.constant 64 : index
      %428 = vector.load %arg15[%c0_210, %c64] : memref<8x512xf32, #tpu.memory_space<vmem>>, vector<8x64xf32>
      %c1 = arith.constant 1 : index
      %c0_211 = arith.constant 0 : index
      %c0_212 = arith.constant 0 : index
      %429 = vector.load %arg11[%c1, %c0_211, %c0_212] : memref<8x8x64xf32, #tpu.memory_space<vmem>>, vector<1x8x64xf32>
      %430 = vector.shape_cast %429 : vector<1x8x64xf32> to vector<8x64xf32>
      %431 = vector.shape_cast %428 : vector<8x64xf32> to vector<1x8x64xf32>
      tpu.vector_store %arg11[%c1, %c0_211, %c0_212], %431 {strides = array<i32>} : memref<8x8x64xf32, #tpu.memory_space<vmem>>, vector<1x8x64xf32>,
      %c0_213 = arith.constant 0 : index
      %c128 = arith.constant 128 : index
      %432 = vector.load %arg15[%c0_213, %c128] : memref<8x512xf32, #tpu.memory_space<vmem>>, vector<8x64xf32>
      %c2 = arith.constant 2 : index
      %c0_214 = arith.constant 0 : index
      %c0_215 = arith.constant 0 : index
      %433 = vector.load %arg11[%c2, %c0_214, %c0_215] : memref<8x8x64xf32, #tpu.memory_space<vmem>>, vector<1x8x64xf32>
      %434 = vector.shape_cast %433 : vector<1x8x64xf32> to vector<8x64xf32>
      %435 = vector.shape_cast %432 : vector<8x64xf32> to vector<1x8x64xf32>
      tpu.vector_store %arg11[%c2, %c0_214, %c0_215], %435 {strides = array<i32>} : memref<8x8x64xf32, #tpu.memory_space<vmem>>, vector<1x8x64xf32>,
      %c0_216 = arith.constant 0 : index
      %c192 = arith.constant 192 : index
      %436 = vector.load %arg15[%c0_216, %c192] : memref<8x512xf32, #tpu.memory_space<vmem>>, vector<8x64xf32>
      %c3 = arith.constant 3 : index
      %c0_217 = arith.constant 0 : index
      %c0_218 = arith.constant 0 : index
      %437 = vector.load %arg11[%c3, %c0_217, %c0_218] : memref<8x8x64xf32, #tpu.memory_space<vmem>>, vector<1x8x64xf32>
      %438 = vector.shape_cast %437 : vector<1x8x64xf32> to vector<8x64xf32>
      %439 = vector.shape_cast %436 : vector<8x64xf32> to vector<1x8x64xf32>
      tpu.vector_store %arg11[%c3, %c0_217, %c0_218], %439 {strides = array<i32>} : memref<8x8x64xf32, #tpu.memory_space<vmem>>, vector<1x8x64xf32>,
      %c0_219 = arith.constant 0 : index
      %c256 = arith.constant 256 : index
      %440 = vector.load %arg15[%c0_219, %c256] : memref<8x512xf32, #tpu.memory_space<vmem>>, vector<8x64xf32>
      %c4 = arith.constant 4 : index
      %c0_220 = arith.constant 0 : index
      %c0_221 = arith.constant 0 : index
      %441 = vector.load %arg11[%c4, %c0_220, %c0_221] : memref<8x8x64xf32, #tpu.memory_space<vmem>>, vector<1x8x64xf32>
      %442 = vector.shape_cast %441 : vector<1x8x64xf32> to vector<8x64xf32>
      %443 = vector.shape_cast %440 : vector<8x64xf32> to vector<1x8x64xf32>
      tpu.vector_store %arg11[%c4, %c0_220, %c0_221], %443 {strides = array<i32>} : memref<8x8x64xf32, #tpu.memory_space<vmem>>, vector<1x8x64xf32>,
      %c0_222 = arith.constant 0 : index
      %c320 = arith.constant 320 : index
      %444 = vector.load %arg15[%c0_222, %c320] : memref<8x512xf32, #tpu.memory_space<vmem>>, vector<8x64xf32>
      %c5 = arith.constant 5 : index
      %c0_223 = arith.constant 0 : index
      %c0_224 = arith.constant 0 : index
      %445 = vector.load %arg11[%c5, %c0_223, %c0_224] : memref<8x8x64xf32, #tpu.memory_space<vmem>>, vector<1x8x64xf32>
      %446 = vector.shape_cast %445 : vector<1x8x64xf32> to vector<8x64xf32>
      %447 = vector.shape_cast %444 : vector<8x64xf32> to vector<1x8x64xf32>
      tpu.vector_store %arg11[%c5, %c0_223, %c0_224], %447 {strides = array<i32>} : memref<8x8x64xf32, #tpu.memory_space<vmem>>, vector<1x8x64xf32>,
      %c0_225 = arith.constant 0 : index
      %c384 = arith.constant 384 : index
      %448 = vector.load %arg15[%c0_225, %c384] : memref<8x512xf32, #tpu.memory_space<vmem>>, vector<8x64xf32>
      %c6 = arith.constant 6 : index
      %c0_226 = arith.constant 0 : index
      %c0_227 = arith.constant 0 : index
      %449 = vector.load %arg11[%c6, %c0_226, %c0_227] : memref<8x8x64xf32, #tpu.memory_space<vmem>>, vector<1x8x64xf32>
      %450 = vector.shape_cast %449 : vector<1x8x64xf32> to vector<8x64xf32>
      %451 = vector.shape_cast %448 : vector<8x64xf32> to vector<1x8x64xf32>
      tpu.vector_store %arg11[%c6, %c0_226, %c0_227], %451 {strides = array<i32>} : memref<8x8x64xf32, #tpu.memory_space<vmem>>, vector<1x8x64xf32>,
      %c0_228 = arith.constant 0 : index
      %c448 = arith.constant 448 : index
      %452 = vector.load %arg15[%c0_228, %c448] : memref<8x512xf32, #tpu.memory_space<vmem>>, vector<8x64xf32>
      %c7 = arith.constant 7 : index
      %c0_229 = arith.constant 0 : index
      %c0_230 = arith.constant 0 : index
      %453 = vector.load %arg11[%c7, %c0_229, %c0_230] : memref<8x8x64xf32, #tpu.memory_space<vmem>>, vector<1x8x64xf32>
      %454 = vector.shape_cast %453 : vector<1x8x64xf32> to vector<8x64xf32>
      %455 = vector.shape_cast %452 : vector<8x64xf32> to vector<1x8x64xf32>
      tpu.vector_store %arg11[%c7, %c0_229, %c0_230], %455 {strides = array<i32>} : memref<8x8x64xf32, #tpu.memory_space<vmem>>, vector<1x8x64xf32>,
      %cst_231 = arith.constant 0xFF800000 : f32
      %456 = vector.broadcast %cst_231 : f32 to vector<8x8x1xf32>
      %c0_232 = arith.constant 0 : index
      %c0_233 = arith.constant 0 : index
      %c0_234 = arith.constant 0 : index
      %457 = vector.load %arg13[%c0_232, %c0_233, %c0_234] : memref<8x8x1xf32, #tpu.memory_space<vmem>>, vector<8x8x1xf32>
      tpu.vector_store %arg13[%c0_232, %c0_233, %c0_234], %456 {strides = array<i32>} : memref<8x8x1xf32, #tpu.memory_space<vmem>>, vector<8x8x1xf32>,
      %cst_235 = arith.constant 0.000000e+00 : f32
      %458 = vector.broadcast %cst_235 : f32 to vector<8x8x1xf32>
      %c0_236 = arith.constant 0 : index
      %c0_237 = arith.constant 0 : index
      %c0_238 = arith.constant 0 : index
      %459 = vector.load %arg14[%c0_236, %c0_237, %c0_238] : memref<8x8x1xf32, #tpu.memory_space<vmem>>, vector<8x8x1xf32>
      tpu.vector_store %arg14[%c0_236, %c0_237, %c0_238], %458 {strides = array<i32>} : memref<8x8x1xf32, #tpu.memory_space<vmem>>, vector<8x8x1xf32>,
      %cst_239 = arith.constant 0.000000e+00 : f32
      %460 = vector.broadcast %cst_239 : f32 to vector<8x8x64xf32>
      %c0_240 = arith.constant 0 : index
      %c0_241 = arith.constant 0 : index
      %c0_242 = arith.constant 0 : index
      %461 = vector.load %arg12[%c0_240, %c0_241, %c0_242] : memref<8x8x64xf32, #tpu.memory_space<vmem>>, vector<8x8x64xf32>
      tpu.vector_store %arg12[%c0_240, %c0_241, %c0_242], %460 {strides = array<i32>} : memref<8x8x64xf32, #tpu.memory_space<vmem>>, vector<8x8x64xf32>,
    } else {
    }
    %c0_i32_3 = arith.constant 0 : i32
    %6 = arith.index_cast %c0_i32_3 : i32 to index
    %c0 = arith.constant 0 : index
    %c0_4 = arith.constant 0 : index
    %7 = vector.load %arg11[%6, %c0, %c0_4] : memref<8x8x64xf32, #tpu.memory_space<vmem>>, vector<1x8x64xf32>
    %8 = vector.shape_cast %7 : vector<1x8x64xf32> to vector<8x64xf32>
    %c1_i32 = arith.constant 1 : i32
    %9 = arith.muli %c0_i32_3, %c1_i32 : i32
    %10 = arith.addi %9, %arg2 : i32
    %11 = arith.index_cast %10 : i32 to index
    %c0_5 = arith.constant 0 : index
    %c0_6 = arith.constant 0 : index
    %12 = vector.load %arg9[%11, %c0_5, %c0_6] : memref<8x8x64xf32, #tpu.memory_space<vmem>>, vector<1x8x64xf32>
    %13 = vector.shape_cast %12 : vector<1x8x64xf32> to vector<8x64xf32>
    %c1_i32_7 = arith.constant 1 : i32
    %14 = arith.muli %c0_i32_3, %c1_i32_7 : i32
    %15 = arith.addi %14, %arg2 : i32
    %16 = arith.index_cast %15 : i32 to index
    %c0_8 = arith.constant 0 : index
    %c0_9 = arith.constant 0 : index
    %17 = vector.load %arg10[%16, %c0_8, %c0_9] : memref<8x8x64xf32, #tpu.memory_space<vmem>>, vector<1x8x64xf32>
    %18 = vector.shape_cast %17 : vector<1x8x64xf32> to vector<8x64xf32>
    %cst = arith.constant dense<0.000000e+00> : vector<8x8xf32>
    %19 = tpu.matmul %8, %13, %cst {dimension_numbers = #tpu.dot_dimension_numbers<[1], [1], [0], [0], [0, 0, 1, 0], [], []>} : vector<8x64xf32>, vector<8x64xf32>, vector<8x8xf32> -> vector<8x8xf32>
    %20 = arith.index_cast %c0_i32_3 : i32 to index
    %c0_10 = arith.constant 0 : index
    %c0_11 = arith.constant 0 : index
    %21 = vector.load %arg13[%20, %c0_10, %c0_11] : memref<8x8x1xf32, #tpu.memory_space<vmem>>, vector<1x8x1xf32>
    %22 = vector.shape_cast %21 : vector<1x8x1xf32> to vector<8x1xf32>
    %cst_12 = arith.constant dense<0xFF800000> : vector<8xf32>
    %23 = vector.multi_reduction <maximumf>, %19, %cst_12 [1] : vector<8x8xf32> to vector<8xf32>
    %24 = vector.shape_cast %23 : vector<8xf32> to vector<8x1xf32>
    %25 = arith.maximumf %22, %24 : vector<8x1xf32>
    %26 = arith.subf %22, %25 : vector<8x1xf32>
    %27 = math.exp %26 : vector<8x1xf32>
    %28 = vector.broadcast %25 : vector<8x1xf32> to vector<8x8xf32>
    %29 = arith.subf %19, %28 : vector<8x8xf32>
    %30 = math.exp %29 : vector<8x8xf32>
    %31 = arith.index_cast %c0_i32_3 : i32 to index
    %c0_13 = arith.constant 0 : index
    %c0_14 = arith.constant 0 : index
    %32 = vector.load %arg14[%31, %c0_13, %c0_14] : memref<8x8x1xf32, #tpu.memory_space<vmem>>, vector<1x8x1xf32>
    %33 = vector.shape_cast %32 : vector<1x8x1xf32> to vector<8x1xf32>
    %34 = arith.mulf %27, %33 : vector<8x1xf32>
    %cst_15 = arith.constant dense<0.000000e+00> : vector<8xf32>
    %35 = vector.multi_reduction <add>, %30, %cst_15 [1] : vector<8x8xf32> to vector<8xf32>
    %36 = vector.shape_cast %35 : vector<8xf32> to vector<8x1xf32>
    %37 = arith.addf %34, %36 : vector<8x1xf32>
    %38 = arith.index_cast %c0_i32_3 : i32 to index
    %c0_16 = arith.constant 0 : index
    %c0_17 = arith.constant 0 : index
    %39 = vector.load %arg14[%38, %c0_16, %c0_17] : memref<8x8x1xf32, #tpu.memory_space<vmem>>, vector<1x8x1xf32>
    %40 = vector.shape_cast %39 : vector<1x8x1xf32> to vector<8x1xf32>
    %41 = vector.shape_cast %37 : vector<8x1xf32> to vector<1x8x1xf32>
    tpu.vector_store %arg14[%38, %c0_16, %c0_17], %41 {strides = array<i32>} : memref<8x8x1xf32, #tpu.memory_space<vmem>>, vector<1x8x1xf32>,
    %42 = arith.index_cast %c0_i32_3 : i32 to index
    %c0_18 = arith.constant 0 : index
    %c0_19 = arith.constant 0 : index
    %43 = vector.load %arg12[%42, %c0_18, %c0_19] : memref<8x8x64xf32, #tpu.memory_space<vmem>>, vector<1x8x64xf32>
    %44 = vector.shape_cast %43 : vector<1x8x64xf32> to vector<8x64xf32>
    %45 = vector.broadcast %27 : vector<8x1xf32> to vector<8x64xf32>
    %46 = arith.mulf %45, %44 : vector<8x64xf32>
    %cst_20 = arith.constant dense<0.000000e+00> : vector<8x64xf32>
    %47 = tpu.matmul %30, %18, %cst_20 {dimension_numbers = #tpu.dot_dimension_numbers<[1], [0], [0], [1], [0, 0, 1, 1], [], []>} : vector<8x8xf32>, vector<8x64xf32>, vector<8x64xf32> -> vector<8x64xf32>
    %48 = arith.addf %46, %47 : vector<8x64xf32>
    %49 = arith.index_cast %c0_i32_3 : i32 to index
    %c0_21 = arith.constant 0 : index
    %c0_22 = arith.constant 0 : index
    %50 = vector.load %arg12[%49, %c0_21, %c0_22] : memref<8x8x64xf32, #tpu.memory_space<vmem>>, vector<1x8x64xf32>
    %51 = vector.shape_cast %50 : vector<1x8x64xf32> to vector<8x64xf32>
    %52 = vector.shape_cast %48 : vector<8x64xf32> to vector<1x8x64xf32>
    tpu.vector_store %arg12[%49, %c0_21, %c0_22], %52 {strides = array<i32>} : memref<8x8x64xf32, #tpu.memory_space<vmem>>, vector<1x8x64xf32>,
    %53 = arith.index_cast %c0_i32_3 : i32 to index
    %c0_23 = arith.constant 0 : index
    %c0_24 = arith.constant 0 : index
    %54 = vector.load %arg13[%53, %c0_23, %c0_24] : memref<8x8x1xf32, #tpu.memory_space<vmem>>, vector<1x8x1xf32>
    %55 = vector.shape_cast %54 : vector<1x8x1xf32> to vector<8x1xf32>
    %56 = vector.shape_cast %25 : vector<8x1xf32> to vector<1x8x1xf32>
    tpu.vector_store %arg13[%53, %c0_23, %c0_24], %56 {strides = array<i32>} : memref<8x8x1xf32, #tpu.memory_space<vmem>>, vector<1x8x1xf32>,
    %c1_i32_25 = arith.constant 1 : i32
    %57 = arith.index_cast %c1_i32_25 : i32 to index
    %c0_26 = arith.constant 0 : index
    %c0_27 = arith.constant 0 : index
    %58 = vector.load %arg11[%57, %c0_26, %c0_27] : memref<8x8x64xf32, #tpu.memory_space<vmem>>, vector<1x8x64xf32>
    %59 = vector.shape_cast %58 : vector<1x8x64xf32> to vector<8x64xf32>
    %c1_i32_28 = arith.constant 1 : i32
    %60 = arith.muli %c1_i32_25, %c1_i32_28 : i32
    %61 = arith.addi %60, %arg2 : i32
    %62 = arith.index_cast %61 : i32 to index
    %c0_29 = arith.constant 0 : index
    %c0_30 = arith.constant 0 : index
    %63 = vector.load %arg9[%62, %c0_29, %c0_30] : memref<8x8x64xf32, #tpu.memory_space<vmem>>, vector<1x8x64xf32>
    %64 = vector.shape_cast %63 : vector<1x8x64xf32> to vector<8x64xf32>
    %c1_i32_31 = arith.constant 1 : i32
    %65 = arith.muli %c1_i32_25, %c1_i32_31 : i32
    %66 = arith.addi %65, %arg2 : i32
    %67 = arith.index_cast %66 : i32 to index
    %c0_32 = arith.constant 0 : index
    %c0_33 = arith.constant 0 : index
    %68 = vector.load %arg10[%67, %c0_32, %c0_33] : memref<8x8x64xf32, #tpu.memory_space<vmem>>, vector<1x8x64xf32>
    %69 = vector.shape_cast %68 : vector<1x8x64xf32> to vector<8x64xf32>
    %cst_34 = arith.constant dense<0.000000e+00> : vector<8x8xf32>
    %70 = tpu.matmul %59, %64, %cst_34 {dimension_numbers = #tpu.dot_dimension_numbers<[1], [1], [0], [0], [0, 0, 1, 0], [], []>} : vector<8x64xf32>, vector<8x64xf32>, vector<8x8xf32> -> vector<8x8xf32>
    %71 = arith.index_cast %c1_i32_25 : i32 to index
    %c0_35 = arith.constant 0 : index
    %c0_36 = arith.constant 0 : index
    %72 = vector.load %arg13[%71, %c0_35, %c0_36] : memref<8x8x1xf32, #tpu.memory_space<vmem>>, vector<1x8x1xf32>
    %73 = vector.shape_cast %72 : vector<1x8x1xf32> to vector<8x1xf32>
    %cst_37 = arith.constant dense<0xFF800000> : vector<8xf32>
    %74 = vector.multi_reduction <maximumf>, %70, %cst_37 [1] : vector<8x8xf32> to vector<8xf32>
    %75 = vector.shape_cast %74 : vector<8xf32> to vector<8x1xf32>
    %76 = arith.maximumf %73, %75 : vector<8x1xf32>
    %77 = arith.subf %73, %76 : vector<8x1xf32>
    %78 = math.exp %77 : vector<8x1xf32>
    %79 = vector.broadcast %76 : vector<8x1xf32> to vector<8x8xf32>
    %80 = arith.subf %70, %79 : vector<8x8xf32>
    %81 = math.exp %80 : vector<8x8xf32>
    %82 = arith.index_cast %c1_i32_25 : i32 to index
    %c0_38 = arith.constant 0 : index
    %c0_39 = arith.constant 0 : index
    %83 = vector.load %arg14[%82, %c0_38, %c0_39] : memref<8x8x1xf32, #tpu.memory_space<vmem>>, vector<1x8x1xf32>
    %84 = vector.shape_cast %83 : vector<1x8x1xf32> to vector<8x1xf32>
    %85 = arith.mulf %78, %84 : vector<8x1xf32>
    %cst_40 = arith.constant dense<0.000000e+00> : vector<8xf32>
    %86 = vector.multi_reduction <add>, %81, %cst_40 [1] : vector<8x8xf32> to vector<8xf32>
    %87 = vector.shape_cast %86 : vector<8xf32> to vector<8x1xf32>
    %88 = arith.addf %85, %87 : vector<8x1xf32>
    %89 = arith.index_cast %c1_i32_25 : i32 to index
    %c0_41 = arith.constant 0 : index
    %c0_42 = arith.constant 0 : index
    %90 = vector.load %arg14[%89, %c0_41, %c0_42] : memref<8x8x1xf32, #tpu.memory_space<vmem>>, vector<1x8x1xf32>
    %91 = vector.shape_cast %90 : vector<1x8x1xf32> to vector<8x1xf32>
    %92 = vector.shape_cast %88 : vector<8x1xf32> to vector<1x8x1xf32>
    tpu.vector_store %arg14[%89, %c0_41, %c0_42], %92 {strides = array<i32>} : memref<8x8x1xf32, #tpu.memory_space<vmem>>, vector<1x8x1xf32>,
    %93 = arith.index_cast %c1_i32_25 : i32 to index
    %c0_43 = arith.constant 0 : index
    %c0_44 = arith.constant 0 : index
    %94 = vector.load %arg12[%93, %c0_43, %c0_44] : memref<8x8x64xf32, #tpu.memory_space<vmem>>, vector<1x8x64xf32>
    %95 = vector.shape_cast %94 : vector<1x8x64xf32> to vector<8x64xf32>
    %96 = vector.broadcast %78 : vector<8x1xf32> to vector<8x64xf32>
    %97 = arith.mulf %96, %95 : vector<8x64xf32>
    %cst_45 = arith.constant dense<0.000000e+00> : vector<8x64xf32>
    %98 = tpu.matmul %81, %69, %cst_45 {dimension_numbers = #tpu.dot_dimension_numbers<[1], [0], [0], [1], [0, 0, 1, 1], [], []>} : vector<8x8xf32>, vector<8x64xf32>, vector<8x64xf32> -> vector<8x64xf32>
    %99 = arith.addf %97, %98 : vector<8x64xf32>
    %100 = arith.index_cast %c1_i32_25 : i32 to index
    %c0_46 = arith.constant 0 : index
    %c0_47 = arith.constant 0 : index
    %101 = vector.load %arg12[%100, %c0_46, %c0_47] : memref<8x8x64xf32, #tpu.memory_space<vmem>>, vector<1x8x64xf32>
    %102 = vector.shape_cast %101 : vector<1x8x64xf32> to vector<8x64xf32>
    %103 = vector.shape_cast %99 : vector<8x64xf32> to vector<1x8x64xf32>
    tpu.vector_store %arg12[%100, %c0_46, %c0_47], %103 {strides = array<i32>} : memref<8x8x64xf32, #tpu.memory_space<vmem>>, vector<1x8x64xf32>,
    %104 = arith.index_cast %c1_i32_25 : i32 to index
    %c0_48 = arith.constant 0 : index
    %c0_49 = arith.constant 0 : index
    %105 = vector.load %arg13[%104, %c0_48, %c0_49] : memref<8x8x1xf32, #tpu.memory_space<vmem>>, vector<1x8x1xf32>
    %106 = vector.shape_cast %105 : vector<1x8x1xf32> to vector<8x1xf32>
    %107 = vector.shape_cast %76 : vector<8x1xf32> to vector<1x8x1xf32>
    tpu.vector_store %arg13[%104, %c0_48, %c0_49], %107 {strides = array<i32>} : memref<8x8x1xf32, #tpu.memory_space<vmem>>, vector<1x8x1xf32>,
    %c2_i32 = arith.constant 2 : i32
    %108 = arith.index_cast %c2_i32 : i32 to index
    %c0_50 = arith.constant 0 : index
    %c0_51 = arith.constant 0 : index
    %109 = vector.load %arg11[%108, %c0_50, %c0_51] : memref<8x8x64xf32, #tpu.memory_space<vmem>>, vector<1x8x64xf32>
    %110 = vector.shape_cast %109 : vector<1x8x64xf32> to vector<8x64xf32>
    %c1_i32_52 = arith.constant 1 : i32
    %111 = arith.muli %c2_i32, %c1_i32_52 : i32
    %112 = arith.addi %111, %arg2 : i32
    %113 = arith.index_cast %112 : i32 to index
    %c0_53 = arith.constant 0 : index
    %c0_54 = arith.constant 0 : index
    %114 = vector.load %arg9[%113, %c0_53, %c0_54] : memref<8x8x64xf32, #tpu.memory_space<vmem>>, vector<1x8x64xf32>
    %115 = vector.shape_cast %114 : vector<1x8x64xf32> to vector<8x64xf32>
    %c1_i32_55 = arith.constant 1 : i32
    %116 = arith.muli %c2_i32, %c1_i32_55 : i32
    %117 = arith.addi %116, %arg2 : i32
    %118 = arith.index_cast %117 : i32 to index
    %c0_56 = arith.constant 0 : index
    %c0_57 = arith.constant 0 : index
    %119 = vector.load %arg10[%118, %c0_56, %c0_57] : memref<8x8x64xf32, #tpu.memory_space<vmem>>, vector<1x8x64xf32>
    %120 = vector.shape_cast %119 : vector<1x8x64xf32> to vector<8x64xf32>
    %cst_58 = arith.constant dense<0.000000e+00> : vector<8x8xf32>
    %121 = tpu.matmul %110, %115, %cst_58 {dimension_numbers = #tpu.dot_dimension_numbers<[1], [1], [0], [0], [0, 0, 1, 0], [], []>} : vector<8x64xf32>, vector<8x64xf32>, vector<8x8xf32> -> vector<8x8xf32>
    %122 = arith.index_cast %c2_i32 : i32 to index
    %c0_59 = arith.constant 0 : index
    %c0_60 = arith.constant 0 : index
    %123 = vector.load %arg13[%122, %c0_59, %c0_60] : memref<8x8x1xf32, #tpu.memory_space<vmem>>, vector<1x8x1xf32>
    %124 = vector.shape_cast %123 : vector<1x8x1xf32> to vector<8x1xf32>
    %cst_61 = arith.constant dense<0xFF800000> : vector<8xf32>
    %125 = vector.multi_reduction <maximumf>, %121, %cst_61 [1] : vector<8x8xf32> to vector<8xf32>
    %126 = vector.shape_cast %125 : vector<8xf32> to vector<8x1xf32>
    %127 = arith.maximumf %124, %126 : vector<8x1xf32>
    %128 = arith.subf %124, %127 : vector<8x1xf32>
    %129 = math.exp %128 : vector<8x1xf32>
    %130 = vector.broadcast %127 : vector<8x1xf32> to vector<8x8xf32>
    %131 = arith.subf %121, %130 : vector<8x8xf32>
    %132 = math.exp %131 : vector<8x8xf32>
    %133 = arith.index_cast %c2_i32 : i32 to index
    %c0_62 = arith.constant 0 : index
    %c0_63 = arith.constant 0 : index
    %134 = vector.load %arg14[%133, %c0_62, %c0_63] : memref<8x8x1xf32, #tpu.memory_space<vmem>>, vector<1x8x1xf32>
    %135 = vector.shape_cast %134 : vector<1x8x1xf32> to vector<8x1xf32>
    %136 = arith.mulf %129, %135 : vector<8x1xf32>
    %cst_64 = arith.constant dense<0.000000e+00> : vector<8xf32>
    %137 = vector.multi_reduction <add>, %132, %cst_64 [1] : vector<8x8xf32> to vector<8xf32>
    %138 = vector.shape_cast %137 : vector<8xf32> to vector<8x1xf32>
    %139 = arith.addf %136, %138 : vector<8x1xf32>
    %140 = arith.index_cast %c2_i32 : i32 to index
    %c0_65 = arith.constant 0 : index
    %c0_66 = arith.constant 0 : index
    %141 = vector.load %arg14[%140, %c0_65, %c0_66] : memref<8x8x1xf32, #tpu.memory_space<vmem>>, vector<1x8x1xf32>
    %142 = vector.shape_cast %141 : vector<1x8x1xf32> to vector<8x1xf32>
    %143 = vector.shape_cast %139 : vector<8x1xf32> to vector<1x8x1xf32>
    tpu.vector_store %arg14[%140, %c0_65, %c0_66], %143 {strides = array<i32>} : memref<8x8x1xf32, #tpu.memory_space<vmem>>, vector<1x8x1xf32>,
    %144 = arith.index_cast %c2_i32 : i32 to index
    %c0_67 = arith.constant 0 : index
    %c0_68 = arith.constant 0 : index
    %145 = vector.load %arg12[%144, %c0_67, %c0_68] : memref<8x8x64xf32, #tpu.memory_space<vmem>>, vector<1x8x64xf32>
    %146 = vector.shape_cast %145 : vector<1x8x64xf32> to vector<8x64xf32>
    %147 = vector.broadcast %129 : vector<8x1xf32> to vector<8x64xf32>
    %148 = arith.mulf %147, %146 : vector<8x64xf32>
    %cst_69 = arith.constant dense<0.000000e+00> : vector<8x64xf32>
    %149 = tpu.matmul %132, %120, %cst_69 {dimension_numbers = #tpu.dot_dimension_numbers<[1], [0], [0], [1], [0, 0, 1, 1], [], []>} : vector<8x8xf32>, vector<8x64xf32>, vector<8x64xf32> -> vector<8x64xf32>
    %150 = arith.addf %148, %149 : vector<8x64xf32>
    %151 = arith.index_cast %c2_i32 : i32 to index
    %c0_70 = arith.constant 0 : index
    %c0_71 = arith.constant 0 : index
    %152 = vector.load %arg12[%151, %c0_70, %c0_71] : memref<8x8x64xf32, #tpu.memory_space<vmem>>, vector<1x8x64xf32>
    %153 = vector.shape_cast %152 : vector<1x8x64xf32> to vector<8x64xf32>
    %154 = vector.shape_cast %150 : vector<8x64xf32> to vector<1x8x64xf32>
    tpu.vector_store %arg12[%151, %c0_70, %c0_71], %154 {strides = array<i32>} : memref<8x8x64xf32, #tpu.memory_space<vmem>>, vector<1x8x64xf32>,
    %155 = arith.index_cast %c2_i32 : i32 to index
    %c0_72 = arith.constant 0 : index
    %c0_73 = arith.constant 0 : index
    %156 = vector.load %arg13[%155, %c0_72, %c0_73] : memref<8x8x1xf32, #tpu.memory_space<vmem>>, vector<1x8x1xf32>
    %157 = vector.shape_cast %156 : vector<1x8x1xf32> to vector<8x1xf32>
    %158 = vector.shape_cast %127 : vector<8x1xf32> to vector<1x8x1xf32>
    tpu.vector_store %arg13[%155, %c0_72, %c0_73], %158 {strides = array<i32>} : memref<8x8x1xf32, #tpu.memory_space<vmem>>, vector<1x8x1xf32>,
    %c3_i32 = arith.constant 3 : i32
    %159 = arith.index_cast %c3_i32 : i32 to index
    %c0_74 = arith.constant 0 : index
    %c0_75 = arith.constant 0 : index
    %160 = vector.load %arg11[%159, %c0_74, %c0_75] : memref<8x8x64xf32, #tpu.memory_space<vmem>>, vector<1x8x64xf32>
    %161 = vector.shape_cast %160 : vector<1x8x64xf32> to vector<8x64xf32>
    %c1_i32_76 = arith.constant 1 : i32
    %162 = arith.muli %c3_i32, %c1_i32_76 : i32
    %163 = arith.addi %162, %arg2 : i32
    %164 = arith.index_cast %163 : i32 to index
    %c0_77 = arith.constant 0 : index
    %c0_78 = arith.constant 0 : index
    %165 = vector.load %arg9[%164, %c0_77, %c0_78] : memref<8x8x64xf32, #tpu.memory_space<vmem>>, vector<1x8x64xf32>
    %166 = vector.shape_cast %165 : vector<1x8x64xf32> to vector<8x64xf32>
    %c1_i32_79 = arith.constant 1 : i32
    %167 = arith.muli %c3_i32, %c1_i32_79 : i32
    %168 = arith.addi %167, %arg2 : i32
    %169 = arith.index_cast %168 : i32 to index
    %c0_80 = arith.constant 0 : index
    %c0_81 = arith.constant 0 : index
    %170 = vector.load %arg10[%169, %c0_80, %c0_81] : memref<8x8x64xf32, #tpu.memory_space<vmem>>, vector<1x8x64xf32>
    %171 = vector.shape_cast %170 : vector<1x8x64xf32> to vector<8x64xf32>
    %cst_82 = arith.constant dense<0.000000e+00> : vector<8x8xf32>
    %172 = tpu.matmul %161, %166, %cst_82 {dimension_numbers = #tpu.dot_dimension_numbers<[1], [1], [0], [0], [0, 0, 1, 0], [], []>} : vector<8x64xf32>, vector<8x64xf32>, vector<8x8xf32> -> vector<8x8xf32>
    %173 = arith.index_cast %c3_i32 : i32 to index
    %c0_83 = arith.constant 0 : index
    %c0_84 = arith.constant 0 : index
    %174 = vector.load %arg13[%173, %c0_83, %c0_84] : memref<8x8x1xf32, #tpu.memory_space<vmem>>, vector<1x8x1xf32>
    %175 = vector.shape_cast %174 : vector<1x8x1xf32> to vector<8x1xf32>
    %cst_85 = arith.constant dense<0xFF800000> : vector<8xf32>
    %176 = vector.multi_reduction <maximumf>, %172, %cst_85 [1] : vector<8x8xf32> to vector<8xf32>
    %177 = vector.shape_cast %176 : vector<8xf32> to vector<8x1xf32>
    %178 = arith.maximumf %175, %177 : vector<8x1xf32>
    %179 = arith.subf %175, %178 : vector<8x1xf32>
    %180 = math.exp %179 : vector<8x1xf32>
    %181 = vector.broadcast %178 : vector<8x1xf32> to vector<8x8xf32>
    %182 = arith.subf %172, %181 : vector<8x8xf32>
    %183 = math.exp %182 : vector<8x8xf32>
    %184 = arith.index_cast %c3_i32 : i32 to index
    %c0_86 = arith.constant 0 : index
    %c0_87 = arith.constant 0 : index
    %185 = vector.load %arg14[%184, %c0_86, %c0_87] : memref<8x8x1xf32, #tpu.memory_space<vmem>>, vector<1x8x1xf32>
    %186 = vector.shape_cast %185 : vector<1x8x1xf32> to vector<8x1xf32>
    %187 = arith.mulf %180, %186 : vector<8x1xf32>
    %cst_88 = arith.constant dense<0.000000e+00> : vector<8xf32>
    %188 = vector.multi_reduction <add>, %183, %cst_88 [1] : vector<8x8xf32> to vector<8xf32>
    %189 = vector.shape_cast %188 : vector<8xf32> to vector<8x1xf32>
    %190 = arith.addf %187, %189 : vector<8x1xf32>
    %191 = arith.index_cast %c3_i32 : i32 to index
    %c0_89 = arith.constant 0 : index
    %c0_90 = arith.constant 0 : index
    %192 = vector.load %arg14[%191, %c0_89, %c0_90] : memref<8x8x1xf32, #tpu.memory_space<vmem>>, vector<1x8x1xf32>
    %193 = vector.shape_cast %192 : vector<1x8x1xf32> to vector<8x1xf32>
    %194 = vector.shape_cast %190 : vector<8x1xf32> to vector<1x8x1xf32>
    tpu.vector_store %arg14[%191, %c0_89, %c0_90], %194 {strides = array<i32>} : memref<8x8x1xf32, #tpu.memory_space<vmem>>, vector<1x8x1xf32>,
    %195 = arith.index_cast %c3_i32 : i32 to index
    %c0_91 = arith.constant 0 : index
    %c0_92 = arith.constant 0 : index
    %196 = vector.load %arg12[%195, %c0_91, %c0_92] : memref<8x8x64xf32, #tpu.memory_space<vmem>>, vector<1x8x64xf32>
    %197 = vector.shape_cast %196 : vector<1x8x64xf32> to vector<8x64xf32>
    %198 = vector.broadcast %180 : vector<8x1xf32> to vector<8x64xf32>
    %199 = arith.mulf %198, %197 : vector<8x64xf32>
    %cst_93 = arith.constant dense<0.000000e+00> : vector<8x64xf32>
    %200 = tpu.matmul %183, %171, %cst_93 {dimension_numbers = #tpu.dot_dimension_numbers<[1], [0], [0], [1], [0, 0, 1, 1], [], []>} : vector<8x8xf32>, vector<8x64xf32>, vector<8x64xf32> -> vector<8x64xf32>
    %201 = arith.addf %199, %200 : vector<8x64xf32>
    %202 = arith.index_cast %c3_i32 : i32 to index
    %c0_94 = arith.constant 0 : index
    %c0_95 = arith.constant 0 : index
    %203 = vector.load %arg12[%202, %c0_94, %c0_95] : memref<8x8x64xf32, #tpu.memory_space<vmem>>, vector<1x8x64xf32>
    %204 = vector.shape_cast %203 : vector<1x8x64xf32> to vector<8x64xf32>
    %205 = vector.shape_cast %201 : vector<8x64xf32> to vector<1x8x64xf32>
    tpu.vector_store %arg12[%202, %c0_94, %c0_95], %205 {strides = array<i32>} : memref<8x8x64xf32, #tpu.memory_space<vmem>>, vector<1x8x64xf32>,
    %206 = arith.index_cast %c3_i32 : i32 to index
    %c0_96 = arith.constant 0 : index
    %c0_97 = arith.constant 0 : index
    %207 = vector.load %arg13[%206, %c0_96, %c0_97] : memref<8x8x1xf32, #tpu.memory_space<vmem>>, vector<1x8x1xf32>
    %208 = vector.shape_cast %207 : vector<1x8x1xf32> to vector<8x1xf32>
    %209 = vector.shape_cast %178 : vector<8x1xf32> to vector<1x8x1xf32>
    tpu.vector_store %arg13[%206, %c0_96, %c0_97], %209 {strides = array<i32>} : memref<8x8x1xf32, #tpu.memory_space<vmem>>, vector<1x8x1xf32>,
    %c4_i32 = arith.constant 4 : i32
    %210 = arith.index_cast %c4_i32 : i32 to index
    %c0_98 = arith.constant 0 : index
    %c0_99 = arith.constant 0 : index
    %211 = vector.load %arg11[%210, %c0_98, %c0_99] : memref<8x8x64xf32, #tpu.memory_space<vmem>>, vector<1x8x64xf32>
    %212 = vector.shape_cast %211 : vector<1x8x64xf32> to vector<8x64xf32>
    %c1_i32_100 = arith.constant 1 : i32
    %213 = arith.muli %c4_i32, %c1_i32_100 : i32
    %214 = arith.addi %213, %arg2 : i32
    %215 = arith.index_cast %214 : i32 to index
    %c0_101 = arith.constant 0 : index
    %c0_102 = arith.constant 0 : index
    %216 = vector.load %arg9[%215, %c0_101, %c0_102] : memref<8x8x64xf32, #tpu.memory_space<vmem>>, vector<1x8x64xf32>
    %217 = vector.shape_cast %216 : vector<1x8x64xf32> to vector<8x64xf32>
    %c1_i32_103 = arith.constant 1 : i32
    %218 = arith.muli %c4_i32, %c1_i32_103 : i32
    %219 = arith.addi %218, %arg2 : i32
    %220 = arith.index_cast %219 : i32 to index
    %c0_104 = arith.constant 0 : index
    %c0_105 = arith.constant 0 : index
    %221 = vector.load %arg10[%220, %c0_104, %c0_105] : memref<8x8x64xf32, #tpu.memory_space<vmem>>, vector<1x8x64xf32>
    %222 = vector.shape_cast %221 : vector<1x8x64xf32> to vector<8x64xf32>
    %cst_106 = arith.constant dense<0.000000e+00> : vector<8x8xf32>
    %223 = tpu.matmul %212, %217, %cst_106 {dimension_numbers = #tpu.dot_dimension_numbers<[1], [1], [0], [0], [0, 0, 1, 0], [], []>} : vector<8x64xf32>, vector<8x64xf32>, vector<8x8xf32> -> vector<8x8xf32>
    %224 = arith.index_cast %c4_i32 : i32 to index
    %c0_107 = arith.constant 0 : index
    %c0_108 = arith.constant 0 : index
    %225 = vector.load %arg13[%224, %c0_107, %c0_108] : memref<8x8x1xf32, #tpu.memory_space<vmem>>, vector<1x8x1xf32>
    %226 = vector.shape_cast %225 : vector<1x8x1xf32> to vector<8x1xf32>
    %cst_109 = arith.constant dense<0xFF800000> : vector<8xf32>
    %227 = vector.multi_reduction <maximumf>, %223, %cst_109 [1] : vector<8x8xf32> to vector<8xf32>
    %228 = vector.shape_cast %227 : vector<8xf32> to vector<8x1xf32>
    %229 = arith.maximumf %226, %228 : vector<8x1xf32>
    %230 = arith.subf %226, %229 : vector<8x1xf32>
    %231 = math.exp %230 : vector<8x1xf32>
    %232 = vector.broadcast %229 : vector<8x1xf32> to vector<8x8xf32>
    %233 = arith.subf %223, %232 : vector<8x8xf32>
    %234 = math.exp %233 : vector<8x8xf32>
    %235 = arith.index_cast %c4_i32 : i32 to index
    %c0_110 = arith.constant 0 : index
    %c0_111 = arith.constant 0 : index
    %236 = vector.load %arg14[%235, %c0_110, %c0_111] : memref<8x8x1xf32, #tpu.memory_space<vmem>>, vector<1x8x1xf32>
    %237 = vector.shape_cast %236 : vector<1x8x1xf32> to vector<8x1xf32>
    %238 = arith.mulf %231, %237 : vector<8x1xf32>
    %cst_112 = arith.constant dense<0.000000e+00> : vector<8xf32>
    %239 = vector.multi_reduction <add>, %234, %cst_112 [1] : vector<8x8xf32> to vector<8xf32>
    %240 = vector.shape_cast %239 : vector<8xf32> to vector<8x1xf32>
    %241 = arith.addf %238, %240 : vector<8x1xf32>
    %242 = arith.index_cast %c4_i32 : i32 to index
    %c0_113 = arith.constant 0 : index
    %c0_114 = arith.constant 0 : index
    %243 = vector.load %arg14[%242, %c0_113, %c0_114] : memref<8x8x1xf32, #tpu.memory_space<vmem>>, vector<1x8x1xf32>
    %244 = vector.shape_cast %243 : vector<1x8x1xf32> to vector<8x1xf32>
    %245 = vector.shape_cast %241 : vector<8x1xf32> to vector<1x8x1xf32>
    tpu.vector_store %arg14[%242, %c0_113, %c0_114], %245 {strides = array<i32>} : memref<8x8x1xf32, #tpu.memory_space<vmem>>, vector<1x8x1xf32>,
    %246 = arith.index_cast %c4_i32 : i32 to index
    %c0_115 = arith.constant 0 : index
    %c0_116 = arith.constant 0 : index
    %247 = vector.load %arg12[%246, %c0_115, %c0_116] : memref<8x8x64xf32, #tpu.memory_space<vmem>>, vector<1x8x64xf32>
    %248 = vector.shape_cast %247 : vector<1x8x64xf32> to vector<8x64xf32>
    %249 = vector.broadcast %231 : vector<8x1xf32> to vector<8x64xf32>
    %250 = arith.mulf %249, %248 : vector<8x64xf32>
    %cst_117 = arith.constant dense<0.000000e+00> : vector<8x64xf32>
    %251 = tpu.matmul %234, %222, %cst_117 {dimension_numbers = #tpu.dot_dimension_numbers<[1], [0], [0], [1], [0, 0, 1, 1], [], []>} : vector<8x8xf32>, vector<8x64xf32>, vector<8x64xf32> -> vector<8x64xf32>
    %252 = arith.addf %250, %251 : vector<8x64xf32>
    %253 = arith.index_cast %c4_i32 : i32 to index
    %c0_118 = arith.constant 0 : index
    %c0_119 = arith.constant 0 : index
    %254 = vector.load %arg12[%253, %c0_118, %c0_119] : memref<8x8x64xf32, #tpu.memory_space<vmem>>, vector<1x8x64xf32>
    %255 = vector.shape_cast %254 : vector<1x8x64xf32> to vector<8x64xf32>
    %256 = vector.shape_cast %252 : vector<8x64xf32> to vector<1x8x64xf32>
    tpu.vector_store %arg12[%253, %c0_118, %c0_119], %256 {strides = array<i32>} : memref<8x8x64xf32, #tpu.memory_space<vmem>>, vector<1x8x64xf32>,
    %257 = arith.index_cast %c4_i32 : i32 to index
    %c0_120 = arith.constant 0 : index
    %c0_121 = arith.constant 0 : index
    %258 = vector.load %arg13[%257, %c0_120, %c0_121] : memref<8x8x1xf32, #tpu.memory_space<vmem>>, vector<1x8x1xf32>
    %259 = vector.shape_cast %258 : vector<1x8x1xf32> to vector<8x1xf32>
    %260 = vector.shape_cast %229 : vector<8x1xf32> to vector<1x8x1xf32>
    tpu.vector_store %arg13[%257, %c0_120, %c0_121], %260 {strides = array<i32>} : memref<8x8x1xf32, #tpu.memory_space<vmem>>, vector<1x8x1xf32>,
    %c5_i32 = arith.constant 5 : i32
    %261 = arith.index_cast %c5_i32 : i32 to index
    %c0_122 = arith.constant 0 : index
    %c0_123 = arith.constant 0 : index
    %262 = vector.load %arg11[%261, %c0_122, %c0_123] : memref<8x8x64xf32, #tpu.memory_space<vmem>>, vector<1x8x64xf32>
    %263 = vector.shape_cast %262 : vector<1x8x64xf32> to vector<8x64xf32>
    %c1_i32_124 = arith.constant 1 : i32
    %264 = arith.muli %c5_i32, %c1_i32_124 : i32
    %265 = arith.addi %264, %arg2 : i32
    %266 = arith.index_cast %265 : i32 to index
    %c0_125 = arith.constant 0 : index
    %c0_126 = arith.constant 0 : index
    %267 = vector.load %arg9[%266, %c0_125, %c0_126] : memref<8x8x64xf32, #tpu.memory_space<vmem>>, vector<1x8x64xf32>
    %268 = vector.shape_cast %267 : vector<1x8x64xf32> to vector<8x64xf32>
    %c1_i32_127 = arith.constant 1 : i32
    %269 = arith.muli %c5_i32, %c1_i32_127 : i32
    %270 = arith.addi %269, %arg2 : i32
    %271 = arith.index_cast %270 : i32 to index
    %c0_128 = arith.constant 0 : index
    %c0_129 = arith.constant 0 : index
    %272 = vector.load %arg10[%271, %c0_128, %c0_129] : memref<8x8x64xf32, #tpu.memory_space<vmem>>, vector<1x8x64xf32>
    %273 = vector.shape_cast %272 : vector<1x8x64xf32> to vector<8x64xf32>
    %cst_130 = arith.constant dense<0.000000e+00> : vector<8x8xf32>
    %274 = tpu.matmul %263, %268, %cst_130 {dimension_numbers = #tpu.dot_dimension_numbers<[1], [1], [0], [0], [0, 0, 1, 0], [], []>} : vector<8x64xf32>, vector<8x64xf32>, vector<8x8xf32> -> vector<8x8xf32>
    %275 = arith.index_cast %c5_i32 : i32 to index
    %c0_131 = arith.constant 0 : index
    %c0_132 = arith.constant 0 : index
    %276 = vector.load %arg13[%275, %c0_131, %c0_132] : memref<8x8x1xf32, #tpu.memory_space<vmem>>, vector<1x8x1xf32>
    %277 = vector.shape_cast %276 : vector<1x8x1xf32> to vector<8x1xf32>
    %cst_133 = arith.constant dense<0xFF800000> : vector<8xf32>
    %278 = vector.multi_reduction <maximumf>, %274, %cst_133 [1] : vector<8x8xf32> to vector<8xf32>
    %279 = vector.shape_cast %278 : vector<8xf32> to vector<8x1xf32>
    %280 = arith.maximumf %277, %279 : vector<8x1xf32>
    %281 = arith.subf %277, %280 : vector<8x1xf32>
    %282 = math.exp %281 : vector<8x1xf32>
    %283 = vector.broadcast %280 : vector<8x1xf32> to vector<8x8xf32>
    %284 = arith.subf %274, %283 : vector<8x8xf32>
    %285 = math.exp %284 : vector<8x8xf32>
    %286 = arith.index_cast %c5_i32 : i32 to index
    %c0_134 = arith.constant 0 : index
    %c0_135 = arith.constant 0 : index
    %287 = vector.load %arg14[%286, %c0_134, %c0_135] : memref<8x8x1xf32, #tpu.memory_space<vmem>>, vector<1x8x1xf32>
    %288 = vector.shape_cast %287 : vector<1x8x1xf32> to vector<8x1xf32>
    %289 = arith.mulf %282, %288 : vector<8x1xf32>
    %cst_136 = arith.constant dense<0.000000e+00> : vector<8xf32>
    %290 = vector.multi_reduction <add>, %285, %cst_136 [1] : vector<8x8xf32> to vector<8xf32>
    %291 = vector.shape_cast %290 : vector<8xf32> to vector<8x1xf32>
    %292 = arith.addf %289, %291 : vector<8x1xf32>
    %293 = arith.index_cast %c5_i32 : i32 to index
    %c0_137 = arith.constant 0 : index
    %c0_138 = arith.constant 0 : index
    %294 = vector.load %arg14[%293, %c0_137, %c0_138] : memref<8x8x1xf32, #tpu.memory_space<vmem>>, vector<1x8x1xf32>
    %295 = vector.shape_cast %294 : vector<1x8x1xf32> to vector<8x1xf32>
    %296 = vector.shape_cast %292 : vector<8x1xf32> to vector<1x8x1xf32>
    tpu.vector_store %arg14[%293, %c0_137, %c0_138], %296 {strides = array<i32>} : memref<8x8x1xf32, #tpu.memory_space<vmem>>, vector<1x8x1xf32>,
    %297 = arith.index_cast %c5_i32 : i32 to index
    %c0_139 = arith.constant 0 : index
    %c0_140 = arith.constant 0 : index
    %298 = vector.load %arg12[%297, %c0_139, %c0_140] : memref<8x8x64xf32, #tpu.memory_space<vmem>>, vector<1x8x64xf32>
    %299 = vector.shape_cast %298 : vector<1x8x64xf32> to vector<8x64xf32>
    %300 = vector.broadcast %282 : vector<8x1xf32> to vector<8x64xf32>
    %301 = arith.mulf %300, %299 : vector<8x64xf32>
    %cst_141 = arith.constant dense<0.000000e+00> : vector<8x64xf32>
    %302 = tpu.matmul %285, %273, %cst_141 {dimension_numbers = #tpu.dot_dimension_numbers<[1], [0], [0], [1], [0, 0, 1, 1], [], []>} : vector<8x8xf32>, vector<8x64xf32>, vector<8x64xf32> -> vector<8x64xf32>
    %303 = arith.addf %301, %302 : vector<8x64xf32>
    %304 = arith.index_cast %c5_i32 : i32 to index
    %c0_142 = arith.constant 0 : index
    %c0_143 = arith.constant 0 : index
    %305 = vector.load %arg12[%304, %c0_142, %c0_143] : memref<8x8x64xf32, #tpu.memory_space<vmem>>, vector<1x8x64xf32>
    %306 = vector.shape_cast %305 : vector<1x8x64xf32> to vector<8x64xf32>
    %307 = vector.shape_cast %303 : vector<8x64xf32> to vector<1x8x64xf32>
    tpu.vector_store %arg12[%304, %c0_142, %c0_143], %307 {strides = array<i32>} : memref<8x8x64xf32, #tpu.memory_space<vmem>>, vector<1x8x64xf32>,
    %308 = arith.index_cast %c5_i32 : i32 to index
    %c0_144 = arith.constant 0 : index
    %c0_145 = arith.constant 0 : index
    %309 = vector.load %arg13[%308, %c0_144, %c0_145] : memref<8x8x1xf32, #tpu.memory_space<vmem>>, vector<1x8x1xf32>
    %310 = vector.shape_cast %309 : vector<1x8x1xf32> to vector<8x1xf32>
    %311 = vector.shape_cast %280 : vector<8x1xf32> to vector<1x8x1xf32>
    tpu.vector_store %arg13[%308, %c0_144, %c0_145], %311 {strides = array<i32>} : memref<8x8x1xf32, #tpu.memory_space<vmem>>, vector<1x8x1xf32>,
    %c6_i32 = arith.constant 6 : i32
    %312 = arith.index_cast %c6_i32 : i32 to index
    %c0_146 = arith.constant 0 : index
    %c0_147 = arith.constant 0 : index
    %313 = vector.load %arg11[%312, %c0_146, %c0_147] : memref<8x8x64xf32, #tpu.memory_space<vmem>>, vector<1x8x64xf32>
    %314 = vector.shape_cast %313 : vector<1x8x64xf32> to vector<8x64xf32>
    %c1_i32_148 = arith.constant 1 : i32
    %315 = arith.muli %c6_i32, %c1_i32_148 : i32
    %316 = arith.addi %315, %arg2 : i32
    %317 = arith.index_cast %316 : i32 to index
    %c0_149 = arith.constant 0 : index
    %c0_150 = arith.constant 0 : index
    %318 = vector.load %arg9[%317, %c0_149, %c0_150] : memref<8x8x64xf32, #tpu.memory_space<vmem>>, vector<1x8x64xf32>
    %319 = vector.shape_cast %318 : vector<1x8x64xf32> to vector<8x64xf32>
    %c1_i32_151 = arith.constant 1 : i32
    %320 = arith.muli %c6_i32, %c1_i32_151 : i32
    %321 = arith.addi %320, %arg2 : i32
    %322 = arith.index_cast %321 : i32 to index
    %c0_152 = arith.constant 0 : index
    %c0_153 = arith.constant 0 : index
    %323 = vector.load %arg10[%322, %c0_152, %c0_153] : memref<8x8x64xf32, #tpu.memory_space<vmem>>, vector<1x8x64xf32>
    %324 = vector.shape_cast %323 : vector<1x8x64xf32> to vector<8x64xf32>
    %cst_154 = arith.constant dense<0.000000e+00> : vector<8x8xf32>
    %325 = tpu.matmul %314, %319, %cst_154 {dimension_numbers = #tpu.dot_dimension_numbers<[1], [1], [0], [0], [0, 0, 1, 0], [], []>} : vector<8x64xf32>, vector<8x64xf32>, vector<8x8xf32> -> vector<8x8xf32>
    %326 = arith.index_cast %c6_i32 : i32 to index
    %c0_155 = arith.constant 0 : index
    %c0_156 = arith.constant 0 : index
    %327 = vector.load %arg13[%326, %c0_155, %c0_156] : memref<8x8x1xf32, #tpu.memory_space<vmem>>, vector<1x8x1xf32>
    %328 = vector.shape_cast %327 : vector<1x8x1xf32> to vector<8x1xf32>
    %cst_157 = arith.constant dense<0xFF800000> : vector<8xf32>
    %329 = vector.multi_reduction <maximumf>, %325, %cst_157 [1] : vector<8x8xf32> to vector<8xf32>
    %330 = vector.shape_cast %329 : vector<8xf32> to vector<8x1xf32>
    %331 = arith.maximumf %328, %330 : vector<8x1xf32>
    %332 = arith.subf %328, %331 : vector<8x1xf32>
    %333 = math.exp %332 : vector<8x1xf32>
    %334 = vector.broadcast %331 : vector<8x1xf32> to vector<8x8xf32>
    %335 = arith.subf %325, %334 : vector<8x8xf32>
    %336 = math.exp %335 : vector<8x8xf32>
    %337 = arith.index_cast %c6_i32 : i32 to index
    %c0_158 = arith.constant 0 : index
    %c0_159 = arith.constant 0 : index
    %338 = vector.load %arg14[%337, %c0_158, %c0_159] : memref<8x8x1xf32, #tpu.memory_space<vmem>>, vector<1x8x1xf32>
    %339 = vector.shape_cast %338 : vector<1x8x1xf32> to vector<8x1xf32>
    %340 = arith.mulf %333, %339 : vector<8x1xf32>
    %cst_160 = arith.constant dense<0.000000e+00> : vector<8xf32>
    %341 = vector.multi_reduction <add>, %336, %cst_160 [1] : vector<8x8xf32> to vector<8xf32>
    %342 = vector.shape_cast %341 : vector<8xf32> to vector<8x1xf32>
    %343 = arith.addf %340, %342 : vector<8x1xf32>
    %344 = arith.index_cast %c6_i32 : i32 to index
    %c0_161 = arith.constant 0 : index
    %c0_162 = arith.constant 0 : index
    %345 = vector.load %arg14[%344, %c0_161, %c0_162] : memref<8x8x1xf32, #tpu.memory_space<vmem>>, vector<1x8x1xf32>
    %346 = vector.shape_cast %345 : vector<1x8x1xf32> to vector<8x1xf32>
    %347 = vector.shape_cast %343 : vector<8x1xf32> to vector<1x8x1xf32>
    tpu.vector_store %arg14[%344, %c0_161, %c0_162], %347 {strides = array<i32>} : memref<8x8x1xf32, #tpu.memory_space<vmem>>, vector<1x8x1xf32>,
    %348 = arith.index_cast %c6_i32 : i32 to index
    %c0_163 = arith.constant 0 : index
    %c0_164 = arith.constant 0 : index
    %349 = vector.load %arg12[%348, %c0_163, %c0_164] : memref<8x8x64xf32, #tpu.memory_space<vmem>>, vector<1x8x64xf32>
    %350 = vector.shape_cast %349 : vector<1x8x64xf32> to vector<8x64xf32>
    %351 = vector.broadcast %333 : vector<8x1xf32> to vector<8x64xf32>
    %352 = arith.mulf %351, %350 : vector<8x64xf32>
    %cst_165 = arith.constant dense<0.000000e+00> : vector<8x64xf32>
    %353 = tpu.matmul %336, %324, %cst_165 {dimension_numbers = #tpu.dot_dimension_numbers<[1], [0], [0], [1], [0, 0, 1, 1], [], []>} : vector<8x8xf32>, vector<8x64xf32>, vector<8x64xf32> -> vector<8x64xf32>
    %354 = arith.addf %352, %353 : vector<8x64xf32>
    %355 = arith.index_cast %c6_i32 : i32 to index
    %c0_166 = arith.constant 0 : index
    %c0_167 = arith.constant 0 : index
    %356 = vector.load %arg12[%355, %c0_166, %c0_167] : memref<8x8x64xf32, #tpu.memory_space<vmem>>, vector<1x8x64xf32>
    %357 = vector.shape_cast %356 : vector<1x8x64xf32> to vector<8x64xf32>
    %358 = vector.shape_cast %354 : vector<8x64xf32> to vector<1x8x64xf32>
    tpu.vector_store %arg12[%355, %c0_166, %c0_167], %358 {strides = array<i32>} : memref<8x8x64xf32, #tpu.memory_space<vmem>>, vector<1x8x64xf32>,
    %359 = arith.index_cast %c6_i32 : i32 to index
    %c0_168 = arith.constant 0 : index
    %c0_169 = arith.constant 0 : index
    %360 = vector.load %arg13[%359, %c0_168, %c0_169] : memref<8x8x1xf32, #tpu.memory_space<vmem>>, vector<1x8x1xf32>
    %361 = vector.shape_cast %360 : vector<1x8x1xf32> to vector<8x1xf32>
    %362 = vector.shape_cast %331 : vector<8x1xf32> to vector<1x8x1xf32>
    tpu.vector_store %arg13[%359, %c0_168, %c0_169], %362 {strides = array<i32>} : memref<8x8x1xf32, #tpu.memory_space<vmem>>, vector<1x8x1xf32>,
    %c7_i32 = arith.constant 7 : i32
    %363 = arith.index_cast %c7_i32 : i32 to index
    %c0_170 = arith.constant 0 : index
    %c0_171 = arith.constant 0 : index
    %364 = vector.load %arg11[%363, %c0_170, %c0_171] : memref<8x8x64xf32, #tpu.memory_space<vmem>>, vector<1x8x64xf32>
    %365 = vector.shape_cast %364 : vector<1x8x64xf32> to vector<8x64xf32>
    %c1_i32_172 = arith.constant 1 : i32
    %366 = arith.muli %c7_i32, %c1_i32_172 : i32
    %367 = arith.addi %366, %arg2 : i32
    %368 = arith.index_cast %367 : i32 to index
    %c0_173 = arith.constant 0 : index
    %c0_174 = arith.constant 0 : index
    %369 = vector.load %arg9[%368, %c0_173, %c0_174] : memref<8x8x64xf32, #tpu.memory_space<vmem>>, vector<1x8x64xf32>
    %370 = vector.shape_cast %369 : vector<1x8x64xf32> to vector<8x64xf32>
    %c1_i32_175 = arith.constant 1 : i32
    %371 = arith.muli %c7_i32, %c1_i32_175 : i32
    %372 = arith.addi %371, %arg2 : i32
    %373 = arith.index_cast %372 : i32 to index
    %c0_176 = arith.constant 0 : index
    %c0_177 = arith.constant 0 : index
    %374 = vector.load %arg10[%373, %c0_176, %c0_177] : memref<8x8x64xf32, #tpu.memory_space<vmem>>, vector<1x8x64xf32>
    %375 = vector.shape_cast %374 : vector<1x8x64xf32> to vector<8x64xf32>
    %cst_178 = arith.constant dense<0.000000e+00> : vector<8x8xf32>
    %376 = tpu.matmul %365, %370, %cst_178 {dimension_numbers = #tpu.dot_dimension_numbers<[1], [1], [0], [0], [0, 0, 1, 0], [], []>} : vector<8x64xf32>, vector<8x64xf32>, vector<8x8xf32> -> vector<8x8xf32>
    %377 = arith.index_cast %c7_i32 : i32 to index
    %c0_179 = arith.constant 0 : index
    %c0_180 = arith.constant 0 : index
    %378 = vector.load %arg13[%377, %c0_179, %c0_180] : memref<8x8x1xf32, #tpu.memory_space<vmem>>, vector<1x8x1xf32>
    %379 = vector.shape_cast %378 : vector<1x8x1xf32> to vector<8x1xf32>
    %cst_181 = arith.constant dense<0xFF800000> : vector<8xf32>
    %380 = vector.multi_reduction <maximumf>, %376, %cst_181 [1] : vector<8x8xf32> to vector<8xf32>
    %381 = vector.shape_cast %380 : vector<8xf32> to vector<8x1xf32>
    %382 = arith.maximumf %379, %381 : vector<8x1xf32>
    %383 = arith.subf %379, %382 : vector<8x1xf32>
    %384 = math.exp %383 : vector<8x1xf32>
    %385 = vector.broadcast %382 : vector<8x1xf32> to vector<8x8xf32>
    %386 = arith.subf %376, %385 : vector<8x8xf32>
    %387 = math.exp %386 : vector<8x8xf32>
    %388 = arith.index_cast %c7_i32 : i32 to index
    %c0_182 = arith.constant 0 : index
    %c0_183 = arith.constant 0 : index
    %389 = vector.load %arg14[%388, %c0_182, %c0_183] : memref<8x8x1xf32, #tpu.memory_space<vmem>>, vector<1x8x1xf32>
    %390 = vector.shape_cast %389 : vector<1x8x1xf32> to vector<8x1xf32>
    %391 = arith.mulf %384, %390 : vector<8x1xf32>
    %cst_184 = arith.constant dense<0.000000e+00> : vector<8xf32>
    %392 = vector.multi_reduction <add>, %387, %cst_184 [1] : vector<8x8xf32> to vector<8xf32>
    %393 = vector.shape_cast %392 : vector<8xf32> to vector<8x1xf32>
    %394 = arith.addf %391, %393 : vector<8x1xf32>
    %395 = arith.index_cast %c7_i32 : i32 to index
    %c0_185 = arith.constant 0 : index
    %c0_186 = arith.constant 0 : index
    %396 = vector.load %arg14[%395, %c0_185, %c0_186] : memref<8x8x1xf32, #tpu.memory_space<vmem>>, vector<1x8x1xf32>
    %397 = vector.shape_cast %396 : vector<1x8x1xf32> to vector<8x1xf32>
    %398 = vector.shape_cast %394 : vector<8x1xf32> to vector<1x8x1xf32>
    tpu.vector_store %arg14[%395, %c0_185, %c0_186], %398 {strides = array<i32>} : memref<8x8x1xf32, #tpu.memory_space<vmem>>, vector<1x8x1xf32>,
    %399 = arith.index_cast %c7_i32 : i32 to index
    %c0_187 = arith.constant 0 : index
    %c0_188 = arith.constant 0 : index
    %400 = vector.load %arg12[%399, %c0_187, %c0_188] : memref<8x8x64xf32, #tpu.memory_space<vmem>>, vector<1x8x64xf32>
    %401 = vector.shape_cast %400 : vector<1x8x64xf32> to vector<8x64xf32>
    %402 = vector.broadcast %384 : vector<8x1xf32> to vector<8x64xf32>
    %403 = arith.mulf %402, %401 : vector<8x64xf32>
    %cst_189 = arith.constant dense<0.000000e+00> : vector<8x64xf32>
    %404 = tpu.matmul %387, %375, %cst_189 {dimension_numbers = #tpu.dot_dimension_numbers<[1], [0], [0], [1], [0, 0, 1, 1], [], []>} : vector<8x8xf32>, vector<8x64xf32>, vector<8x64xf32> -> vector<8x64xf32>
    %405 = arith.addf %403, %404 : vector<8x64xf32>
    %406 = arith.index_cast %c7_i32 : i32 to index
    %c0_190 = arith.constant 0 : index
    %c0_191 = arith.constant 0 : index
    %407 = vector.load %arg12[%406, %c0_190, %c0_191] : memref<8x8x64xf32, #tpu.memory_space<vmem>>, vector<1x8x64xf32>
    %408 = vector.shape_cast %407 : vector<1x8x64xf32> to vector<8x64xf32>
    %409 = vector.shape_cast %405 : vector<8x64xf32> to vector<1x8x64xf32>
    tpu.vector_store %arg12[%406, %c0_190, %c0_191], %409 {strides = array<i32>} : memref<8x8x64xf32, #tpu.memory_space<vmem>>, vector<1x8x64xf32>,
    %410 = arith.index_cast %c7_i32 : i32 to index
    %c0_192 = arith.constant 0 : index
    %c0_193 = arith.constant 0 : index
    %411 = vector.load %arg13[%410, %c0_192, %c0_193] : memref<8x8x1xf32, #tpu.memory_space<vmem>>, vector<1x8x1xf32>
    %412 = vector.shape_cast %411 : vector<1x8x1xf32> to vector<8x1xf32>
    %413 = vector.shape_cast %382 : vector<8x1xf32> to vector<1x8x1xf32>
    tpu.vector_store %arg13[%410, %c0_192, %c0_193], %413 {strides = array<i32>} : memref<8x8x1xf32, #tpu.memory_space<vmem>>, vector<1x8x1xf32>,
    %c8_i32 = arith.constant 8 : i32
    %c0_i32_194 = arith.constant 0 : i32
    %414 = arith.cmpi eq, %arg2, %c0_i32_194 : i32
    %415 = arith.extui %414 : i1 to i32
    %c0_i32_195 = arith.constant 0 : i32
    %416 = arith.cmpi ne, %415, %c0_i32_195 : i32
    scf.if %416 {
      %c0_196 = arith.constant 0 : index
      %c0_197 = arith.constant 0 : index
      %c0_198 = arith.constant 0 : index
      %417 = vector.load %arg12[%c0_196, %c0_197, %c0_198] : memref<8x8x64xf32, #tpu.memory_space<vmem>>, vector<1x8x64xf32>
      %418 = vector.shape_cast %417 : vector<1x8x64xf32> to vector<8x64xf32>
      %c0_199 = arith.constant 0 : index
      %c0_200 = arith.constant 0 : index
      %c0_201 = arith.constant 0 : index
      %419 = vector.load %arg14[%c0_199, %c0_200, %c0_201] : memref<8x8x1xf32, #tpu.memory_space<vmem>>, vector<1x8x1xf32>
      %420 = vector.shape_cast %419 : vector<1x8x1xf32> to vector<8x1xf32>
      %cst_202 = arith.constant 1.000000e+00 : f32
      %421 = vector.broadcast %cst_202 : f32 to vector<8x1xf32>
      %422 = arith.divf %421, %420 : vector<8x1xf32>
      %423 = vector.broadcast %422 : vector<8x1xf32> to vector<8x64xf32>
      %424 = arith.mulf %418, %423 : vector<8x64xf32>
      %c0_203 = arith.constant 0 : index
      %c0_204 = arith.constant 0 : index
      %425 = vector.load %arg15[%c0_203, %c0_204] : memref<8x512xf32, #tpu.memory_space<vmem>>, vector<8x64xf32>
      tpu.vector_store %arg15[%c0_203, %c0_204], %424 {strides = array<i32>} : memref<8x512xf32, #tpu.memory_space<vmem>>, vector<8x64xf32>,
      %c1 = arith.constant 1 : index
      %c0_205 = arith.constant 0 : index
      %c0_206 = arith.constant 0 : index
      %426 = vector.load %arg12[%c1, %c0_205, %c0_206] : memref<8x8x64xf32, #tpu.memory_space<vmem>>, vector<1x8x64xf32>
      %427 = vector.shape_cast %426 : vector<1x8x64xf32> to vector<8x64xf32>
      %c1_207 = arith.constant 1 : index
      %c0_208 = arith.constant 0 : index
      %c0_209 = arith.constant 0 : index
      %428 = vector.load %arg14[%c1_207, %c0_208, %c0_209] : memref<8x8x1xf32, #tpu.memory_space<vmem>>, vector<1x8x1xf32>
      %429 = vector.shape_cast %428 : vector<1x8x1xf32> to vector<8x1xf32>
      %cst_210 = arith.constant 1.000000e+00 : f32
      %430 = vector.broadcast %cst_210 : f32 to vector<8x1xf32>
      %431 = arith.divf %430, %429 : vector<8x1xf32>
      %432 = vector.broadcast %431 : vector<8x1xf32> to vector<8x64xf32>
      %433 = arith.mulf %427, %432 : vector<8x64xf32>
      %c0_211 = arith.constant 0 : index
      %c64 = arith.constant 64 : index
      %434 = vector.load %arg15[%c0_211, %c64] : memref<8x512xf32, #tpu.memory_space<vmem>>, vector<8x64xf32>
      tpu.vector_store %arg15[%c0_211, %c64], %433 {strides = array<i32>} : memref<8x512xf32, #tpu.memory_space<vmem>>, vector<8x64xf32>,
      %c2 = arith.constant 2 : index
      %c0_212 = arith.constant 0 : index
      %c0_213 = arith.constant 0 : index
      %435 = vector.load %arg12[%c2, %c0_212, %c0_213] : memref<8x8x64xf32, #tpu.memory_space<vmem>>, vector<1x8x64xf32>
      %436 = vector.shape_cast %435 : vector<1x8x64xf32> to vector<8x64xf32>
      %c2_214 = arith.constant 2 : index
      %c0_215 = arith.constant 0 : index
      %c0_216 = arith.constant 0 : index
      %437 = vector.load %arg14[%c2_214, %c0_215, %c0_216] : memref<8x8x1xf32, #tpu.memory_space<vmem>>, vector<1x8x1xf32>
      %438 = vector.shape_cast %437 : vector<1x8x1xf32> to vector<8x1xf32>
      %cst_217 = arith.constant 1.000000e+00 : f32
      %439 = vector.broadcast %cst_217 : f32 to vector<8x1xf32>
      %440 = arith.divf %439, %438 : vector<8x1xf32>
      %441 = vector.broadcast %440 : vector<8x1xf32> to vector<8x64xf32>
      %442 = arith.mulf %436, %441 : vector<8x64xf32>
      %c0_218 = arith.constant 0 : index
      %c128 = arith.constant 128 : index
      %443 = vector.load %arg15[%c0_218, %c128] : memref<8x512xf32, #tpu.memory_space<vmem>>, vector<8x64xf32>
      tpu.vector_store %arg15[%c0_218, %c128], %442 {strides = array<i32>} : memref<8x512xf32, #tpu.memory_space<vmem>>, vector<8x64xf32>,
      %c3 = arith.constant 3 : index
      %c0_219 = arith.constant 0 : index
      %c0_220 = arith.constant 0 : index
      %444 = vector.load %arg12[%c3, %c0_219, %c0_220] : memref<8x8x64xf32, #tpu.memory_space<vmem>>, vector<1x8x64xf32>
      %445 = vector.shape_cast %444 : vector<1x8x64xf32> to vector<8x64xf32>
      %c3_221 = arith.constant 3 : index
      %c0_222 = arith.constant 0 : index
      %c0_223 = arith.constant 0 : index
      %446 = vector.load %arg14[%c3_221, %c0_222, %c0_223] : memref<8x8x1xf32, #tpu.memory_space<vmem>>, vector<1x8x1xf32>
      %447 = vector.shape_cast %446 : vector<1x8x1xf32> to vector<8x1xf32>
      %cst_224 = arith.constant 1.000000e+00 : f32
      %448 = vector.broadcast %cst_224 : f32 to vector<8x1xf32>
      %449 = arith.divf %448, %447 : vector<8x1xf32>
      %450 = vector.broadcast %449 : vector<8x1xf32> to vector<8x64xf32>
      %451 = arith.mulf %445, %450 : vector<8x64xf32>
      %c0_225 = arith.constant 0 : index
      %c192 = arith.constant 192 : index
      %452 = vector.load %arg15[%c0_225, %c192] : memref<8x512xf32, #tpu.memory_space<vmem>>, vector<8x64xf32>
      tpu.vector_store %arg15[%c0_225, %c192], %451 {strides = array<i32>} : memref<8x512xf32, #tpu.memory_space<vmem>>, vector<8x64xf32>,
      %c4 = arith.constant 4 : index
      %c0_226 = arith.constant 0 : index
      %c0_227 = arith.constant 0 : index
      %453 = vector.load %arg12[%c4, %c0_226, %c0_227] : memref<8x8x64xf32, #tpu.memory_space<vmem>>, vector<1x8x64xf32>
      %454 = vector.shape_cast %453 : vector<1x8x64xf32> to vector<8x64xf32>
      %c4_228 = arith.constant 4 : index
      %c0_229 = arith.constant 0 : index
      %c0_230 = arith.constant 0 : index
      %455 = vector.load %arg14[%c4_228, %c0_229, %c0_230] : memref<8x8x1xf32, #tpu.memory_space<vmem>>, vector<1x8x1xf32>
      %456 = vector.shape_cast %455 : vector<1x8x1xf32> to vector<8x1xf32>
      %cst_231 = arith.constant 1.000000e+00 : f32
      %457 = vector.broadcast %cst_231 : f32 to vector<8x1xf32>
      %458 = arith.divf %457, %456 : vector<8x1xf32>
      %459 = vector.broadcast %458 : vector<8x1xf32> to vector<8x64xf32>
      %460 = arith.mulf %454, %459 : vector<8x64xf32>
      %c0_232 = arith.constant 0 : index
      %c256 = arith.constant 256 : index
      %461 = vector.load %arg15[%c0_232, %c256] : memref<8x512xf32, #tpu.memory_space<vmem>>, vector<8x64xf32>
      tpu.vector_store %arg15[%c0_232, %c256], %460 {strides = array<i32>} : memref<8x512xf32, #tpu.memory_space<vmem>>, vector<8x64xf32>,
      %c5 = arith.constant 5 : index
      %c0_233 = arith.constant 0 : index
      %c0_234 = arith.constant 0 : index
      %462 = vector.load %arg12[%c5, %c0_233, %c0_234] : memref<8x8x64xf32, #tpu.memory_space<vmem>>, vector<1x8x64xf32>
      %463 = vector.shape_cast %462 : vector<1x8x64xf32> to vector<8x64xf32>
      %c5_235 = arith.constant 5 : index
      %c0_236 = arith.constant 0 : index
      %c0_237 = arith.constant 0 : index
      %464 = vector.load %arg14[%c5_235, %c0_236, %c0_237] : memref<8x8x1xf32, #tpu.memory_space<vmem>>, vector<1x8x1xf32>
      %465 = vector.shape_cast %464 : vector<1x8x1xf32> to vector<8x1xf32>
      %cst_238 = arith.constant 1.000000e+00 : f32
      %466 = vector.broadcast %cst_238 : f32 to vector<8x1xf32>
      %467 = arith.divf %466, %465 : vector<8x1xf32>
      %468 = vector.broadcast %467 : vector<8x1xf32> to vector<8x64xf32>
      %469 = arith.mulf %463, %468 : vector<8x64xf32>
      %c0_239 = arith.constant 0 : index
      %c320 = arith.constant 320 : index
      %470 = vector.load %arg15[%c0_239, %c320] : memref<8x512xf32, #tpu.memory_space<vmem>>, vector<8x64xf32>
      tpu.vector_store %arg15[%c0_239, %c320], %469 {strides = array<i32>} : memref<8x512xf32, #tpu.memory_space<vmem>>, vector<8x64xf32>,
      %c6 = arith.constant 6 : index
      %c0_240 = arith.constant 0 : index
      %c0_241 = arith.constant 0 : index
      %471 = vector.load %arg12[%c6, %c0_240, %c0_241] : memref<8x8x64xf32, #tpu.memory_space<vmem>>, vector<1x8x64xf32>
      %472 = vector.shape_cast %471 : vector<1x8x64xf32> to vector<8x64xf32>
      %c6_242 = arith.constant 6 : index
      %c0_243 = arith.constant 0 : index
      %c0_244 = arith.constant 0 : index
      %473 = vector.load %arg14[%c6_242, %c0_243, %c0_244] : memref<8x8x1xf32, #tpu.memory_space<vmem>>, vector<1x8x1xf32>
      %474 = vector.shape_cast %473 : vector<1x8x1xf32> to vector<8x1xf32>
      %cst_245 = arith.constant 1.000000e+00 : f32
      %475 = vector.broadcast %cst_245 : f32 to vector<8x1xf32>
      %476 = arith.divf %475, %474 : vector<8x1xf32>
      %477 = vector.broadcast %476 : vector<8x1xf32> to vector<8x64xf32>
      %478 = arith.mulf %472, %477 : vector<8x64xf32>
      %c0_246 = arith.constant 0 : index
      %c384 = arith.constant 384 : index
      %479 = vector.load %arg15[%c0_246, %c384] : memref<8x512xf32, #tpu.memory_space<vmem>>, vector<8x64xf32>
      tpu.vector_store %arg15[%c0_246, %c384], %478 {strides = array<i32>} : memref<8x512xf32, #tpu.memory_space<vmem>>, vector<8x64xf32>,
      %c7 = arith.constant 7 : index
      %c0_247 = arith.constant 0 : index
      %c0_248 = arith.constant 0 : index
      %480 = vector.load %arg12[%c7, %c0_247, %c0_248] : memref<8x8x64xf32, #tpu.memory_space<vmem>>, vector<1x8x64xf32>
      %481 = vector.shape_cast %480 : vector<1x8x64xf32> to vector<8x64xf32>
      %c7_249 = arith.constant 7 : index
      %c0_250 = arith.constant 0 : index
      %c0_251 = arith.constant 0 : index
      %482 = vector.load %arg14[%c7_249, %c0_250, %c0_251] : memref<8x8x1xf32, #tpu.memory_space<vmem>>, vector<1x8x1xf32>
      %483 = vector.shape_cast %482 : vector<1x8x1xf32> to vector<8x1xf32>
      %cst_252 = arith.constant 1.000000e+00 : f32
      %484 = vector.broadcast %cst_252 : f32 to vector<8x1xf32>
      %485 = arith.divf %484, %483 : vector<8x1xf32>
      %486 = vector.broadcast %485 : vector<8x1xf32> to vector<8x64xf32>
      %487 = arith.mulf %481, %486 : vector<8x64xf32>
      %c0_253 = arith.constant 0 : index
      %c448 = arith.constant 448 : index
      %488 = vector.load %arg15[%c0_253, %c448] : memref<8x512xf32, #tpu.memory_space<vmem>>, vector<8x64xf32>
      tpu.vector_store %arg15[%c0_253, %c448], %487 {strides = array<i32>} : memref<8x512xf32, #tpu.memory_space<vmem>>, vector<8x64xf32>,
      %c0_254 = arith.constant 0 : index
      %c0_255 = arith.constant 0 : index
      %489 = vector.load %arg15[%c0_254, %c0_255] : memref<8x512xf32, #tpu.memory_space<vmem>>, vector<8x512xf32>
      %c0_256 = arith.constant 0 : index
      %c0_257 = arith.constant 0 : index
      %490 = vector.load %arg6[%c0_256, %c0_257] : memref<512x32xf32, #tpu.memory_space<vmem>>, vector<512x32xf32>
      %cst_258 = arith.constant dense<0.000000e+00> : vector<8x32xf32>
      %491 = tpu.matmul %489, %490, %cst_258 {dimension_numbers = #tpu.dot_dimension_numbers<[1], [0], [0], [1], [0, 0, 1, 1], [], []>} : vector<8x512xf32>, vector<512x32xf32>, vector<8x32xf32> -> vector<8x32xf32>
      %c0_259 = arith.constant 0 : index
      %c0_260 = arith.constant 0 : index
      %492 = vector.load %arg7[%c0_259, %c0_260] : memref<1x32xf32, #tpu.memory_space<vmem>>, vector<1x32xf32>
      %493 = vector.broadcast %492 : vector<1x32xf32> to vector<8x32xf32>
      %494 = arith.addf %491, %493 : vector<8x32xf32>
      %c0_261 = arith.constant 0 : index
      %c0_262 = arith.constant 0 : index
      %c0_263 = arith.constant 0 : index
      %495 = vector.load %arg8[%c0_261, %c0_262, %c0_263] : memref<1x8x32xf32, #tpu.memory_space<vmem>>, vector<1x8x32xf32>
      %496 = vector.shape_cast %495 : vector<1x8x32xf32> to vector<8x32xf32>
      %497 = vector.shape_cast %494 : vector<8x32xf32> to vector<1x8x32xf32>
      tpu.vector_store %arg8[%c0_261, %c0_262, %c0_263], %497 {strides = array<i32>} : memref<1x8x32xf32, #tpu.memory_space<vmem>>, vector<1x8x32xf32>,
    } else {
    }
    return
  }
  func.func @transform_0(%arg0: i32, %arg1: i32, %arg2: i32) -> (i32, i32, i32) {
    %c0_i32 = arith.constant 0 : i32
    %c0_i32_0 = arith.constant 0 : i32
    return %arg0, %arg1, %c0_i32 : i32, i32, i32
  }
  func.func @transform_1(%arg0: i32, %arg1: i32, %arg2: i32) -> (i32, i32, i32) {
    %c0_i32 = arith.constant 0 : i32
    %0 = arith.cmpi eq, %arg1, %c0_i32 : i32
    %c0_i32_0 = arith.constant 0 : i32
    %1 = arith.select %0, %arg2, %c0_i32_0 : i32
    %c0_i32_1 = arith.constant 0 : i32
    %c0_i32_2 = arith.constant 0 : i32
    return %arg0, %1, %c0_i32_1 : i32, i32, i32
  }
  func.func @transform_2(%arg0: i32, %arg1: i32, %arg2: i32) -> (i32, i32) {
    %c0_i32 = arith.constant 0 : i32
    %c0_i32_0 = arith.constant 0 : i32
    %c0_i32_1 = arith.constant 0 : i32
    return %c0_i32, %c0_i32_0 : i32, i32
  }
  func.func @transform_3(%arg0: i32, %arg1: i32, %arg2: i32) -> (i32, i32) {
    %c0_i32 = arith.constant 0 : i32
    %c0_i32_0 = arith.constant 0 : i32
    %c0_i32_1 = arith.constant 0 : i32
    return %c0_i32, %c0_i32_0 : i32, i32
  }
  func.func @transform_4(%arg0: i32, %arg1: i32, %arg2: i32) -> (i32, i32) {
    %c0_i32 = arith.constant 0 : i32
    %c0_i32_0 = arith.constant 0 : i32
    %c0_i32_1 = arith.constant 0 : i32
    return %c0_i32, %c0_i32_0 : i32, i32
  }
  func.func @transform_5(%arg0: i32, %arg1: i32, %arg2: i32) -> (i32, i32, i32) {
    %c0_i32 = arith.constant 0 : i32
    %c0_i32_0 = arith.constant 0 : i32
    return %arg0, %arg1, %c0_i32 : i32, i32, i32
  }
}

</mosaic_0001>

<bundles_post_ra>
// kernel: tpu_custom_call.1
= control target key start
LH: loop header
LB: loop body
LE: loop exit
PB: predicated region body
PF: predicated region fallthrough
CT: control target
= control target key end

     0   :  { %10 = vsyncpa [#allocation11], 0  ;;  %s3178_s0 = inlined_call_operand.vmem [shape: f32[2,8,32], index: 0, kind: input, shape index: {}]   ;;  %s3179_s1 = inlined_call_operand.vmem [shape: f32[2,8,32], index: 1, kind: input, shape index: {}]   ;;  %s3180_s2 = inlined_call_operand.vmem [shape: f32[32,1536], index: 2, kind: input, shape index: {}]   ;;  %s3181_s3 = inlined_call_operand.vmem [shape: f32[512,32], index: 3, kind: input, shape index: {}]   ;;  %s3182_s4 = inlined_call_operand.vmem [shape: f32[1,32], index: 4, kind: input, shape index: {}]   ;;  %s3183_s5 = inlined_call_operand.hbm [shape: f32[2,8,32], index: 5, kind: output, shape index: {}]  }
   0x1   :  { %12 = vsyncpa [#allocation11 + $0x1], 0  ;;  %s2384_s18 = smov 0   ;;  %s2386_s19 = smov 0  }
   0x2   :  { %s2388_s20 = smov 0   ;;  %s2390_s21 = smov 0  }
   0x3   :  { %s2392_s22 = smov 0   ;;  %s2394_s23 = smov 0  }
   0x4 LB: > { %s2083_s24 = sadd.s32 4294967295, %s2348_s23   ;;  %s2084_s25 = sadd.s32 4294967294, %s2348_s23   ;;  %s2348_s23 = sphi %s2394_s23, %s18_s23   ;;  %s2344_s22 = sphi %s2392_s22, %s3196_s22   ;;  %s2340_s21 = sphi %s2390_s21, %s3195_s21   ;;  %s2336_s20 = sphi %s2388_s20, %s3194_s20   ;;  %s2332_s19 = sphi %s2386_s19, %s3193_s19   ;;  %s2328_s18 = sphi %s2384_s18, %s3192_s18  }
   0x5   : > { %s37_s26 = sadd.s32 1, %s2344_s22  ;;  %s169_s27 = sadd.s32 1, %s2336_s20 }
   0x6   : > { %p39_p0 = scmp.ge.s32.totalorder %s37_s26, 2  ;;  %p179_p1 = scmp.ne.s32.totalorder %s2336_s20, %s2332_s19 }
   0x7   : > { %p180_p2 = scmp.eq.s32.totalorder %s2083_s24, 1  ;;  %p185_p3 = scmp.ne.s32.totalorder %s2332_s19, %s2328_s18 }
   0x8   : > { %s3198_s26 = smov (%p39_p0, %s37_s26), 0  ;;  %p186_p5 = scmp.eq.s32.totalorder %s2084_s25, 1 }
   0x9   : > { %p2424_p4 = por %p180_p2, %p179_p1  ;;  %s164_s29 = ssub.s32 %s2344_s22, %s3198_s26 }
   0xa   : > { %p2087_p6 = scmp.ge.s32.totalorder %s2348_s23, 1  ;;  %p167_p7 = scmp.eq.s32.totalorder %s164_s29, 0 }
   0xb   : > { %p2431_p8 = por %p186_p5, %p185_p3  ;;  %p237_p9 = scmp.lt.s32.totalorder %s2348_s23, 3 }
   0xc   : > { %s2437_s6 = scalar_select %p167_p7, %s2336_s20, %s169_s27  }
   0xd   : > { %p238_p10 = pnand %p2087_p6, %p237_p9 }
   0xe   : > { %p276_p11 = scmp.lt.s32.totalorder (!%p238_p10), %s2340_s21, 1  ;;  %s2350_s14 = smov (!%p238_p10), 64  }
   0xf   : > { %241 = sbr.rel (%p238_p10) target bundleno = 1299 (0x513), region = 40  ;;  %s2156_s13 = sshll.u32 (!%p238_p10), %s2340_s21, 3 }
  0x10   : > { %s2290_s8 = scalar_lea.hbm (!%p238_p10), %s3183_s5, 16 }
  0x14   : > { %v323_v0 = vld [vmem:[%s3180_s2 + $0x140] sm:$0xff]  ;;  %v325_v1 = vld [vmem:[%s3180_s2 + $0x150] sm:$0xff]  ;;  %s2459_s25 = scalar_select %p276_p11, %s2340_s21, 1  ;;  %v324_v6 = vld [vmem:[%s3180_s2 + $0x148] sm:$0xff]  ;;  %vm331_vm0 = vcmask 261120   ;;  %vm506_vm1 = vcmask 523264  }
  0x15   : > { %v315_v2 = vld [vmem:[%s3180_s2 + $0xe0] sm:$0xff]  ;;  %347 = vmatpush.msra.mxu0 %v323_v0  ;;  %387 = vmatpush.msra.mxu2 %v325_v1  ;;  %v317_v3 = vld [vmem:[%s3180_s2 + $0xf0] sm:$0xff]  ;;  %v316_v9 = vld [vmem:[%s3180_s2 + $0xe8] sm:$0xff]  ;;  %vm811_vm2 = vcmask 64512   ;;  %vm752_vm3 = vcmask 7168  }
  0x16   : > { %v307_v4 = vld [vmem:[%s3180_s2 + $0x80] sm:$0xff]  ;;  %v309_v5 = vld [vmem:[%s3180_s2 + $0x90] sm:$0xff]  ;;  %s2089_s11 = sshll.u32 %s2459_s25, 3  ;;  %367 = vmatpush.msra.mxu1 %v324_v6  ;;  %v308_v13 = vld [vmem:[%s3180_s2 + $0x88] sm:$0xff] }
  0x17   : > { %348 = vmatpush.msra.mxu0 %v315_v2  ;;  %388 = vmatpush.msra.mxu2 %v317_v3  ;;  %v299_v7 = vld [vmem:[%s3180_s2 + $0x20] sm:$0xff]  ;;  %v301_v8 = vld [vmem:[%s3180_s2 + $0x30] sm:$0xff]  ;;  %s291_s16 = scalar_lea.vmem %s3179_s1, %s2089_s11  ;;  %v300_v16 = vld [vmem:[%s3180_s2 + $0x28] sm:$0xff]  ;;  %s282_s10 = scalar_lea.vmem %s3178_s0, %s2089_s11 }
  0x18   : > { %v2479_v10 = vld [vmem:[%s291_s16] sm:$0xff]  ;;  %v329_v12 = vld [vmem:[%s3180_s2 + $0x170] sm:$0xff]  ;;  %368 = vmatpush.msra.mxu1 %v316_v9  ;;  %v326_v21 = vld [vmem:[%s3180_s2 + $0x158] sm:$0xff]  ;;  %s1897_s16 = scalar_lea.hbm %s3183_s5, %s2156_s13 }
  0x19   : > { %349 = vmatpush.msra.mxu0 %v307_v4  ;;  %389 = vmatpush.msra.mxu2 %v309_v5  ;;  %v327_v11 = vld [vmem:[%s3180_s2 + $0x160] sm:$0xff]  ;;  %v321_v15 = vld [vmem:[%s3180_s2 + $0x110] sm:$0xff]  ;;  %v328_v23 = vld [vmem:[%s3180_s2 + $0x168] sm:$0xff]  ;;  %s1901_s24 = sshll.u32 %s1897_s16, 4  ;;  %s1902_s24 = int_to_ptr.hbm [resolvable:$true] %s1901_s24 }
  0x1a   : > { %v319_v14 = vld [vmem:[%s3180_s2 + $0x100] sm:$0xff]  ;;  %369 = vmatpush.msra.mxu1 %v308_v13  ;;  %v313_v18 = vld [vmem:[%s3180_s2 + $0xb0] sm:$0xff]  ;;  %407 = vmatpush.msra.mxu3 %v326_v21  ;;  %v318_v25 = vld [vmem:[%s3180_s2 + $0xf8] sm:$0xff]  ;;  %s2284_s11 = sshra.s32 %s1902_s24, 4  ;;  %s2285_s11 = int_to_ptr.hbm [resolvable:$true] %s2284_s11 }
  0x1b   : > { %350 = vmatpush.msra.mxu0 %v299_v7  ;;  %390 = vmatpush.msra.mxu2 %v301_v8  ;;  %v311_v17 = vld [vmem:[%s3180_s2 + $0xa0] sm:$0xff]  ;;  %v305_v20 = vld [vmem:[%s3180_s2 + $0x50] sm:$0xff]  ;;  %v320_v27 = vld [vmem:[%s3180_s2 + $0x108] sm:$0xff]  ;;  %s2286_s27 = scalar_lea.hbm %s2285_s11, 8  ;;  %p2291_p1 = scmp.lt.s32.totalorder %s2285_s11, %s3183_s5 }
  0x1c   : > { %2091 = vmatmul.msk.f32.vlgmr.msra.gmra.mxu0 %vm331_vm0, %v2479_v10  ;;  %2093 = vmatmul.msk.f32.vlgmr.msra.gmra.mxu2 %vm331_vm0, %v2479_v10  ;;  %v303_v19 = vld [vmem:[%s3180_s2 + $0x40] sm:$0xff]  ;;  %v618_v24 = vld [vmem:[%s3180_s2 + $0x130] sm:$0xff]  ;;  %v310_v29 = vld [vmem:[%s3180_s2 + $0x98] sm:$0xff]  ;;  %p2287_p12 = scmp.ne.s32.totalorder %s2285_s11, %s2286_s27  ;;  %p2292_p2 = scmp.lt.s32.totalorder %s2290_s8, %s2286_s27 }
  0x1d   : > { %427 = vmatpush.msrb.mxu0 %v327_v11  ;;  %467 = vmatpush.msrb.mxu2 %v329_v12  ;;  %v616_v22 = vld [vmem:[%s3180_s2 + $0x120] sm:$0xff]  ;;  %v614_v28 = vld [vmem:[%s3180_s2 + $0xd0] sm:$0xff]  ;;  %v312_v31 = vld [vmem:[%s3180_s2 + $0xa8] sm:$0xff] }
  0x1e   : > { %370 = vmatpush.msra.mxu1 %v300_v16  ;;  %v612_v26 = vld [vmem:[%s3180_s2 + $0xc0] sm:$0xff]  ;;  %408 = vmatpush.msra.mxu3 %v318_v25  ;;  %v610_v32 = vld [vmem:[%s3180_s2 + $0x70] sm:$0xff]  ;;  %v302_v33 = vld [vmem:[%s3180_s2 + $0x38] sm:$0xff]  ;;  %p2288_p13 = pnand %p2287_p12, %p2424_p4  ;;  %p2293_p3 = por %p2292_p2, %p2291_p1 }
  0x1f   : > { %428 = vmatpush.msrb.mxu0 %v319_v14  ;;  %468 = vmatpush.msrb.mxu2 %v321_v15  ;;  %v608_v30 = vld [vmem:[%s3180_s2 + $0x60] sm:$0xff]  ;;  %v304_v35 = vld [vmem:[%s3180_s2 + $0x48] sm:$0xff]  ;;  %v606_v36 = vld [vmem:[%s3180_s2 + $0x10] sm:$0xff] }
  0x20   : > { %2092 = vmatmul.msk.f32.vlgmr.msra.gmra.mxu1 %vm331_vm0, %v2479_v10  ;;  %v604_v34 = vld [vmem:[%s3180_s2] sm:$0xff]  ;;  %409 = vmatpush.msra.mxu3 %v310_v29  ;;  %v617_v38 = vld [vmem:[%s3180_s2 + $0x128] sm:$0xff]  ;;  %v330_v39 = vld [vmem:[%s3180_s2 + $0x178] sm:$0xff]  ;;  %p2289_p0 = pneg %p2288_p13 }
  0x21   : > { %429 = vmatpush.msrb.mxu0 %v311_v17  ;;  %469 = vmatpush.msrb.mxu2 %v313_v18  ;;  %v603_v37 = vld [vmem:[%s282_s10] sm:$0xff]  ;;  %v613_v40 = vld [vmem:[%s3180_s2 + $0xc8] sm:$0xff]  ;;  %v322_v41 = vld [vmem:[%s3180_s2 + $0x118] sm:$0xff]  ;;  %s273_s10 = sand.u32 1, %s2332_s19  }
  0x22   : > { %447 = vmatpush.msrb.mxu1 %v328_v23  ;;  %410 = vmatpush.msra.mxu3 %v302_v33  ;;  %v609_v42 = vld [vmem:[%s3180_s2 + $0x68] sm:$0xff]  ;;  %v314_v43 = vld [vmem:[%s3180_s2 + $0xb8] sm:$0xff]  ;;  %v2351_v33 = vmov -inf   ;;  %s2088_s12 = sshll.u32 %s273_s10, 3  ;;  %s1886_s21 = scalar_lea.sflag [#allocation11], %s273_s10 }
  0x23   : > { %430 = vmatpush.msrb.mxu0 %v303_v19  ;;  %470 = vmatpush.msrb.mxu2 %v305_v20  ;;  %v605_v44 = vld [vmem:[%s3180_s2 + $0x8] sm:$0xff]  ;;  %v306_v45 = vld [vmem:[%s3180_s2 + $0x58] sm:$0xff]  ;;  %753 = vst.msk [vmem:[#allocation6] sm:$0xff] %vm752_vm3, %v2351_v33  ;;  %s275_s17 = scalar_lea.vmem [#allocation10], %s2088_s12  ;;  %p2294_p5 = pnand %p2293_p3, %p2289_p0 }
  0x24   : > { %2095 = vmatmul.msk.f32.vlgmr.msrb.gmra.mxu0 %vm331_vm0, %v2479_v10  ;;  %2097 = vmatmul.msk.f32.vlgmr.msrb.gmra.mxu2 %vm331_vm0, %v2479_v10  ;;  %v619_v46 = vld [vmem:[%s3180_s2 + $0x138] sm:$0xff]  ;;  %754 = vst.msk [vmem:[#allocation6 + $0x8] sm:$0xff] %vm752_vm3, %v2351_v33  ;;  %s1899_s25 = sshll.u32 %s275_s17, 4  ;;  %s1900_s25 = int_to_ptr.vmem [resolvable:$true] %s1899_s25 }
  0x25   : > { %636 = vmatpush.msra.mxu0 %v616_v22  ;;  %676 = vmatpush.msra.mxu2 %v618_v24  ;;  %v615_v47 = vld [vmem:[%s3180_s2 + $0xd8] sm:$0xff]  ;;  %755 = vst.msk [vmem:[#allocation6 + $0x10] sm:$0xff] %vm752_vm3, %v2351_v33 }
  0x26   : > { %448 = vmatpush.msrb.mxu1 %v320_v27  ;;  %2094 = vmatmul.msk.f32.vlgmr.msra.gmra.mxu3 %vm331_vm0, %v2479_v10  ;;  %v611_v48 = vld [vmem:[%s3180_s2 + $0x78] sm:$0xff]  ;;  %756 = vst.msk [vmem:[#allocation6 + $0x18] sm:$0xff] %vm752_vm3, %v2351_v33 }
  0x27   : > { %637 = vmatpush.msra.mxu0 %v612_v26  ;;  %677 = vmatpush.msra.mxu2 %v614_v28  ;;  %v607_v49 = vld [vmem:[%s3180_s2 + $0x18] sm:$0xff]  ;;  %757 = vst.msk [vmem:[#allocation6 + $0x20] sm:$0xff] %vm752_vm3, %v2351_v33 }
  0x28   : > { %449 = vmatpush.msrb.mxu1 %v312_v31  ;;  %487 = vmatpush.msrb.mxu3 %v330_v39  ;;  %758 = vst.msk [vmem:[#allocation6 + $0x28] sm:$0xff] %vm752_vm3, %v2351_v33 }
  0x29   : > { %638 = vmatpush.msra.mxu0 %v608_v30  ;;  %678 = vmatpush.msra.mxu2 %v610_v32  ;;  %759 = vst.msk [vmem:[#allocation6 + $0x30] sm:$0xff] %vm752_vm3, %v2351_v33 }
  0x2a   : > { %450 = vmatpush.msrb.mxu1 %v304_v35  ;;  %488 = vmatpush.msrb.mxu3 %v322_v41  ;;  %760 = vst.msk [vmem:[#allocation6 + $0x38] sm:$0xff] %vm752_vm3, %v2351_v33  ;;  %v810_v39 = vld [vmem:[#allocation6] sm:$0xff] }
  0x2b   : > { %639 = vmatpush.msra.mxu0 %v604_v34  ;;  %679 = vmatpush.msra.mxu2 %v606_v36 }
  0x2c   : > { %2096 = vmatmul.msk.f32.vlgmr.msrb.gmra.mxu1 %vm331_vm0, %v2479_v10  ;;  %2113 = vmatmul.msk.f32.vlgmr.msra.gmra.mxu0 %vm331_vm0, %v603_v37 }
  0x2d   : > { %2115 = vmatmul.msk.f32.vlgmr.msra.gmra.mxu2 %vm331_vm0, %v603_v37  ;;  %656 = vmatpush.msra.mxu1 %v617_v38  ;;  %v2353_v38 = vmov 0.0  }
  0x2e   : > { %489 = vmatpush.msrb.mxu3 %v314_v43  ;;  %769 = vst.msk [vmem:[#allocation5] sm:$0xff] %vm506_vm1, %v2353_v38 }
  0x2f   : > { %657 = vmatpush.msra.mxu1 %v613_v40  ;;  %761 = vst.msk [vmem:[#allocation7] sm:$0xff] %vm752_vm3, %v2353_v38 }
  0x30   : > { %490 = vmatpush.msrb.mxu3 %v306_v45  ;;  %762 = vst.msk [vmem:[#allocation7 + $0x8] sm:$0xff] %vm752_vm3, %v2353_v38 }
  0x31   : > { %658 = vmatpush.msra.mxu1 %v609_v42  ;;  %2098 = vmatmul.msk.f32.vlgmr.msrb.gmra.mxu3 %vm331_vm0, %v2479_v10  ;;  %763 = vst.msk [vmem:[#allocation7 + $0x10] sm:$0xff] %vm752_vm3, %v2353_v38 }
  0x32   : > { %696 = vmatpush.msra.mxu3 %v619_v46  ;;  %764 = vst.msk [vmem:[#allocation7 + $0x18] sm:$0xff] %vm752_vm3, %v2353_v38 }
  0x33   : > { %659 = vmatpush.msra.mxu1 %v605_v44  ;;  %765 = vst.msk [vmem:[#allocation7 + $0x20] sm:$0xff] %vm752_vm3, %v2353_v38 }
  0x34   : > { %2114 = vmatmul.msk.f32.vlgmr.msra.gmra.mxu1 %vm331_vm0, %v603_v37  ;;  %697 = vmatpush.msra.mxu3 %v615_v47  ;;  %766 = vst.msk [vmem:[#allocation7 + $0x28] sm:$0xff] %vm752_vm3, %v2353_v38 }
  0x35   : > { %767 = vst.msk [vmem:[#allocation7 + $0x30] sm:$0xff] %vm752_vm3, %v2353_v38 }
  0x36   : > { %698 = vmatpush.msra.mxu3 %v611_v48  ;;  %768 = vst.msk [vmem:[#allocation7 + $0x38] sm:$0xff] %vm752_vm3, %v2353_v38 }
  0x37   : > { %770 = vst.msk [vmem:[#allocation5 + $0x8] sm:$0xff] %vm506_vm1, %v2353_v38 }
  0x38   : > { %699 = vmatpush.msra.mxu3 %v607_v49  ;;  %771 = vst.msk [vmem:[#allocation5 + $0x10] sm:$0xff] %vm506_vm1, %v2353_v38 }
  0x39   : > { %2116 = vmatmul.msk.f32.vlgmr.msra.gmra.mxu3 %vm331_vm0, %v603_v37  ;;  %v2352_v37 = vmov 0   ;;  %772 = vst.msk [vmem:[#allocation5 + $0x18] sm:$0xff] %vm506_vm1, %v2353_v38 }
  0x3a   : > { %2218 = vset.pattern.permute.xlu1 %v2352_v37  ;;  %2220 = vset.pattern.permute.xlu0 %v2352_v37  ;;  %773 = vst.msk [vmem:[#allocation5 + $0x20] sm:$0xff] %vm506_vm1, %v2353_v38 }
  0x3b   : > { %2219 = vset.pattern.permute.xlu2 %v2352_v37  ;;  %774 = vst.msk [vmem:[#allocation5 + $0x28] sm:$0xff] %vm506_vm1, %v2353_v38 }
  0x3c   : > { %775 = vst.msk [vmem:[#allocation5 + $0x30] sm:$0xff] %vm506_vm1, %v2353_v38 }
  0x3d   : > { %776 = vst.msk [vmem:[#allocation5 + $0x38] sm:$0xff] %vm506_vm1, %v2353_v38 }
  0x99   : > { %v352_v50 = vpop.f32.mrf.mxu0 }
  0x9a   : > { %507 = vst.msk [vmem:[#allocation2] sm:$0xff] %vm506_vm1, %v352_v50  ;;  %514 = vrot.lane.b32.xlu0 %v352_v50, %s2350_s14 }
  0x9d   : > { %v372_v52 = vpop.f32.mrf.mxu1 }
  0x9e   : > { %538 = vrot.lane.b32.xlu1 %v372_v52, %s2350_s14  ;;  %2101 = vst.msk [vmem:[#allocation2 + $0x10] sm:$0xff] %vm506_vm1, %v372_v52 }
  0x9f   : > { %v392_v51 = vpop.f32.mrf.mxu2 }
  0xa0   : > { %2105 = vst.msk [vmem:[#allocation2 + $0x20] sm:$0xff] %vm506_vm1, %v392_v51  ;;  %562 = vrot.lane.b32.xlu2 %v392_v51, %s2350_s14 }
  0xa1   : > { %v432_v53 = vpop.f32.mrf.mxu0  ;;  %v780_v54 = vld [vmem:[#allocation2] sm:$0xff] }
  0xa2   : > { %510 = vst.msk [vmem:[#allocation3] sm:$0xff] %vm506_vm1, %v432_v53  ;;  %2117 = vmatpush.xpose.msk.msrb.mxu0 %vm506_vm1, %v780_v54 }
  0xa5   : > { %v2125_v3 = vld [vmem:[#allocation2 + $0x10] sm:$0xff] }
  0xa6   : > { %2127 = vmatpush.xpose.msk.msra.mxu0 %vm506_vm1, %v2125_v3 }
  0xa7   : > { %v472_v55 = vpop.f32.mrf.mxu2  ;;  %v2135_v4 = vld [vmem:[#allocation2 + $0x20] sm:$0xff] }
  0xa8   : > { %2106 = vst.msk [vmem:[#allocation3 + $0x20] sm:$0xff] %vm506_vm1, %v472_v55 }
  0xa9   : > { %v452_v56 = vpop.f32.mrf.mxu1  ;;  %v782_v57 = vld [vmem:[#allocation3] sm:$0xff]  ;;  %v641_v58 = vpop.f32.mrf.mxu0 }
  0xaa   : > { %2102 = vst.msk [vmem:[#allocation3 + $0x10] sm:$0xff] %vm506_vm1, %v452_v56  ;;  %860 = vmatpush.msrb.mxu1 %v782_v57  ;;  %v704_v59 = vmul.f32 0.125, %v641_v58  ;;  %v412_v62 = vpop.f32.mrf.mxu3 }
  0xab   : > { %2109 = vst.msk [vmem:[#allocation2 + $0x30] sm:$0xff] %vm506_vm1, %v412_v62 }
  0xac   : > { %708 = vst [vmem:[#allocation8] sm:$0xff] %v704_v59  ;;  %717 = vrot.lane.b32.xlu0 %v704_v59, %s2350_s14 }
  0xad   : > { %714 = vst.msk [vmem:[#allocation4] sm:$0xff] %vm506_vm1, %v704_v59 }
  0xb0   : > { %v681_v60 = vpop.f32.mrf.mxu2 }
  0xb1   : > { %v706_v61 = vmul.f32 0.125, %v681_v60  ;;  %v661_v63 = vpop.f32.mrf.mxu1  ;;  %v2126_v9 = vld [vmem:[#allocation3 + $0x10] sm:$0xff] }
  0xb2   : > { %v705_v0 = vmul.f32 0.125, %v661_v63  ;;  %v2145_v6 = vld [vmem:[#allocation2 + $0x30] sm:$0xff]  ;;  %1046 = vmatpush.msra.mxu1 %v2126_v9 }
  0xb3   : > { %710 = vst [vmem:[#allocation8 + $0x10] sm:$0xff] %v706_v61  ;;  %737 = vrot.lane.b32.xlu2 %v706_v61, %s2350_s14 }
  0xb4   : > { %734 = vst.msk [vmem:[#allocation4 + $0x20] sm:$0xff] %vm506_vm1, %v706_v61  ;;  %727 = vrot.lane.b32.xlu1 %v705_v0, %s2350_s14  ;;  %v777_v1 = vld [vmem:[#allocation4] sm:$0xff]  ;;  %586 = vrot.lane.b32.xlu0 %v412_v62, %s2350_s14  ;;  %v492_v2 = vpop.f32.mrf.mxu3  ;;  %v2733_v62 = vld [vmem:[#allocation6 + $0x18] sm:$0xff] }
  0xb5   : > { %709 = vst [vmem:[#allocation8 + $0x8] sm:$0xff] %v705_v0  ;;  %2118 = vmatmul.msk.f32.vlgmr.msrb.gmra.mxu0 %vm506_vm1, %v777_v1  ;;  %v2136_v1 = vld [vmem:[#allocation3 + $0x20] sm:$0xff] }
  0xb6   : > { %724 = vst.msk [vmem:[#allocation4 + $0x10] sm:$0xff] %vm506_vm1, %v705_v0  ;;  %2137 = vmatpush.xpose.msk.msrb.mxu0 %vm506_vm1, %v2135_v4  ;;  %v903_v4 = vld [vmem:[#allocation6 + $0x8] sm:$0xff] }
  0xb7   : > { %2110 = vst.msk [vmem:[#allocation3 + $0x30] sm:$0xff] %vm506_vm1, %v492_v2 }
  0xbb   : > { %522 = vrot.lane.b32.xlu2 %v432_v53, %s2350_s14  ;;  %v1148_v16 = vld [vmem:[#allocation4 + $0x20] sm:$0xff] }
  0xbc   : > { %546 = vrot.lane.b32.xlu0 %v452_v56, %s2350_s14  ;;  %v701_v7 = vpop.f32.mrf.mxu3 }
  0xbd   : > { %v962_v5 = vld [vmem:[#allocation4 + $0x10] sm:$0xff]  ;;  %v707_v8 = vmul.f32 0.125, %v701_v7 }
  0xbe   : > { %2128 = vmatmul.msk.f32.vlgmr.msra.gmra.mxu0 %vm506_vm1, %v962_v5  ;;  %v2745_v7 = vld [vmem:[#allocation6 + $0x10] sm:$0xff] }
  0xbf   : > { %2147 = vmatpush.xpose.msk.msra.mxu0 %vm506_vm1, %v2145_v6  ;;  %711 = vst [vmem:[#allocation8 + $0x18] sm:$0xff] %v707_v8  ;;  %747 = vrot.lane.b32.xlu1 %v707_v8, %s2350_s14 }
  0xc0   : > { %744 = vst.msk [vmem:[#allocation4 + $0x30] sm:$0xff] %vm506_vm1, %v707_v8 }
  0xc3   : > { %594 = vrot.lane.b32.xlu2 %v492_v2, %s2350_s14 }
  0xc6   : > { %2138 = vmatmul.msk.f32.vlgmr.msrb.gmra.mxu0 %vm506_vm1, %v1148_v16 }
  0xc7   : > { %570 = vrot.lane.b32.xlu1 %v472_v55, %s2350_s14  ;;  %v1334_v18 = vld [vmem:[#allocation4 + $0x30] sm:$0xff] }
  0xce   : > { %2148 = vmatmul.msk.f32.vlgmr.msra.gmra.mxu0 %vm506_vm1, %v1334_v18 }
  0xfa   : > { %v563_v10 = vpop.permute.xlu2 %562 }
  0xfb   : > { %2107 = vst.msk [vmem:[#allocation2 + $0x28] sm:$0xff] %vm506_vm1, %v563_v10  ;;  %v2752_v10 = vld [vmem:[#allocation6 + $0x20] sm:$0xff] }
 0x102   : > { %v2140_v21 = vld [vmem:[#allocation2 + $0x28] sm:$0xff] }
 0x10c   : > { %v515_v11 = vpop.permute.xlu0 %514 }
 0x10d   : > { %2099 = vst.msk [vmem:[#allocation2 + $0x8] sm:$0xff] %vm506_vm1, %v515_v11  ;;  %v738_v12 = vpop.permute.xlu2 %737 }
 0x10e   : > { %741 = vst.msk [vmem:[#allocation4 + $0x28] sm:$0xff] %vm506_vm1, %v738_v12 }
 0x110   : > { %v539_v13 = vpop.permute.xlu1 %538 }
 0x111   : > { %2103 = vst.msk [vmem:[#allocation2 + $0x18] sm:$0xff] %vm506_vm1, %v539_v13 }
 0x114   : > { %v2120_v14 = vld [vmem:[#allocation2 + $0x8] sm:$0xff] }
 0x115   : > { %2122 = vmatpush.xpose.msk.msrb.mxu2 %vm506_vm1, %v2120_v14  ;;  %v523_v15 = vpop.permute.xlu2 %522  ;;  %v1241_v31 = vld [vmem:[#allocation4 + $0x28] sm:$0xff]  ;;  %v2762_v14 = vld [vmem:[#allocation6 + $0x30] sm:$0xff] }
 0x116   : > { %2100 = vst.msk [vmem:[#allocation3 + $0x8] sm:$0xff] %vm506_vm1, %v523_v15 }
 0x118   : > { %v2130_v17 = vld [vmem:[#allocation2 + $0x18] sm:$0xff] }
 0x119   : > { %2132 = vmatpush.xpose.msk.msra.mxu2 %vm506_vm1, %v2130_v17  ;;  %v2769_v17 = vld [vmem:[#allocation6 + $0x28] sm:$0xff] }
 0x11d   : > { %v2121_v19 = vld [vmem:[#allocation3 + $0x8] sm:$0xff]  ;;  %v595_v32 = vpop.permute.xlu2 %594 }
 0x11e   : > { %953 = vmatpush.msrb.mxu3 %v2121_v19  ;;  %v718_v20 = vpop.permute.xlu0 %717  ;;  %2112 = vst.msk [vmem:[#allocation3 + $0x38] sm:$0xff] %vm506_vm1, %v595_v32 }
 0x11f   : > { %721 = vst.msk [vmem:[#allocation4 + $0x8] sm:$0xff] %vm506_vm1, %v718_v20 }
 0x126   : > { %v728_v22 = vpop.permute.xlu1 %727  ;;  %v869_v23 = vld [vmem:[#allocation4 + $0x8] sm:$0xff]  ;;  %v587_v24 = vpop.permute.xlu0 %586 }
 0x127   : > { %731 = vst.msk [vmem:[#allocation4 + $0x18] sm:$0xff] %vm506_vm1, %v728_v22  ;;  %2123 = vmatmul.msk.f32.vlgmr.msrb.gmra.mxu2 %vm506_vm1, %v869_v23  ;;  %v2779_v22 = vld [vmem:[#allocation6 + $0x38] sm:$0xff] }
 0x128   : > { %2111 = vst.msk [vmem:[#allocation2 + $0x38] sm:$0xff] %vm506_vm1, %v587_v24  ;;  %2142 = vmatpush.xpose.msk.msrb.mxu2 %vm506_vm1, %v2140_v21 }
 0x12e   : > { %v1055_v25 = vld [vmem:[#allocation4 + $0x18] sm:$0xff]  ;;  %v547_v26 = vpop.permute.xlu0 %546 }
 0x12f   : > { %2133 = vmatmul.msk.f32.vlgmr.msra.gmra.mxu2 %vm506_vm1, %v1055_v25  ;;  %2104 = vst.msk [vmem:[#allocation3 + $0x18] sm:$0xff] %vm506_vm1, %v547_v26  ;;  %v2150_v27 = vld [vmem:[#allocation2 + $0x38] sm:$0xff] }
 0x130   : > { %2152 = vmatpush.xpose.msk.msra.mxu2 %vm506_vm1, %v2150_v27 }
 0x131   : > { %v748_v34 = vpop.permute.xlu1 %747 }
 0x132   : > { %v2667_v28 = vpop.f32.mrf.mxu0  ;;  %751 = vst.msk [vmem:[#allocation4 + $0x38] sm:$0xff] %vm506_vm1, %v748_v34 }
 0x133   : > { %v812_v29 = vsel %vm811_vm2, %v2667_v28, -inf }
 0x134   : > { %813 = vmax.xlane.f32.xlu0 %v812_v29  ;;  %v835_v29 = vld [vmem:[#allocation5] sm:$0xff] }
 0x136   : > { %v2131_v30 = vld [vmem:[#allocation3 + $0x18] sm:$0xff] }
 0x137   : > { %1139 = vmatpush.msra.mxu3 %v2131_v30  ;;  %2143 = vmatmul.msk.f32.vlgmr.msrb.gmra.mxu2 %vm506_vm1, %v1241_v31 }
 0x139   : > { %v1427_v35 = vld [vmem:[#allocation4 + $0x38] sm:$0xff]  ;;  %v571_v36 = vpop.permute.xlu1 %570 }
 0x13a   : > { %2108 = vst.msk [vmem:[#allocation3 + $0x28] sm:$0xff] %vm506_vm1, %v571_v36 }
 0x13b   : > { %v2709_v47 = vpop.f32.mrf.mxu0 }
 0x13c   : > { %v997_v48 = vsel %vm811_vm2, %v2709_v47, -inf }
 0x13f   : > { %2153 = vmatmul.msk.f32.vlgmr.msra.gmra.mxu2 %vm506_vm1, %v1427_v35 }
 0x143   : > { %v2713_v49 = vpop.f32.mrf.mxu0 }
 0x144   : > { %v1183_v50 = vsel %vm811_vm2, %v2713_v49, -inf }
 0x14b   : > { %v2721_v53 = vpop.f32.mrf.mxu0 }
 0x14c   : > { %v1369_v54 = vsel %vm811_vm2, %v2721_v53, -inf }
 0x1a7   : > { %v814_v40 = vpop.xlane.xlu0 %813 }
 0x1a8   : > { %v815_v41 = vmax.f32 %v810_v39, %v814_v40 }
 0x1aa   : > { %v816_v42 = vsub.f32 %v810_v39, %v815_v41  ;;  %867 = vst.msk [vmem:[#allocation6] sm:$0xff] %vm752_vm3, %v815_v41  ;;  %821 = vperm.xlu1 %2218, %v815_v41   ;;  %v2701_v43 = vpop.f32.mrf.mxu2  ;;  %v2141_v41 = vld [vmem:[#allocation3 + $0x28] sm:$0xff] }
 0x1ab   : > { %v904_v46 = vsel %vm811_vm2, %v2701_v43, -inf }
 0x1ac   : > { %v817_v57 = vmul.f32 1.442695, %v816_v42 }
 0x1ae   : > { %2222 = vpow2.f32 %v817_v57 }
 0x1b2   : > { %v2703_v44 = vpop.f32.mrf.mxu2 }
 0x1b3   : > { %v1090_v45 = vsel %vm811_vm2, %v2703_v44, -inf }
 0x1b4   : > { %1091 = vmax.xlane.f32.xlu0 %v1090_v45  ;;  %v2729_v58 = vpop.eup %2222 }
 0x1ba   : > { %v2717_v51 = vpop.f32.mrf.mxu2 }
 0x1bb   : > { %v1276_v52 = vsel %vm811_vm2, %v2717_v51, -inf }
 0x1bc   : > { %1277 = vmax.xlane.f32.xlu0 %v1276_v52 }
 0x1c2   : > { %v2725_v55 = vpop.f32.mrf.mxu2 }
 0x1c3   : > { %v1462_v56 = vsel %vm811_vm2, %v2725_v55, -inf }
 0x1c4   : > { %1463 = vmax.xlane.f32.xlu0 %v1462_v56 }
 0x1d4   : > { %905 = vmax.xlane.f32.xlu1 %v904_v46  ;;  %v827_v46 = vld [vmem:[#allocation7] sm:$0xff] }
 0x1dc   : > { %998 = vmax.xlane.f32.xlu1 %v997_v48  ;;  %v828_v48 = vmul.f32 %v2729_v58, %v827_v46 }
 0x1e4   : > { %1184 = vmax.xlane.f32.xlu1 %v1183_v50 }
 0x1ec   : > { %1370 = vmax.xlane.f32.xlu1 %v1369_v54 }
 0x205   : > { %838 = vperm.xlu1 %2218, %v2729_v58  }
 0x21c   : > { %v822_v59 = vpop.permute.xlu1 %821 }
 0x21d   : > { %v824_v60 = vsub.f32 %v2667_v28, %v822_v59 }
 0x21f   : > { %v825_v61 = vmul.f32 1.442695, %v824_v60 }
 0x221   : > { %2224 = vpow2.f32 %v825_v61 }
 0x227   : > { %v2225_v63 = vpop.eup %2224  ;;  %v1092_v0 = vpop.xlane.xlu0 %1091 }
 0x228   : > { %2119 = vmatmul.msk.f32.vlgmr.msrb.gmra.mxu1 %vm811_vm2, %v2225_v63  ;;  %v2737_v2 = vmax.f32 %v2733_v62, %v1092_v0  ;;  %v829_v21 = vsel %vm811_vm2, %v2225_v63, 0.0 }
 0x229   : > { %1232 = vmatpush.msrb.mxu1 %v2136_v1 }
 0x22a   : > { %v1094_v3 = vsub.f32 %v2733_v62, %v2737_v2  ;;  %1146 = vst.msk [vmem:[#allocation6 + $0x18] sm:$0xff] %vm752_vm3, %v2737_v2  ;;  %1099 = vperm.xlu0 %2220, %v2737_v2   ;;  %v1106_v2 = vld [vmem:[#allocation7 + $0x18] sm:$0xff] }
 0x22f   : > { %v1278_v18 = vpop.xlane.xlu0 %1277 }
 0x230   : > { %v2772_v19 = vmax.f32 %v2769_v17, %v1278_v18 }
 0x232   : > { %v1280_v20 = vsub.f32 %v2769_v17, %v2772_v19  ;;  %1332 = vst.msk [vmem:[#allocation6 + $0x28] sm:$0xff] %vm752_vm3, %v2772_v19 }
 0x234   : > { %v1281_v62 = vmul.f32 1.442695, %v1280_v20 }
 0x237   : > { %v1464_v23 = vpop.xlane.xlu0 %1463 }
 0x238   : > { %v2782_v24 = vmax.f32 %v2779_v22, %v1464_v23 }
 0x23a   : > { %v1466_v25 = vsub.f32 %v2779_v22, %v2782_v24  ;;  %1518 = vst.msk [vmem:[#allocation6 + $0x38] sm:$0xff] %vm752_vm3, %v2782_v24 }
 0x247   : > { %v906_v5 = vpop.xlane.xlu1 %905 }
 0x248   : > { %v907_v6 = vmax.f32 %v903_v4, %v906_v5 }
 0x24a   : > { %960 = vst.msk [vmem:[#allocation6 + $0x8] sm:$0xff] %vm752_vm3, %v907_v6  ;;  %913 = vperm.xlu2 %2219, %v907_v6   ;;  %v908_v26 = vsub.f32 %v903_v4, %v907_v6 }
 0x24c   : > { %v909_v27 = vmul.f32 1.442695, %v908_v26 }
 0x24e   : > { %2226 = vpow2.f32 %v909_v27 }
 0x24f   : > { %v999_v8 = vpop.xlane.xlu1 %998 }
 0x250   : > { %v2748_v9 = vmax.f32 %v2745_v7, %v999_v8 }
 0x252   : > { %1053 = vst.msk [vmem:[#allocation6 + $0x10] sm:$0xff] %vm752_vm3, %v2748_v9 }
 0x254   : > { %v2788_v28 = vpop.eup %2226 }
 0x257   : > { %v1185_v11 = vpop.xlane.xlu1 %1184 }
 0x258   : > { %v2755_v12 = vmax.f32 %v2752_v10, %v1185_v11 }
 0x25a   : > { %v1187_v13 = vsub.f32 %v2752_v10, %v2755_v12  ;;  %1239 = vst.msk [vmem:[#allocation6 + $0x20] sm:$0xff] %vm752_vm3, %v2755_v12  ;;  %1192 = vperm.xlu1 %2218, %v2755_v12  }
 0x25f   : > { %v1371_v15 = vpop.xlane.xlu1 %1370 }
 0x260   : > { %v2765_v16 = vmax.f32 %v2762_v14, %v1371_v15 }
 0x262   : > { %1425 = vst.msk [vmem:[#allocation6 + $0x30] sm:$0xff] %vm752_vm3, %v2765_v16 }
 0x273   : > { %830 = vadd.xlane.f32.xlu2 %v829_v21  ;;  %v1001_v21 = vsub.f32 %v2745_v7, %v2748_v9 }
 0x275   : > { %v1002_v27 = vmul.f32 1.442695, %v1001_v21 }
 0x277   : > { %v839_v30 = vpop.permute.xlu1 %838 }
 0x278   : > { %v841_v31 = vmul.f32 %v839_v30, %v835_v29 }
 0x28b   : > { %931 = vperm.xlu2 %2219, %v2788_v28  }
 0x293   : > { %1285 = vperm.xlu2 %2219, %v2772_v19  }
 0x29b   : > { %1471 = vperm.xlu2 %2219, %v2782_v24  }
 0x29c   : > { %v1100_v32 = vpop.permute.xlu0 %1099 }
 0x29d   : > { %v1102_v37 = vsub.f32 %v2703_v44, %v1100_v32  ;;  %v2151_v44 = vld [vmem:[#allocation3 + $0x38] sm:$0xff]  ;;  %v920_v32 = vld [vmem:[#allocation7 + $0x8] sm:$0xff] }
 0x29f   : > { %v1103_v39 = vmul.f32 1.442695, %v1102_v37 }
 0x2a3   : > { %1006 = vperm.xlu2 %2219, %v2748_v9   ;;  %v1095_v9 = vmul.f32 1.442695, %v1094_v3  ;;  %v1467_v3 = vmul.f32 1.442695, %v1466_v25 }
 0x2a4   : > { %v914_v33 = vpop.permute.xlu2 %913 }
 0x2a5   : > { %v916_v34 = vsub.f32 %v2701_v43, %v914_v33  ;;  %v862_v35 = vpop.f32.mrf.mxu1  ;;  %v921_v33 = vmul.f32 %v2788_v28, %v920_v32 }
 0x2a6   : > { %v865_v36 = vadd.f32 %v862_v35, %v841_v31 }
 0x2a7   : > { %v917_v38 = vmul.f32 1.442695, %v916_v34 }
 0x2a8   : > { %866 = vst.msk [vmem:[#allocation5] sm:$0xff] %vm506_vm1, %v865_v36 }
 0x2a9   : > { %2228 = vpow2.f32 %v917_v38 }
 0x2aa   : > { %2230 = vpow2.f32 %v1103_v39  ;;  %v928_v39 = vld [vmem:[#allocation5 + $0x8] sm:$0xff] }
 0x2ab   : > { %1378 = vperm.xlu2 %2219, %v2765_v16  }
 0x2af   : > { %v2229_v40 = vpop.eup %2228 }
 0x2b0   : > { %2124 = vmatmul.msk.f32.vlgmr.msrb.gmra.mxu3 %vm811_vm2, %v2229_v40  ;;  %v922_v42 = vsel %vm811_vm2, %v2229_v40, 0.0  ;;  %v2231_v43 = vpop.eup %2230 }
 0x2b1   : > { %1325 = vmatpush.msrb.mxu3 %v2141_v41  ;;  %923 = vadd.xlane.f32.xlu1 %v922_v42  ;;  %v1108_v45 = vsel %vm811_vm2, %v2231_v43, 0.0 }
 0x2b8   : > { %2134 = vmatmul.msk.f32.vlgmr.msra.gmra.mxu3 %vm811_vm2, %v2231_v43 }
 0x2b9   : > { %1511 = vmatpush.msra.mxu3 %v2151_v44  ;;  %1109 = vadd.xlane.f32.xlu1 %v1108_v45 }
 0x2cc   : > { %v1193_v1 = vpop.permute.xlu1 %1192 }
 0x2e6   : > { %v831_v50 = vpop.xlane.xlu2 %830 }
 0x2e7   : > { %v832_v52 = vadd.f32 %v831_v50, %v828_v48 }
 0x2e9   : > { %834 = vst.msk [vmem:[#allocation7] sm:$0xff] %vm752_vm3, %v832_v52 }
 0x2ee   : > { %v2804_v54 = vpop.permute.xlu2 %931 }
 0x2ef   : > { %v934_v41 = vmul.f32 %v2804_v54, %v928_v39  ;;  %v1292_v54 = vld [vmem:[#allocation7 + $0x28] sm:$0xff] }
 0x2f6   : > { %v1286_v56 = vpop.permute.xlu2 %1285 }
 0x2f7   : > { %v1288_v57 = vsub.f32 %v2717_v51, %v1286_v56  ;;  %v1195_v51 = vsub.f32 %v2713_v49, %v1193_v1  ;;  %v2146_v49 = vld [vmem:[#allocation3 + $0x30] sm:$0xff]  ;;  %v1188_v1 = vmul.f32 1.442695, %v1187_v13 }
 0x2f9   : > { %v1289_v59 = vmul.f32 1.442695, %v1288_v57  ;;  %v1196_v11 = vmul.f32 1.442695, %v1195_v51  ;;  %v1013_v51 = vld [vmem:[#allocation7 + $0x10] sm:$0xff] }
 0x2fb   : > { %2232 = vpow2.f32 %v1289_v59 }
 0x2fe   : > { %v1472_v60 = vpop.permute.xlu2 %1471 }
 0x2ff   : > { %v1474_v61 = vsub.f32 %v2725_v55, %v1472_v60  ;;  %v1478_v60 = vld [vmem:[#allocation7 + $0x38] sm:$0xff] }
 0x301   : > { %v2233_v63 = vpop.eup %2232  ;;  %v1475_v0 = vmul.f32 1.442695, %v1474_v61 }
 0x302   : > { %2144 = vmatmul.msk.f32.vlgmr.msrb.gmra.mxu3 %vm811_vm2, %v2233_v63  ;;  %v1294_v58 = vsel %vm811_vm2, %v2233_v63, 0.0  ;;  %v1373_v63 = vsub.f32 %v2762_v14, %v2765_v16  ;;  %v2853_v16 = vld [vmem:[#allocation7] sm:$0xff] }
 0x303   : > { %2234 = vpow2.f32 %v1475_v0  ;;  %1295 = vadd.xlane.f32.xlu2 %v1294_v58 }
 0x306   : > { %v1007_v4 = vpop.permute.xlu2 %1006 }
 0x307   : > { %v1009_v5 = vsub.f32 %v2709_v47, %v1007_v4 }
 0x309   : > { %v2235_v6 = vpop.eup %2234  ;;  %v1010_v8 = vmul.f32 1.442695, %v1009_v5  ;;  %v1374_v5 = vmul.f32 1.442695, %v1373_v63 }
 0x30a   : > { %2154 = vmatmul.msk.f32.vlgmr.msra.gmra.mxu3 %vm811_vm2, %v2235_v6  ;;  %v1480_v55 = vsel %vm811_vm2, %v2235_v6, 0.0 }
 0x30b   : > { %2236 = vpow2.f32 %v1010_v8  ;;  %1481 = vadd.xlane.f32.xlu0 %v1480_v55 }
 0x30c   : > { %2238 = vpow2.f32 %v1196_v11 }
 0x30e   : > { %v1379_v15 = vpop.permute.xlu2 %1378 }
 0x30f   : > { %v1381_v18 = vsub.f32 %v2721_v53, %v1379_v15 }
 0x311   : > { %v2237_v23 = vpop.eup %2236  ;;  %v1382_v47 = vmul.f32 1.442695, %v1381_v18 }
 0x312   : > { %2129 = vmatmul.msk.f32.vlgmr.msra.gmra.mxu1 %vm811_vm2, %v2237_v23  ;;  %v1015_v26 = vsel %vm811_vm2, %v2237_v23, 0.0  ;;  %v2239_v29 = vpop.eup %2238  ;;  %v1199_v23 = vld [vmem:[#allocation7 + $0x20] sm:$0xff] }
 0x313   : > { %2240 = vpow2.f32 %v1382_v47  ;;  %1418 = vmatpush.msra.mxu1 %v2146_v49  ;;  %1016 = vadd.xlane.f32.xlu2 %v1015_v26  ;;  %v1201_v53 = vsel %vm811_vm2, %v2239_v29, 0.0  ;;  %v1385_v47 = vld [vmem:[#allocation7 + $0x30] sm:$0xff] }
 0x314   : > { %2242 = vpow2.f32 %v1002_v27 }
 0x315   : > { %2244 = vpow2.f32 %v1095_v9 }
 0x316   : > { %2246 = vpow2.f32 %v1281_v62 }
 0x317   : > { %2248 = vpow2.f32 %v1467_v3 }
 0x319   : > { %v2241_v30 = vpop.eup %2240 }
 0x31a   : > { %2139 = vmatmul.msk.f32.vlgmr.msrb.gmra.mxu1 %vm811_vm2, %v2239_v29  ;;  %v1387_v7 = vsel %vm811_vm2, %v2241_v30, 0.0  ;;  %v2825_v31 = vpop.eup %2242 }
 0x31b   : > { %1202 = vadd.xlane.f32.xlu2 %v1201_v53  ;;  %1388 = vadd.xlane.f32.xlu1 %v1387_v7  ;;  %v2245_v36 = vpop.eup %2244  ;;  %v1014_v14 = vmul.f32 %v2825_v31, %v1013_v51 }
 0x31c   : > { %v1107_v37 = vmul.f32 %v2245_v36, %v1106_v2  ;;  %v2247_v40 = vpop.eup %2246  ;;  %v1021_v2 = vld [vmem:[#allocation5 + $0x10] sm:$0xff] }
 0x31d   : > { %v2249_v42 = vpop.eup %2248  ;;  %v1293_v56 = vmul.f32 %v2247_v40, %v1292_v54 }
 0x31e   : > { %v1479_v0 = vmul.f32 %v2249_v42, %v1478_v60 }
 0x31f   : > { %1024 = vperm.xlu0 %2220, %v2825_v31  }
 0x322   : > { %2149 = vmatmul.msk.f32.vlgmr.msra.gmra.mxu1 %vm811_vm2, %v2241_v30 }
 0x324   : > { %v924_v34 = vpop.xlane.xlu1 %923 }
 0x325   : > { %v925_v35 = vadd.f32 %v924_v34, %v921_v33 }
 0x327   : > { %926 = vst.msk [vmem:[#allocation7 + $0x8] sm:$0xff] %vm752_vm3, %v925_v35  ;;  %1117 = vperm.xlu0 %2220, %v2245_v36  }
 0x32c   : > { %v1110_v38 = vpop.xlane.xlu1 %1109 }
 0x32d   : > { %v1111_v28 = vadd.f32 %v1110_v38, %v1107_v37 }
 0x32e   : > { %v2841_v61 = vld [vmem:[#allocation7 + $0x8] sm:$0xff] }
 0x32f   : > { %1112 = vst.msk [vmem:[#allocation7 + $0x18] sm:$0xff] %vm752_vm3, %v1111_v28  ;;  %vm1553_vm13 = vweird.f32 %v2841_v61 }
 0x333   : > { %v955_v43 = vpop.f32.mrf.mxu3  ;;  %1303 = vperm.xlu2 %2219, %v2247_v40  }
 0x334   : > { %v958_v17 = vadd.f32 %v955_v43, %v934_v41  ;;  %1489 = vperm.xlu1 %2218, %v2249_v42  }
 0x336   : > { %959 = vst.msk [vmem:[#allocation5 + $0x8] sm:$0xff] %vm506_vm1, %v958_v17  ;;  %v1600_v19 = vld [vmem:[#allocation7 + $0x18] sm:$0xff] }
 0x337   : > { %2250 = vrcp.f32 %v1600_v19  ;;  %v1612_v25 = vand.u32 2147483648, %v1600_v19  ;;  %v1610_v45 = vand.u32 2147483647, %v1600_v19  ;;  %vm1606_vm5 = vweird.f32 %v1600_v19 }
 0x338   : > { %2252 = vrcp.f32 %v2841_v61 }
 0x339   : > { %v1613_v48 = vor.u32 1.1754944e-38, %v1612_v25  ;;  %vm1611_vm7 = vcmp.eq.f32.partialorder %v1610_v45, 8.507059e+37  ;;  %v1300_v45 = vld [vmem:[#allocation5 + $0x28] sm:$0xff] }
 0x33b   : > { %v1141_v37 = vpop.f32.mrf.mxu3 }
 0x33d   : > { %v2251_v20 = vpop.eup %2250 }
 0x33e   : > { %v1602_v22 = vmul.f32 %v2251_v20, %v1600_v19  ;;  %vm1607_vm4 = vweird.f32 %v2251_v20  ;;  %v2850_v8 = vpop.eup %2252 }
 0x33f   : > { %vm1608_vm6 = vmor %vm1606_vm5, %vm1607_vm4  ;;  %v1549_v10 = vmul.f32 %v2850_v8, %v2841_v61  ;;  %vm1554_vm12 = vweird.f32 %v2850_v8 }
 0x340   : > { %v1603_v24 = vsub.f32 1.0, %v1602_v22  ;;  %v1557_v22 = vand.u32 2147483647, %v2841_v61  ;;  %vm2885_vm15 = vmor %vm1553_vm13, %vm1554_vm12 }
 0x341   : > { %v1550_v26 = vsub.f32 1.0, %v1549_v10 }
 0x342   : > { %v1604_v44 = vmul.f32 %v2251_v20, %v1603_v24  ;;  %v1559_v24 = vand.u32 2147483648, %v2841_v61  ;;  %vm1558_vm4 = vcmp.eq.f32.partialorder %v1557_v22, 8.507059e+37 }
 0x343   : > { %v1551_v34 = vmul.f32 %v2850_v8, %v1550_v26 }
 0x344   : > { %v1605_v46 = vadd.f32 %v2251_v20, %v1604_v44  ;;  %v1560_v60 = vor.u32 1.1754944e-38, %v1559_v24 }
 0x345   : > { %v1552_v43 = vadd.f32 %v2850_v8, %v1551_v34 }
 0x346   : > { %v1609_v50 = vsel %vm1608_vm6, %v2251_v20, %v1605_v46 }
 0x347   : > { %v1614_v52 = vsel %vm1611_vm7, %v1613_v48, %v1609_v50  ;;  %v1556_v54 = vsel %vm2885_vm15, %v2850_v8, %v1552_v43  ;;  %vm1529_vm7 = vweird.f32 %v2853_v16 }
 0x348   : > { %1618 = vperm.xlu1 %2218, %v1614_v52  }
 0x376   : > { %v1296_v57 = vpop.xlane.xlu2 %1295 }
 0x377   : > { %v1297_v59 = vadd.f32 %v1296_v57, %v1293_v56 }
 0x379   : > { %1298 = vst.msk [vmem:[#allocation7 + $0x28] sm:$0xff] %vm752_vm3, %v1297_v59  ;;  %v1114_v59 = vld [vmem:[#allocation5 + $0x18] sm:$0xff] }
 0x37e   : > { %v1482_v58 = vpop.xlane.xlu0 %1481 }
 0x37f   : > { %v1483_v4 = vadd.f32 %v1482_v58, %v1479_v0 }
 0x380   : > { %v1652_v6 = vld [vmem:[#allocation7 + $0x28] sm:$0xff] }
 0x381   : > { %1484 = vst.msk [vmem:[#allocation7 + $0x38] sm:$0xff] %vm752_vm3, %v1483_v4  ;;  %2254 = vrcp.f32 %v1652_v6  ;;  %v1664_v27 = vand.u32 2147483648, %v1652_v6  ;;  %v1662_v30 = vand.u32 2147483647, %v1652_v6  ;;  %vm1658_vm9 = vweird.f32 %v1652_v6 }
 0x382   : > { %2256 = vpow2.f32 %v1188_v1 }
 0x383   : > { %2258 = vpow2.f32 %v1374_v5  ;;  %v1665_v3 = vor.u32 1.1754944e-38, %v1664_v27  ;;  %vm1663_vm11 = vcmp.eq.f32.partialorder %v1662_v30, 8.507059e+37  ;;  %v1535_v27 = vand.u32 2147483648, %v2853_v16 }
 0x384   : > { %2260 = vrcp.f32 %v2853_v16 }
 0x385   : > { %v1327_v63 = vpop.f32.mrf.mxu3 }
 0x386   : > { %v1017_v55 = vpop.xlane.xlu2 %1016 }
 0x387   : > { %v2255_v12 = vpop.eup %2254  ;;  %v1018_v13 = vadd.f32 %v1017_v55, %v1014_v14 }
 0x388   : > { %v1654_v11 = vmul.f32 %v2255_v12, %v1652_v6  ;;  %v2857_v15 = vld [vmem:[#allocation7 + $0x38] sm:$0xff]  ;;  %v2860_v18 = vpop.eup %2256  ;;  %vm1659_vm8 = vweird.f32 %v2255_v12  ;;  %v1561_v6 = vsel %vm1558_vm4, %v1560_v60, %v1556_v54  ;;  %v1393_v60 = vld [vmem:[#allocation5 + $0x30] sm:$0xff] }
 0x389   : > { %1019 = vst.msk [vmem:[#allocation7 + $0x10] sm:$0xff] %vm752_vm3, %v1018_v13  ;;  %2262 = vrcp.f32 %v2857_v15  ;;  %v2864_v21 = vpop.eup %2258  ;;  %v1200_v53 = vmul.f32 %v2860_v18, %v1199_v23  ;;  %vm1660_vm10 = vmor %vm1658_vm9, %vm1659_vm8  ;;  %v1716_v25 = vand.u32 2147483648, %v2857_v15  ;;  %v1714_v48 = vand.u32 2147483647, %v2857_v15 }
 0x38a   : > { %v1655_v49 = vsub.f32 1.0, %v1654_v11  ;;  %v1386_v7 = vmul.f32 %v2864_v21, %v1385_v47  ;;  %v2868_v9 = vpop.eup %2260  ;;  %vm1710_vm2 = vweird.f32 %v2857_v15 }
 0x38b   : > { %v1525_v41 = vmul.f32 %v2868_v9, %v2853_v16  ;;  %v1717_v61 = vor.u32 1.1754944e-38, %v1716_v25  ;;  %vm1715_vm5 = vcmp.eq.f32.partialorder %v1714_v48, 8.507059e+37  ;;  %vm1530_vm6 = vweird.f32 %v2868_v9 }
 0x38c   : > { %v1656_v29 = vmul.f32 %v2255_v12, %v1655_v49  ;;  %vm2913_vm9 = vmor %vm1529_vm7, %vm1530_vm6 }
 0x38d   : > { %v1526_v58 = vsub.f32 1.0, %v1525_v41 }
 0x38e   : > { %v1203_v31 = vpop.xlane.xlu2 %1202  ;;  %v1389_v32 = vpop.xlane.xlu1 %1388  ;;  %v1657_v33 = vadd.f32 %v2255_v12, %v1656_v29 }
 0x38f   : > { %v2263_v35 = vpop.eup %2262  ;;  %v1204_v36 = vadd.f32 %v1203_v31, %v1200_v53  ;;  %v1390_v62 = vadd.f32 %v1389_v32, %v1386_v7  ;;  %v1048_v20 = vpop.f32.mrf.mxu1  ;;  %v1486_v32 = vld [vmem:[#allocation5 + $0x38] sm:$0xff]  ;;  %v1755_v53 = vld [vmem:[%s3181_s3 + $0xa0] sm:$0xff] }
 0x390   : > { %v1661_v38 = vsel %vm1660_vm10, %v2255_v12, %v1657_v33  ;;  %v1706_v28 = vmul.f32 %v2263_v35, %v2857_v15  ;;  %v2878_v19 = vld [vmem:[#allocation7 + $0x10] sm:$0xff]  ;;  %vm1711_vm14 = vweird.f32 %v2263_v35  ;;  %v1527_v12 = vmul.f32 %v2868_v9, %v1526_v58  ;;  %v1764_v58 = vld [vmem:[%s3181_s3 + $0xe8] sm:$0xff] }
 0x391   : > { %1205 = vst.msk [vmem:[#allocation7 + $0x20] sm:$0xff] %vm752_vm3, %v1204_v36  ;;  %v1025_v39 = vpop.permute.xlu0 %1024  ;;  %v1666_v40 = vsel %vm1663_vm11, %v1665_v3, %v1661_v38  ;;  %2264 = vrcp.f32 %v2878_v19  ;;  %v1533_v15 = vand.u32 2147483647, %v2853_v16  ;;  %v1588_v25 = vand.u32 2147483648, %v2878_v19 }
 0x392   : > { %1391 = vst.msk [vmem:[#allocation7 + $0x30] sm:$0xff] %vm752_vm3, %v1390_v62  ;;  %v1027_v42 = vmul.f32 %v1025_v39, %v1021_v2  ;;  %1670 = vperm.xlu0 %2220, %v1666_v40   ;;  %v1707_v17 = vsub.f32 1.0, %v1706_v28  ;;  %vm1712_vm3 = vmor %vm1710_vm2, %vm1711_vm14  ;;  %v1528_v49 = vadd.f32 %v2868_v9, %v1527_v12  ;;  %v1536_v2 = vor.u32 1.1754944e-38, %v1535_v27  ;;  %v1513_v40 = vpop.f32.mrf.mxu3 }
 0x393   : > { %vm2909_vm8 = vcmp.eq.f32.partialorder %v1533_v15, 8.507059e+37 }
 0x394   : > { %v1051_v44 = vadd.f32 %v1048_v20, %v1027_v42  ;;  %v1708_v46 = vmul.f32 %v2263_v35, %v1707_v17 }
 0x396   : > { %1052 = vst.msk [vmem:[#allocation5 + $0x10] sm:$0xff] %vm506_vm1, %v1051_v44  ;;  %v1304_v52 = vpop.permute.xlu2 %1303  ;;  %v1709_v56 = vadd.f32 %v2263_v35, %v1708_v46  ;;  %v1586_v44 = vand.u32 2147483647, %v2878_v19  ;;  %v1589_v46 = vor.u32 1.1754944e-38, %v1588_v25 }
 0x397   : > { %v1306_v57 = vmul.f32 %v1304_v52, %v1300_v45  ;;  %v2895_v55 = vpop.eup %2264 }
 0x398   : > { %v1713_v0 = vsel %vm1712_vm3, %v2263_v35, %v1709_v56  ;;  %v1628_v1 = vld [vmem:[#allocation7 + $0x20] sm:$0xff]  ;;  %v1578_v13 = vmul.f32 %v2895_v55, %v2878_v19  ;;  %v1532_v35 = vsel %vm2913_vm9, %v2868_v9, %v1528_v49  ;;  %vm1583_vm4 = vweird.f32 %v2895_v55  ;;  %v1234_v56 = vpop.f32.mrf.mxu1  ;;  %v1546_v49 = vld [vmem:[#allocation5 + $0x8] sm:$0xff] }
 0x399   : > { %v1330_v4 = vadd.f32 %v1327_v63, %v1306_v57  ;;  %v1118_v5 = vpop.permute.xlu0 %1117  ;;  %v1718_v51 = vsel %vm1715_vm5, %v1717_v61, %v1713_v0  ;;  %2266 = vrcp.f32 %v1628_v1  ;;  %v1680_v8 = vld [vmem:[#allocation7 + $0x30] sm:$0xff]  ;;  %v1640_v7 = vand.u32 2147483648, %v1628_v1 }
 0x39a   : > { %v1120_v14 = vmul.f32 %v1118_v5, %v1114_v59  ;;  %1565 = vperm.xlu0 %2220, %v1561_v6   ;;  %1722 = vperm.xlu2 %2219, %v1718_v51   ;;  %2268 = vrcp.f32 %v1680_v8  ;;  %v1579_v30 = vsub.f32 1.0, %v1578_v13  ;;  %v1692_v34 = vand.u32 2147483648, %v1680_v8  ;;  %v1766_v59 = vld [vmem:[%s3181_s3 + $0xf8] sm:$0xff]  ;;  %v1761_v6 = vld [vmem:[%s3181_s3 + $0xd0] sm:$0xff] }
 0x39b   : > { %1331 = vst.msk [vmem:[#allocation5 + $0x28] sm:$0xff] %vm506_vm1, %v1330_v4  ;;  %v1690_v36 = vand.u32 2147483647, %v1680_v8  ;;  %vm1634_vm12 = vweird.f32 %v1628_v1  ;;  %v1641_v28 = vor.u32 1.1754944e-38, %v1640_v7  ;;  %vm1686_vm14 = vweird.f32 %v1680_v8  ;;  %1823 = vmatpush.msrb.mxu1 %v1766_v59  ;;  %v1763_v4 = vld [vmem:[%s3181_s3 + $0xe0] sm:$0xff]  ;;  %v1762_v5 = vld [vmem:[%s3181_s3 + $0xd8] sm:$0xff] }
 0x39c   : > { %v1144_v10 = vadd.f32 %v1141_v37, %v1120_v14  ;;  %v1580_v37 = vmul.f32 %v2895_v55, %v1579_v30  ;;  %v1537_v41 = vsel %vm2909_vm8, %v1536_v2, %v1532_v35  ;;  %v1693_v9 = vor.u32 1.1754944e-38, %v1692_v34  ;;  %v1756_v30 = vld [vmem:[%s3181_s3 + $0xa8] sm:$0xff]  ;;  %v1754_v7 = vld [vmem:[%s3181_s3 + $0x98] sm:$0xff]  ;;  %v1751_v35 = vld [vmem:[%s3181_s3 + $0x80] sm:$0xff] }
 0x39d   : > { %vm1691_vm3 = vcmp.eq.f32.partialorder %v1690_v36, 8.507059e+37  ;;  %vm1582_vm5 = vweird.f32 %v2878_v19  ;;  %vm1587_vm7 = vcmp.eq.f32.partialorder %v1586_v44, 8.507059e+37  ;;  %v1765_v19 = vld [vmem:[%s3181_s3 + $0xf0] sm:$0xff]  ;;  %v1782_v2 = vld [vmem:[%s3181_s3 + $0x178] sm:$0xff]  ;;  %v1743_v44 = vld [vmem:[%s3181_s3 + $0x40] sm:$0xff]  ;;  %vm1573_vm8 = vcmask 1048064  }
 0x39e   : > { %1145 = vst.msk [vmem:[#allocation5 + $0x18] sm:$0xff] %vm506_vm1, %v1144_v10  ;;  %v1581_v24 = vadd.f32 %v2895_v55, %v1580_v37  ;;  %vm1584_vm6 = vmor %vm1582_vm5, %vm1583_vm4  ;;  %1824 = vmatpush.msrb.mxu1 %v1765_v19  ;;  %v1759_v10 = vld [vmem:[%s3181_s3 + $0xc0] sm:$0xff]  ;;  %v1749_v36 = vld [vmem:[%s3181_s3 + $0x70] sm:$0xff]  ;;  %1843 = vmatpush.msrb.mxu2 %v1782_v2 }
 0x39f   : > { %v2267_v11 = vpop.eup %2266  ;;  %v1522_v37 = vld [vmem:[#allocation5] sm:$0xff]  ;;  %v1778_v59 = vld [vmem:[%s3181_s3 + $0x158] sm:$0xff] }
 0x3a0   : > { %v2269_v23 = vpop.eup %2268  ;;  %v1630_v47 = vmul.f32 %v2267_v11, %v1628_v1  ;;  %vm1635_vm10 = vweird.f32 %v2267_v11  ;;  %v1585_v45 = vsel %vm1584_vm6, %v2895_v55, %v1581_v24  ;;  %v1420_v0 = vpop.f32.mrf.mxu1  ;;  %1825 = vmatpush.msrb.mxu1 %v1764_v58  ;;  %v1760_v55 = vld [vmem:[%s3181_s3 + $0xc8] sm:$0xff]  ;;  %v1575_v24 = vld [vmem:[#allocation5 + $0x10] sm:$0xff]  ;;  %v1798_v19 = vld [vmem:[%s3181_s3 + $0x1f8] sm:$0xff] }
 0x3a1   : > { %v1682_v26 = vmul.f32 %v2269_v23, %v1680_v8  ;;  %vm1687_vm11 = vweird.f32 %v2269_v23  ;;  %vm1636_vm13 = vmor %vm1634_vm12, %vm1635_vm10  ;;  %v1590_v48 = vsel %vm1587_vm7, %v1589_v46, %v1585_v45  ;;  %v1742_v46 = vld [vmem:[%s3181_s3 + $0x38] sm:$0xff]  ;;  %1863 = vmatpush.msrb.mxu3 %v1798_v19  ;;  %v1776_v58 = vld [vmem:[%s3181_s3 + $0x148] sm:$0xff] }
 0x3a2   : > { %1210 = vperm.xlu0 %2220, %v2860_v18   ;;  %1396 = vperm.xlu2 %2219, %v2864_v21   ;;  %v1631_v29 = vsub.f32 1.0, %v1630_v47  ;;  %v1638_v21 = vand.u32 2147483647, %v1628_v1  ;;  %vm1688_vm2 = vmor %vm1686_vm14, %vm1687_vm11  ;;  %v1651_v51 = vld [vmem:[#allocation5 + $0x28] sm:$0xff] }
 0x3a3   : > { %v1683_v31 = vsub.f32 1.0, %v1682_v26  ;;  %1826 = vmatpush.msrb.mxu1 %v1763_v4  ;;  %v1735_v4 = vld [vmem:[%s3181_s3] sm:$0xff] }
 0x3a4   : > { %v1632_v18 = vmul.f32 %v2267_v11, %v1631_v29  ;;  %vm1639_vm15 = vcmp.eq.f32.partialorder %v1638_v21, 8.507059e+37  ;;  %v1752_v21 = vld [vmem:[%s3181_s3 + $0x88] sm:$0xff] }
 0x3a5   : > { %v1684_v16 = vmul.f32 %v2269_v23, %v1683_v31  ;;  %v1599_v52 = vld [vmem:[#allocation5 + $0x18] sm:$0xff]  ;;  %1827 = vmatpush.msrb.mxu1 %v1762_v5  ;;  %v1207_v31 = vld [vmem:[#allocation5 + $0x20] sm:$0xff] }
 0x3a6   : > { %v1490_v62 = vpop.permute.xlu1 %1489  ;;  %v1633_v3 = vadd.f32 %v2267_v11, %v1632_v18  ;;  %v1775_v5 = vld [vmem:[%s3181_s3 + $0x140] sm:$0xff] }
 0x3a7   : > { %v1492_v38 = vmul.f32 %v1490_v62, %v1486_v32  ;;  %v1685_v39 = vadd.f32 %v2269_v23, %v1684_v16  ;;  %1828 = vmatpush.msrb.mxu1 %v1761_v6  ;;  %v1753_v32 = vld [vmem:[%s3181_s3 + $0x90] sm:$0xff]  ;;  %v1750_v16 = vld [vmem:[%s3181_s3 + $0x78] sm:$0xff]  ;;  %v1748_v62 = vld [vmem:[%s3181_s3 + $0x68] sm:$0xff] }
 0x3a8   : > { %v1637_v42 = vsel %vm1636_vm13, %v2267_v11, %v1633_v3  ;;  %v1758_v11 = vld [vmem:[%s3181_s3 + $0xb8] sm:$0xff]  ;;  %1803 = vmatpush.msrb.mxu0 %v1750_v16  ;;  %v1781_v3 = vld [vmem:[%s3181_s3 + $0x170] sm:$0xff]  ;;  %v1795_v6 = vld [vmem:[%s3181_s3 + $0x1e0] sm:$0xff] }
 0x3a9   : > { %v1516_v43 = vadd.f32 %v1513_v40, %v1492_v38  ;;  %v1642_v17 = vsel %vm1639_vm15, %v1641_v28, %v1637_v42  ;;  %v1689_v20 = vsel %vm1688_vm2, %v2269_v23, %v1685_v39  ;;  %1829 = vmatpush.msrb.mxu1 %v1760_v55  ;;  %v1757_v23 = vld [vmem:[%s3181_s3 + $0xb0] sm:$0xff]  ;;  %v1747_v28 = vld [vmem:[%s3181_s3 + $0x60] sm:$0xff]  ;;  %v1780_v40 = vld [vmem:[%s3181_s3 + $0x168] sm:$0xff]  ;;  %1844 = vmatpush.msrb.mxu2 %v1781_v3 }
 0x3aa   : > { %1541 = vperm.xlu0 %2220, %v1537_v41   ;;  %1646 = vperm.xlu1 %2218, %v1642_v17   ;;  %v1694_v22 = vsel %vm1691_vm3, %v1693_v9, %v1689_v20  ;;  %v1746_v41 = vld [vmem:[%s3181_s3 + $0x58] sm:$0xff]  ;;  %v1779_v42 = vld [vmem:[%s3181_s3 + $0x160] sm:$0xff]  ;;  %v1745_v17 = vld [vmem:[%s3181_s3 + $0x50] sm:$0xff] }
 0x3ab   : > { %1517 = vst.msk [vmem:[#allocation5 + $0x38] sm:$0xff] %vm506_vm1, %v1516_v43  ;;  %1698 = vperm.xlu2 %2219, %v1694_v22   ;;  %1830 = vmatpush.msrb.mxu1 %v1759_v10  ;;  %v1744_v22 = vld [vmem:[%s3181_s3 + $0x48] sm:$0xff]  ;;  %v1793_v55 = vld [vmem:[%s3181_s3 + $0x1d0] sm:$0xff] }
 0x3ac   : > { %1804 = vmatpush.msrb.mxu0 %v1749_v36  ;;  %1845 = vmatpush.msrb.mxu2 %v1780_v40  ;;  %v1772_v10 = vld [vmem:[%s3181_s3 + $0x128] sm:$0xff]  ;;  %v2221_v36 = vld [vmem:[%s3182_s4] ss:$0 sm:$0xff] }
 0x3ad   : > { %1831 = vmatpush.msrb.mxu1 %v1758_v11  ;;  %v1791_v11 = vld [vmem:[%s3181_s3 + $0x1c0] sm:$0xff] }
 0x3ae   : > { %1805 = vmatpush.msrb.mxu0 %v1748_v62  ;;  %1846 = vmatpush.msrb.mxu2 %v1779_v42 }
 0x3af   : > { %1832 = vmatpush.msrb.mxu1 %v1757_v23  ;;  %v1790_v23 = vld [vmem:[%s3181_s3 + $0x1b8] sm:$0xff] }
 0x3b0   : > { %1806 = vmatpush.msrb.mxu0 %v1747_v28  ;;  %1847 = vmatpush.msrb.mxu2 %v1778_v59 }
 0x3b1   : > { %1833 = vmatpush.msrb.mxu1 %v1756_v30  ;;  %v1787_v30 = vld [vmem:[%s3181_s3 + $0x1a0] sm:$0xff] }
 0x3b2   : > { %1594 = vperm.xlu0 %2220, %v1590_v48   ;;  %v1703_v47 = vld [vmem:[#allocation5 + $0x38] sm:$0xff]  ;;  %1807 = vmatpush.msrb.mxu0 %v1746_v41  ;;  %v1741_v48 = vld [vmem:[%s3181_s3 + $0x30] sm:$0xff] }
 0x3b3   : > { %1834 = vmatpush.msrb.mxu1 %v1755_v53  ;;  %v1786_v53 = vld [vmem:[%s3181_s3 + $0x198] sm:$0xff] }
 0x3b4   : > { %1808 = vmatpush.msrb.mxu0 %v1745_v17 }
 0x3b5   : > { %1835 = vmatpush.msrb.mxu1 %v1754_v7  ;;  %v1785_v7 = vld [vmem:[%s3181_s3 + $0x190] sm:$0xff] }
 0x3b6   : > { %1809 = vmatpush.msrb.mxu0 %v1744_v22 }
 0x3b7   : > { %1836 = vmatpush.msrb.mxu1 %v1753_v32  ;;  %v1783_v32 = vld [vmem:[%s3181_s3 + $0x180] sm:$0xff] }
 0x3b8   : > { %1810 = vmatpush.msrb.mxu0 %v1743_v44 }
 0x3b9   : > { %1837 = vmatpush.msrb.mxu1 %v1752_v21 }
 0x3ba   : > { %v1619_v50 = vpop.permute.xlu1 %1618  ;;  %1811 = vmatpush.msrb.mxu0 %v1742_v46 }
 0x3bb   : > { %v1621_v54 = vmul.f32 %v1619_v50, %v1599_v52  ;;  %1838 = vmatpush.msrb.mxu1 %v1751_v35  ;;  %v1740_v50 = vld [vmem:[%s3181_s3 + $0x28] sm:$0xff]  ;;  %v1739_v52 = vld [vmem:[%s3181_s3 + $0x20] sm:$0xff] }
 0x3bc   : > { %1812 = vmatpush.msrb.mxu0 %v1741_v48 }
 0x3bd   : > { %1623 = vrot.lane.b32.xlu0 %v1621_v54, %s2350_s14 }
 0x3be   : > { %1813 = vmatpush.msrb.mxu0 %v1740_v50 }
 0x3c0   : > { %1814 = vmatpush.msrb.mxu0 %v1739_v52 }
 0x3f4   : > { %v1723_v57 = vpop.permute.xlu2 %1722 }
 0x3f5   : > { %v1725_v27 = vmul.f32 %v1723_v57, %v1703_v47  ;;  %v1738_v57 = vld [vmem:[%s3181_s3 + $0x18] sm:$0xff]  ;;  %v1769_v47 = vld [vmem:[%s3181_s3 + $0x110] sm:$0xff] }
 0x3f6   : > { %1815 = vmatpush.msrb.mxu0 %v1738_v57 }
 0x3fc   : > { %v1397_v61 = vpop.permute.xlu2 %1396 }
 0x3fd   : > { %v1399_v63 = vmul.f32 %v1397_v61, %v1393_v60  ;;  %v1737_v60 = vld [vmem:[%s3181_s3 + $0x10] sm:$0xff] }
 0x3fe   : > { %v1777_v61 = vld [vmem:[%s3181_s3 + $0x150] sm:$0xff]  ;;  %1816 = vmatpush.msrb.mxu0 %v1737_v60 }
 0x3ff   : > { %v1423_v1 = vadd.f32 %v1420_v0, %v1399_v63  ;;  %v1797_v63 = vld [vmem:[%s3181_s3 + $0x1f0] sm:$0xff]  ;;  %v1736_v0 = vld [vmem:[%s3181_s3 + $0x8] sm:$0xff]  ;;  %1848 = vmatpush.msrb.mxu2 %v1777_v61 }
 0x400   : > { %1864 = vmatpush.msrb.mxu3 %v1797_v63  ;;  %1817 = vmatpush.msrb.mxu0 %v1736_v0 }
 0x401   : > { %1424 = vst.msk [vmem:[#allocation5 + $0x30] sm:$0xff] %vm506_vm1, %v1423_v1  ;;  %v1796_v1 = vld [vmem:[%s3181_s3 + $0x1e8] sm:$0xff]  ;;  %1849 = vmatpush.msrb.mxu2 %v1776_v58 }
 0x402   : > { %1865 = vmatpush.msrb.mxu3 %v1796_v1  ;;  %1818 = vmatpush.msrb.mxu0 %v1735_v4 }
 0x403   : > { %1850 = vmatpush.msrb.mxu2 %v1775_v5 }
 0x404   : > { %v1671_v8 = vpop.permute.xlu0 %1670  ;;  %1866 = vmatpush.msrb.mxu3 %v1795_v6 }
 0x405   : > { %v1673_v14 = vmul.f32 %v1671_v8, %v1651_v51  ;;  %v1699_v13 = vpop.permute.xlu2 %1698  ;;  %v1774_v51 = vld [vmem:[%s3181_s3 + $0x138] sm:$0xff] }
 0x406   : > { %v1794_v8 = vld [vmem:[%s3181_s3 + $0x1d8] sm:$0xff]  ;;  %1851 = vmatpush.msrb.mxu2 %v1774_v51 }
 0x407   : > { %1675 = vrot.lane.b32.xlu1 %v1673_v14, %s2350_s14  ;;  %v1773_v14 = vld [vmem:[%s3181_s3 + $0x130] sm:$0xff]  ;;  %1867 = vmatpush.msrb.mxu3 %v1794_v8 }
 0x408   : > { %v1679_v12 = vld [vmem:[#allocation5 + $0x30] sm:$0xff]  ;;  %1852 = vmatpush.msrb.mxu2 %v1773_v14 }
 0x409   : > { %v1701_v15 = vmul.f32 %v1699_v13, %v1679_v12  ;;  %v1792_v12 = vld [vmem:[%s3181_s3 + $0x1c8] sm:$0xff]  ;;  %1868 = vmatpush.msrb.mxu3 %v1793_v55  ;;  %v1771_v13 = vld [vmem:[%s3181_s3 + $0x120] sm:$0xff] }
 0x40a   : > { %1853 = vmatpush.msrb.mxu2 %v1772_v10 }
 0x40b   : > { %1702 = vst.msk [vmem:[#allocation8 + $0x18] sm:$0xff] %vm506_vm1, %v1701_v15  ;;  %1869 = vmatpush.msrb.mxu3 %v1792_v12  ;;  %v1770_v15 = vld [vmem:[%s3181_s3 + $0x118] sm:$0xff] }
 0x40c   : > { %v1566_v26 = vpop.permute.xlu0 %1565  ;;  %1854 = vmatpush.msrb.mxu2 %v1771_v13 }
 0x40d   : > { %v1568_v29 = vmul.f32 %v1566_v26, %v1546_v49  ;;  %1870 = vmatpush.msrb.mxu3 %v1791_v11  ;;  %v1789_v49 = vld [vmem:[%s3181_s3 + $0x1b0] sm:$0xff]  ;;  %v1768_v26 = vld [vmem:[%s3181_s3 + $0x108] sm:$0xff] }
 0x40e   : > { %1855 = vmatpush.msrb.mxu2 %v1770_v15 }
 0x40f   : > { %1727 = vrot.lane.b32.xlu1 %v1725_v27, %s2350_s14  ;;  %1570 = vrot.lane.b32.xlu2 %v1568_v29, %s2350_s14  ;;  %v1788_v27 = vld [vmem:[%s3181_s3 + $0x1a8] sm:$0xff]  ;;  %v1767_v29 = vld [vmem:[%s3181_s3 + $0x100] sm:$0xff] }
 0x410   : > { %1871 = vmatpush.msrb.mxu3 %v1790_v23  ;;  %1856 = vmatpush.msrb.mxu2 %v1769_v47 }
 0x412   : > { %1872 = vmatpush.msrb.mxu3 %v1789_v49  ;;  %1857 = vmatpush.msrb.mxu2 %v1768_v26 }
 0x414   : > { %v1211_v33 = vpop.permute.xlu0 %1210  ;;  %1873 = vmatpush.msrb.mxu3 %v1788_v27  ;;  %1858 = vmatpush.msrb.mxu2 %v1767_v29 }
 0x415   : > { %v1213_v18 = vmul.f32 %v1211_v33, %v1207_v31  ;;  %v1784_v31 = vld [vmem:[%s3181_s3 + $0x188] sm:$0xff] }
 0x416   : > { %1874 = vmatpush.msrb.mxu3 %v1787_v30 }
 0x417   : > { %v1237_v34 = vadd.f32 %v1234_v56, %v1213_v18 }
 0x418   : > { %1875 = vmatpush.msrb.mxu3 %v1786_v53 }
 0x419   : > { %1238 = vst.msk [vmem:[#allocation5 + $0x20] sm:$0xff] %vm506_vm1, %v1237_v34 }
 0x41a   : > { %1876 = vmatpush.msrb.mxu3 %v1785_v7 }
 0x41c   : > { %v1542_v38 = vpop.permute.xlu0 %1541  ;;  %v1647_v9 = vpop.permute.xlu1 %1646  ;;  %1877 = vmatpush.msrb.mxu3 %v1784_v31 }
 0x41d   : > { %v1544_v39 = vmul.f32 %v1542_v38, %v1522_v37 }
 0x41e   : > { %1878 = vmatpush.msrb.mxu3 %v1783_v32 }
 0x41f   : > { %1545 = vst.msk [vmem:[#allocation8] sm:$0xff] %vm506_vm1, %v1544_v39 }
 0x420   : > { %v1627_v43 = vld [vmem:[#allocation5 + $0x20] sm:$0xff] }
 0x421   : > { %v1649_v20 = vmul.f32 %v1647_v9, %v1627_v43 }
 0x423   : > { %1650 = vst.msk [vmem:[#allocation8 + $0x10] sm:$0xff] %vm506_vm1, %v1649_v20 }
 0x424   : > { %v1595_v25 = vpop.permute.xlu0 %1594 }
 0x425   : > { %v1597_v45 = vmul.f32 %v1595_v25, %v1575_v24 }
 0x427   : > { %1598 = vst.msk [vmem:[#allocation8 + $0x8] sm:$0xff] %vm506_vm1, %v1597_v45 }
 0x42f   : > { %v1624_v54 = vpop.permute.xlu0 %1623 }
 0x430   : > { %1626 = vst.msk [vmem:[#allocation8 + $0x8] sm:$0xff] %vm1573_vm8, %v1624_v54 }
 0x437   : > { %v1732_v56 = vld [vmem:[#allocation8 + $0x8] sm:$0xff] }
 0x438   : > { %1839 = vmatmul.f32.vlgmr.msrb.gmra.mxu1 %v1732_v56 }
 0x469   : > { %v1571_v33 = vpop.permute.xlu2 %1570 }
 0x46a   : > { %1574 = vst.msk [vmem:[#allocation8] sm:$0xff] %vm1573_vm8, %v1571_v33 }
 0x471   : > { %v1731_v18 = vld [vmem:[#allocation8] sm:$0xff] }
 0x472   : > { %1819 = vmatmul.f32.vlgmr.msrb.gmra.mxu0 %v1731_v18 }
 0x479   : > { %v1676_v21 = vpop.permute.xlu1 %1675 }
 0x47a   : > { %1678 = vst.msk [vmem:[#allocation8 + $0x10] sm:$0xff] %vm1573_vm8, %v1676_v21 }
 0x481   : > { %v1728_v34 = vpop.permute.xlu1 %1727  ;;  %v1733_v35 = vld [vmem:[#allocation8 + $0x10] sm:$0xff] }
 0x482   : > { %1730 = vst.msk [vmem:[#allocation8 + $0x18] sm:$0xff] %vm1573_vm8, %v1728_v34  ;;  %1859 = vmatmul.f32.vlgmr.msrb.gmra.mxu2 %v1733_v35 }
 0x489   : > { %v1734_v16 = vld [vmem:[#allocation8 + $0x18] sm:$0xff] }
 0x48a   : > { %1879 = vmatmul.f32.vlgmr.msrb.gmra.mxu3 %v1734_v16 }
 0x4b5   : > { %v1840_v3 = vpop.f32.mrf.mxu1 }
 0x4ef   : > { %v1820_v62 = vpop.f32.mrf.mxu0 }
 0x4f0   : > { %v1821_v2 = vadd.f32 %v2221_v36, %v1820_v62 }
 0x4f2   : > { %v1841_v38 = vadd.f32 %v1840_v3, %v1821_v2 }
 0x505   : > { %v1860_v37 = vpop.f32.mrf.mxu2 }
 0x506   : > { %v1861_v28 = vadd.f32 %v1860_v37, %v1841_v38 }
 0x50d   : > { %v1880_v39 = vpop.f32.mrf.mxu3 }
 0x50e   : > { %v1881_v40 = vadd.f32 %v1880_v39, %v1861_v28 }
 0x510   : > { %1884 = vst.msk [vmem:[%s275_s17] sm:$0xff] %vm331_vm0, %v1881_v40 }
 0x511   : > { %2297 = shalt.err (!%p2294_p5)
}
 0x512   : > { %2159 = dma.vmem_to_hbm [thread:$0]  (%p2424_p4), %s1900_s25, 128, %s1902_s24, %s1886_s21  }
 0x513 PF: > { %p2165_p6 = scmp.ge.s32.totalorder %s2348_s23, 2  ;;  %s1913_s10 = sand.u32 1, %s2328_s18  }
 0x514   : > { %s1914_s13 = scalar_lea.sflag [#allocation11], %s1913_s10 }
 0x515   : > { %p2162_p7 = pnand %p2165_p6, %p2431_p8 }
 0x517   : > { %p2163_p9 = pneg %p2162_p7 }
 0x519   : > { %2323 = dma.done.wait (%p2163_p9), %s1914_s13, 128  }
 0x51a   : > { %2325 = vsyncadd (%p2163_p9), %s1914_s13, 4294967168  ;;  %s18_s23 = sadd.s32 1, %s2348_s23   ;;  %s3192_s18 = smov %s2332_s19 }
 0x51b   : > { %p15_p10 = scmp.ge.s32.totalorder %s18_s23, 4   ;;  %s3193_s19 = smov %s2336_s20 }
 0x51c   : > { %s3194_s20 = smov %s2437_s6  ;;  %s3195_s21 = smov %s2344_s22 }
 0x51d   : > { %s3196_s22 = smov %s3198_s26  ;;  %17 = sbr.rel (!%p15_p10) target bundleno = 4 (0x4), region = 157 }
 0x522   :  { %1920 = vsyncpa [#allocation11], 1 }
 0x523   :  { %1922 = vsyncpa [#allocation11 + $0x1], 1 }

</bundles_post_ra>
